<compile_context>
chip_gen: v7x
topology: tpu7x:2x2x1
jax: 0.10.0
libtpu: 0.0.40
codegen_flags: <defaults>
</compile_context>

<pallas_src>
import dataclasses
import functools
import math

import jax
import jax.numpy as jnp
from jax import lax
from jax.experimental import pallas as pl
from jax.experimental.pallas import tpu as pltpu


# ----------------------------------------------------------------------------
# Config
# ----------------------------------------------------------------------------
@dataclasses.dataclass
class TransformerConfig:
    n_head: int
    hidden_size: int = 32
    num_layers: int = 2
    max_sequence_length: int = 16
    vocab_size: int = 64
    dropout: float = 0.0
    layer_norm_epsilon: float = 1e-5
    use_cache: bool = True
    architecture: str = "variant1"


# ----------------------------------------------------------------------------
# In-kernel helpers (pure f32 math on VMEM-resident values)
# ----------------------------------------------------------------------------
def _erf_f32(x):
    # Abramowitz & Stegun 7.1.26 rational approximation of erf (|err| < 1.5e-7).
    a1, a2, a3, a4, a5 = 0.254829592, -0.284496736, 1.421413741, -1.453152027, 1.061405429
    p = 0.3275911
    sign = jnp.where(x >= 0.0, 1.0, -1.0)
    ax = jnp.abs(x)
    t = 1.0 / (1.0 + p * ax)
    poly = ((((a5 * t + a4) * t + a3) * t + a2) * t + a1) * t
    return sign * (1.0 - poly * jnp.exp(-ax * ax))


def _gelu(x):
    # torch.nn.functional.gelu default is the exact (erf-based) form.
    return 0.5 * x * (1.0 + _erf_f32(x * (1.0 / math.sqrt(2.0))))


def _layernorm(x, g, b, eps):
    mu = jnp.mean(x, axis=-1, keepdims=True)
    var = jnp.mean(jnp.square(x - mu), axis=-1, keepdims=True)
    return (x - mu) * lax.rsqrt(var + eps) * g + b


# ----------------------------------------------------------------------------
# Fully fused forward kernel.
#   Grid: (splits,) over batch chunks.  Each step handles block_batch*S rows.
#   ids_ref     : (B, S) int32 in SMEM (scalar prefetch)
#   emb/pos/...  : whole-array VMEM blocks, constant index_map (resident)
#   out_ref     : (block_batch, S, Vpad) lane-dense logits block
#   x_scr       : (block_batch*S, H) f32 VMEM scratch (embedding assembly)
# ----------------------------------------------------------------------------
def _fused_transformer_kernel(
    ids_ref,
    emb_ref, pos_ref,
    ln1_g_ref, ln1_b_ref,
    q_w_ref, q_b_ref, k_w_ref, k_b_ref, v_w_ref, v_b_ref,
    proj_w_ref, proj_b_ref,
    ln2_g_ref, ln2_b_ref,
    fc1_w_ref, fc1_b_ref, fc2_w_ref, fc2_b_ref,
    lnf_g_ref, lnf_b_ref, lmh_w_ref,
    out_ref,
    x_scr,
    *, num_layers, n_head, seq_len, block_batch, eps):
    S = seq_len
    NH = n_head
    H = emb_ref.shape[1]

    g = pl.program_id(0)

    # ---------------- fused token + positional embedding gather ----------------
    # TODO(synk): for large S / large vocab, replace the row-by-row dynamic
    # gather with a DMA gather or one-hot matmul.
    for b in range(block_batch):                       # static
        gb = g * block_batch + b                       # global batch index
        base = b * S
        for s in range(S):                             # static
            tok = ids_ref[gb, s]                       # SMEM scalar
            x_scr[base + s:base + s + 1, :] = (
                emb_ref[pl.ds(tok, 1), :] + pos_ref[s:s + 1, :]
            ).astype(jnp.float32)

    x = x_scr[...]                                     # (R, H), R = block_batch*S

    # TODO(synk): attention_mask / past_key_values / use_cache paths are not
    # implemented (non-causal full-block inference, matching
    # F.scaled_dot_product_attention(attn_mask=None), dropout=0).
    # TODO(synk): for large num_layers, switch to lax.fori_loop over li and
    # stream per-layer weights via an 'arbitrary' L grid axis / emit_pipeline
    # (needed before v7x's 64 MiB VMEM becomes a constraint).
    for li in range(num_layers):                       # static unrolled loop
        # ---------------- attention block ----------------
        normed = _layernorm(x, ln1_g_ref[li:li + 1, :], ln1_b_ref[li:li + 1, :], eps)

        attn_acc = [jnp.zeros((S, H), jnp.float32) for _ in range(block_batch)]
        for h in range(NH):                            # static head loop; no lane slices
            lh = li * NH + h                           # index into (L*NH, ...) stacks
            # per-head projections over all rows at once (M = block_batch*S)
            qh = jnp.dot(normed, q_w_ref[lh], preferred_element_type=jnp.float32) + q_b_ref[lh]
            kh = jnp.dot(normed, k_w_ref[lh], preferred_element_type=jnp.float32) + k_b_ref[lh]
            vh = jnp.dot(normed, v_w_ref[lh], preferred_element_type=jnp.float32) + v_b_ref[lh]
            for b in range(block_batch):               # static per-batch scores
                rows = slice(b * S, (b + 1) * S)       # sublane-aligned value slice
                # scale already folded into q_w/q_b at pack time
                scores = lax.dot_general(
                    qh[rows], kh[rows],
                    dimension_numbers=(((1,), (1,)), ((), ())),
                    preferred_element_type=jnp.float32)             # (S, S)
                scores = scores - jnp.max(scores, axis=-1, keepdims=True)
                p = jnp.exp(scores)
                p = p * pl.reciprocal(jnp.sum(p, axis=-1, keepdims=True), approx=True)
                ctx = jnp.dot(p, vh[rows], preferred_element_type=jnp.float32)       # (S, HD)
                # head concat folded into the proj matmul accumulation
                attn_acc[b] = attn_acc[b] + jnp.dot(
                    ctx, proj_w_ref[lh], preferred_element_type=jnp.float32)         # (S, H)

        attn = attn_acc[0] if block_batch == 1 else jnp.concatenate(attn_acc, axis=0)
        x = x + attn + proj_b_ref[li:li + 1, :]

        # ---------------- MLP block ----------------
        normed = _layernorm(x, ln2_g_ref[li:li + 1, :], ln2_b_ref[li:li + 1, :], eps)
        h1 = jnp.dot(normed, fc1_w_ref[li], preferred_element_type=jnp.float32)
        h1 = _gelu(h1 + fc1_b_ref[li:li + 1, :])                                     # (R, 4H)
        h2 = jnp.dot(h1, fc2_w_ref[li], preferred_element_type=jnp.float32)
        x = x + h2 + fc2_b_ref[li:li + 1, :]

    # ---------------- final LN + lm_head (no bias, lane-dense padded V) ----------------
    normed = _layernorm(x, lnf_g_ref[...], lnf_b_ref[...], eps)
    logits = jnp.dot(normed, lmh_w_ref[...], preferred_element_type=jnp.float32)     # (R, Vpad)
    for b in range(block_batch):
        out_ref[b] = logits[b * S:(b + 1) * S, :].astype(out_ref.dtype)


def _resident_spec(shape):
    """Whole-array VMEM block, constant across the grid (stays resident)."""
    nd = len(shape)
    return pl.BlockSpec(shape, lambda g, ids_ref, nd=nd: (0,) * nd)


_WEIGHT_ORDER = (
    "embedding", "position_embedding",
    "ln1_g", "ln1_b",
    "q_w", "q_b", "k_w", "k_b", "v_w", "v_b",
    "proj_w", "proj_b",
    "ln2_g", "ln2_b",
    "fc1_w", "fc1_b", "fc2_w", "fc2_b",
    "ln_f_g", "ln_f_b", "lm_head_w",
)


# ----------------------------------------------------------------------------
# Parameter init (mirrors nn.Linear / nn.Embedding / nn.LayerNorm defaults)
# ----------------------------------------------------------------------------
def _dense_init(key, out_f, in_f):
    kw, kb = jax.random.split(key)
    bound = 1.0 / math.sqrt(in_f)
    w = jax.random.uniform(kw, (out_f, in_f), jnp.float32, -bound, bound)
    b = jax.random.uniform(kb, (out_f,), jnp.float32, -bound, bound)
    return w, b


def init_transformer_params(key, cfg: TransformerConfig):
    H, V, L, P = cfg.hidden_size, cfg.vocab_size, cfg.num_layers, cfg.max_sequence_length
    keys = jax.random.split(key, 3 + L)
    params = {
        "embedding": jax.random.normal(keys[0], (V, H), jnp.float32),
        "position_embedding": jax.random.normal(keys[1], (P, H), jnp.float32),
        "ln_f_g": jnp.ones((H,), jnp.float32),
        "ln_f_b": jnp.zeros((H,), jnp.float32),
        "lm_head_w": jax.random.uniform(keys[2], (V, H), jnp.float32,
                                        -1.0 / math.sqrt(H), 1.0 / math.sqrt(H)),
        "layers": [],
    }
    for li in range(L):
        lk = jax.random.split(keys[3 + li], 4)
        qkv_w, qkv_b = _dense_init(lk[0], 3 * H, H)
        proj_w, proj_b = _dense_init(lk[1], H, H)
        fc1_w, fc1_b = _dense_init(lk[2], 4 * H, H)
        fc2_w, fc2_b = _dense_init(lk[3], H, 4 * H)
        params["layers"].append({
            "ln1_g": jnp.ones((H,), jnp.float32), "ln1_b": jnp.zeros((H,), jnp.float32),
            "ln2_g": jnp.ones((H,), jnp.float32), "ln2_b": jnp.zeros((H,), jnp.float32),
            "qkv_w": qkv_w, "qkv_b": qkv_b,
            "proj_w": proj_w, "proj_b": proj_b,
            "fc1_w": fc1_w, "fc1_b": fc1_b,
            "fc2_w": fc2_w, "fc2_b": fc2_b,
        })
    return params


# ----------------------------------------------------------------------------
# One-time packing:
#   * stack per-layer tensors on a leading axis
#   * transpose matmul weights from torch (out, in) to (in, out)
#   * pre-split QKV / proj weights per head -> (L*NH, H, HD) / (L*NH, HD, H)
#   * fold the 1/sqrt(head_dim) attention scale into q_w / q_b
#   * zero-pad lm_head to a lane-dense 128-multiple output width
# ----------------------------------------------------------------------------
def pack_params(params, cfg: TransformerConfig):
    H, NH = cfg.hidden_size, cfg.n_head
    HD = H // NH
    scale = 1.0 / math.sqrt(HD)
    V = params["lm_head_w"].shape[0]
    v_pad = max(128, ((V + 127) // 128) * 128)

    def per_head_in_out(w):        # (NH*HD, H) torch (out,in) -> (NH, H, HD)
        return jnp.transpose(w.reshape(NH, HD, H), (0, 2, 1))

    qw, kw, vw, qb, kb, vb, pw = [], [], [], [], [], [], []
    ln1_g, ln1_b, ln2_g, ln2_b = [], [], [], []
    proj_b, fc1_w, fc1_b, fc2_w, fc2_b = [], [], [], [], []
    for lp in params["layers"]:
        W, Bv = lp["qkv_w"], lp["qkv_b"]
        qw.append(per_head_in_out(W[0:H]) * scale)         # scale folded into Q
        kw.append(per_head_in_out(W[H:2 * H]))
        vw.append(per_head_in_out(W[2 * H:3 * H]))
        qb.append(Bv[0:H].reshape(NH, 1, HD) * scale)
        kb.append(Bv[H:2 * H].reshape(NH, 1, HD))
        vb.append(Bv[2 * H:3 * H].reshape(NH, 1, HD))
        pw.append(lp["proj_w"].T.reshape(NH, HD, H))        # per-head (HD, H)
        proj_b.append(lp["proj_b"])
        ln1_g.append(lp["ln1_g"]); ln1_b.append(lp["ln1_b"])
        ln2_g.append(lp["ln2_g"]); ln2_b.append(lp["ln2_b"])
        fc1_w.append(lp["fc1_w"].T); fc1_b.append(lp["fc1_b"])
        fc2_w.append(lp["fc2_w"].T); fc2_b.append(lp["fc2_b"])

    lmh = params["lm_head_w"].T                              # (H, V)
    if v_pad > V:
        lmh = jnp.pad(lmh, ((0, 0), (0, v_pad - V)))         # lane-dense output

    cat = lambda lst: jnp.concatenate(lst, axis=0)           # (L*NH, ...)
    return {
        "embedding": params["embedding"],
        "position_embedding": params["position_embedding"],
        "ln1_g": jnp.stack(ln1_g), "ln1_b": jnp.stack(ln1_b),       # (L, H)
        "q_w": cat(qw), "k_w": cat(kw), "v_w": cat(vw),             # (L*NH, H, HD)
        "q_b": cat(qb), "k_b": cat(kb), "v_b": cat(vb),             # (L*NH, 1, HD)
        "proj_w": cat(pw),                                          # (L*NH, HD, H)
        "proj_b": jnp.stack(proj_b),                                # (L, H)
        "ln2_g": jnp.stack(ln2_g), "ln2_b": jnp.stack(ln2_b),       # (L, H)
        "fc1_w": jnp.stack(fc1_w), "fc1_b": jnp.stack(fc1_b),       # (L, H, 4H), (L, 4H)
        "fc2_w": jnp.stack(fc2_w), "fc2_b": jnp.stack(fc2_b),       # (L, 4H, H), (L, H)
        "ln_f_g": params["ln_f_g"].reshape(1, -1),                  # (1, H)
        "ln_f_b": params["ln_f_b"].reshape(1, -1),                  # (1, H)
        "lm_head_w": lmh,                                           # (H, v_pad)
    }


def _num_batch_splits(batch):
    """Split the batch across grid steps only on chips with >1 TensorCore
    (v7x / megacore v4/v5p). On single-TC v5e/v6e a single fused grid step
    avoids per-step overhead and folds the whole batch into the matmul M dim."""
    try:
        kind = jax.devices()[0].device_kind.lower()
    except Exception:
        kind = ""
    multi_tc = ("7" in kind) or ("v4" in kind) or ("v5p" in kind)
    if multi_tc and batch % 2 == 0:
        return 2
    return 1


# ----------------------------------------------------------------------------
# Full forward pass (Transformer._forward_variant1, inference / no KV cache)
# ----------------------------------------------------------------------------
def transformer_forward(packed, input_ids, cfg: TransformerConfig):
    B, S = input_ids.shape
    H, V = cfg.hidden_size, cfg.vocab_size
    v_pad = packed["lm_head_w"].shape[1]

    splits = _num_batch_splits(B)
    bblk = B // splits

    weights = [packed[name] for name in _WEIGHT_ORDER]
    kernel = functools.partial(
        _fused_transformer_kernel,
        num_layers=cfg.num_layers, n_head=cfg.n_head, seq_len=S,
        block_batch=bblk, eps=cfg.layer_norm_epsilon)

    grid_spec = pltpu.PrefetchScalarGridSpec(
        num_scalar_prefetch=1,                       # input_ids -> SMEM
        grid=(splits,),
        in_specs=[_resident_spec(w.shape) for w in weights],
        out_specs=pl.BlockSpec((bblk, S, v_pad), lambda g, ids_ref: (g, 0, 0)),
        scratch_shapes=[pltpu.VMEM((bblk * S, H), jnp.float32)],
    )
    padded_logits = pl.pallas_call(
        kernel,
        out_shape=jax.ShapeDtypeStruct((B, S, v_pad), jnp.float32),
        grid_spec=grid_spec,
        compiler_params=pltpu.CompilerParams(dimension_semantics=("parallel",)),
    )(input_ids.astype(jnp.int32), *weights)

    logits = padded_logits[:, :, :V] if v_pad != V else padded_logits
    return logits, None


# ----------------------------------------------------------------------------
# Pure-JAX reference (in-script sanity check of the fused kernel)
# ----------------------------------------------------------------------------
def _reference_forward(params, input_ids, cfg: TransformerConfig):
    B, S = input_ids.shape
    H, NH = cfg.hidden_size, cfg.n_head
    HD = H // NH
    eps = cfg.layer_norm_epsilon

    def ln(x, g, b):
        mu = jnp.mean(x, axis=-1, keepdims=True)
        var = jnp.mean(jnp.square(x - mu), axis=-1, keepdims=True)
        return (x - mu) / jnp.sqrt(var + eps) * g + b

    hs = params["embedding"][input_ids] + params["position_embedding"][jnp.arange(S)][None]
    for lp in params["layers"]:
        normed = ln(hs, lp["ln1_g"], lp["ln1_b"])
        qkv = normed @ lp["qkv_w"].T + lp["qkv_b"]
        qkv = qkv.reshape(B, S, 3, NH, HD).transpose(2, 0, 3, 1, 4)
        q, k, v = qkv[0], qkv[1], qkv[2]
        s = jnp.einsum("bhqd,bhkd->bhqk", q, k) / math.sqrt(HD)
        p = jax.nn.softmax(s, axis=-1)
        attn = jnp.einsum("bhqk,bhkd->bhqd", p, v).transpose(0, 2, 1, 3).reshape(B, S, H)
        hs = hs + (attn @ lp["proj_w"].T + lp["proj_b"])
        normed = ln(hs, lp["ln2_g"], lp["ln2_b"])
        h1 = jax.nn.gelu(normed @ lp["fc1_w"].T + lp["fc1_b"], approximate=False)
        hs = hs + (h1 @ lp["fc2_w"].T + lp["fc2_b"])
    normed = ln(hs, params["ln_f_g"], params["ln_f_b"])
    return normed @ params["lm_head_w"].T


# ----------------------------------------------------------------------------
if __name__ == "__main__":
    cfg = TransformerConfig(
        n_head=4,
        hidden_size=32,
        num_layers=2,
        max_sequence_length=16,
        vocab_size=64,
        dropout=0.0,                # inference mode: dropout is a no-op
        layer_norm_epsilon=1e-5,
        architecture="variant1",
    )

    key = jax.random.PRNGKey(0)
    pkey, dkey = jax.random.split(key)
    params = init_transformer_params(pkey, cfg)
    packed = pack_params(params, cfg)   # one-time stacking / per-head split / padding

    B, S = 2, 8
    input_ids = jax.random.randint(dkey, (B, S), 0, cfg.vocab_size, dtype=jnp.int32)

    fwd = jax.jit(lambda p, ids: transformer_forward(p, ids, cfg))
    logits, present = fwd(packed, input_ids)
    jax.block_until_ready(logits)

    assert logits.shape == (B, S, cfg.vocab_size), logits.shape
    assert logits.dtype == jnp.float32
    assert bool(jnp.all(jnp.isfinite(logits)))

    # Sanity check against a pure-JAX reference (loose tol: approx reciprocal
    # in softmax and A&S erf in GELU are not bit-identical).
    ref = _reference_forward(params, input_ids, cfg)
    max_abs = float(jnp.max(jnp.abs(ref)))
    max_err = float(jnp.max(jnp.abs(logits - ref)))
    assert max_err <= 1e-2 + 1e-2 * max_abs, (max_err, max_abs)

    print("KERNEL_OK")
</pallas_src>

<mosaic_0001>
module attributes {stable_mosaic.version = 11 : i64} {
  func.func @_fused_transformer_kernel(%arg0: i32, %arg1: memref<2x8xi32, #tpu.memory_space<smem>>, %arg2: memref<64x32xf32, #tpu.memory_space<vmem>>, %arg3: memref<16x32xf32, #tpu.memory_space<vmem>>, %arg4: memref<2x32xf32, #tpu.memory_space<vmem>>, %arg5: memref<2x32xf32, #tpu.memory_space<vmem>>, %arg6: memref<8x32x8xf32, #tpu.memory_space<vmem>>, %arg7: memref<8x1x8xf32, #tpu.memory_space<vmem>>, %arg8: memref<8x32x8xf32, #tpu.memory_space<vmem>>, %arg9: memref<8x1x8xf32, #tpu.memory_space<vmem>>, %arg10: memref<8x32x8xf32, #tpu.memory_space<vmem>>, %arg11: memref<8x1x8xf32, #tpu.memory_space<vmem>>, %arg12: memref<8x8x32xf32, #tpu.memory_space<vmem>>, %arg13: memref<2x32xf32, #tpu.memory_space<vmem>>, %arg14: memref<2x32xf32, #tpu.memory_space<vmem>>, %arg15: memref<2x32xf32, #tpu.memory_space<vmem>>, %arg16: memref<2x32x128xf32, #tpu.memory_space<vmem>>, %arg17: memref<2x128xf32, #tpu.memory_space<vmem>>, %arg18: memref<2x128x32xf32, #tpu.memory_space<vmem>>, %arg19: memref<2x32xf32, #tpu.memory_space<vmem>>, %arg20: memref<1x32xf32, #tpu.memory_space<vmem>>, %arg21: memref<1x32xf32, #tpu.memory_space<vmem>>, %arg22: memref<32x128xf32, #tpu.memory_space<vmem>>, %arg23: memref<2x8x128xf32, #tpu.memory_space<vmem>>, %arg24: memref<16x32xf32, #tpu.memory_space<vmem>>) attributes {dimension_semantics = [#tpu.dimension_semantics<parallel>], iteration_bounds = array<i64: 1>, scalar_prefetch = 1 : i64, scratch_operands = 1 : i64, tpu.core_type = #tpu.core_type<tc>, window_params = [{pipeline_mode = #tpu.pipeline_mode<synchronous>, transform_indices = @transform_0, window_bounds = array<i64: 64, 32>}, {pipeline_mode = #tpu.pipeline_mode<synchronous>, transform_indices = @transform_1, window_bounds = array<i64: 16, 32>}, {pipeline_mode = #tpu.pipeline_mode<synchronous>, transform_indices = @transform_2, window_bounds = array<i64: 2, 32>}, {pipeline_mode = #tpu.pipeline_mode<synchronous>, transform_indices = @transform_3, window_bounds = array<i64: 2, 32>}, {pipeline_mode = #tpu.pipeline_mode<synchronous>, transform_indices = @transform_4, window_bounds = array<i64: 8, 32, 8>}, {pipeline_mode = #tpu.pipeline_mode<synchronous>, transform_indices = @transform_5, window_bounds = array<i64: 8, 1, 8>}, {pipeline_mode = #tpu.pipeline_mode<synchronous>, transform_indices = @transform_6, window_bounds = array<i64: 8, 32, 8>}, {pipeline_mode = #tpu.pipeline_mode<synchronous>, transform_indices = @transform_7, window_bounds = array<i64: 8, 1, 8>}, {pipeline_mode = #tpu.pipeline_mode<synchronous>, transform_indices = @transform_8, window_bounds = array<i64: 8, 32, 8>}, {pipeline_mode = #tpu.pipeline_mode<synchronous>, transform_indices = @transform_9, window_bounds = array<i64: 8, 1, 8>}, {pipeline_mode = #tpu.pipeline_mode<synchronous>, transform_indices = @transform_10, window_bounds = array<i64: 8, 8, 32>}, {pipeline_mode = #tpu.pipeline_mode<synchronous>, transform_indices = @transform_11, window_bounds = array<i64: 2, 32>}, {pipeline_mode = #tpu.pipeline_mode<synchronous>, transform_indices = @transform_12, window_bounds = array<i64: 2, 32>}, {pipeline_mode = #tpu.pipeline_mode<synchronous>, transform_indices = @transform_13, window_bounds = array<i64: 2, 32>}, {pipeline_mode = #tpu.pipeline_mode<synchronous>, transform_indices = @transform_14, window_bounds = array<i64: 2, 32, 128>}, {pipeline_mode = #tpu.pipeline_mode<synchronous>, transform_indices = @transform_15, window_bounds = array<i64: 2, 128>}, {pipeline_mode = #tpu.pipeline_mode<synchronous>, transform_indices = @transform_16, window_bounds = array<i64: 2, 128, 32>}, {pipeline_mode = #tpu.pipeline_mode<synchronous>, transform_indices = @transform_17, window_bounds = array<i64: 2, 32>}, {pipeline_mode = #tpu.pipeline_mode<synchronous>, transform_indices = @transform_18, window_bounds = array<i64: 1, 32>}, {pipeline_mode = #tpu.pipeline_mode<synchronous>, transform_indices = @transform_19, window_bounds = array<i64: 1, 32>}, {pipeline_mode = #tpu.pipeline_mode<synchronous>, transform_indices = @transform_20, window_bounds = array<i64: 32, 128>}, {transform_indices = @transform_21, window_bounds = array<i64: 2, 8, 128>}]} {
    %c2_i32 = arith.constant 2 : i32
    %0 = arith.muli %arg0, %c2_i32 : i32
    %c0_i32 = arith.constant 0 : i32
    %1 = arith.addi %0, %c0_i32 : i32
    %2 = arith.index_cast %1 : i32 to index
    %c0 = arith.constant 0 : index
    %3 = memref.load %arg1[%2, %c0] : memref<2x8xi32, #tpu.memory_space<smem>>
    %4 = arith.index_cast %3 : i32 to index
    %c0_0 = arith.constant 0 : index
    %5 = vector.load %arg2[%4, %c0_0] : memref<64x32xf32, #tpu.memory_space<vmem>>, vector<1x32xf32>
    %c0_1 = arith.constant 0 : index
    %c0_2 = arith.constant 0 : index
    %6 = vector.load %arg3[%c0_1, %c0_2] : memref<16x32xf32, #tpu.memory_space<vmem>>, vector<1x32xf32>
    %7 = arith.addf %5, %6 : vector<1x32xf32>
    %c0_3 = arith.constant 0 : index
    %c0_4 = arith.constant 0 : index
    %8 = vector.load %arg24[%c0_3, %c0_4] : memref<16x32xf32, #tpu.memory_space<vmem>>, vector<1x32xf32>
    tpu.vector_store %arg24[%c0_3, %c0_4], %7 {strides = array<i32>} : memref<16x32xf32, #tpu.memory_space<vmem>>, vector<1x32xf32>,
    %9 = arith.index_cast %1 : i32 to index
    %c1 = arith.constant 1 : index
    %10 = memref.load %arg1[%9, %c1] : memref<2x8xi32, #tpu.memory_space<smem>>
    %11 = arith.index_cast %10 : i32 to index
    %c0_5 = arith.constant 0 : index
    %12 = vector.load %arg2[%11, %c0_5] : memref<64x32xf32, #tpu.memory_space<vmem>>, vector<1x32xf32>
    %c1_6 = arith.constant 1 : index
    %c0_7 = arith.constant 0 : index
    %13 = vector.load %arg3[%c1_6, %c0_7] : memref<16x32xf32, #tpu.memory_space<vmem>>, vector<1x32xf32>
    %14 = arith.addf %12, %13 : vector<1x32xf32>
    %c1_8 = arith.constant 1 : index
    %c0_9 = arith.constant 0 : index
    %15 = vector.load %arg24[%c1_8, %c0_9] : memref<16x32xf32, #tpu.memory_space<vmem>>, vector<1x32xf32>
    tpu.vector_store %arg24[%c1_8, %c0_9], %14 {strides = array<i32>} : memref<16x32xf32, #tpu.memory_space<vmem>>, vector<1x32xf32>,
    %16 = arith.index_cast %1 : i32 to index
    %c2 = arith.constant 2 : index
    %17 = memref.load %arg1[%16, %c2] : memref<2x8xi32, #tpu.memory_space<smem>>
    %18 = arith.index_cast %17 : i32 to index
    %c0_10 = arith.constant 0 : index
    %19 = vector.load %arg2[%18, %c0_10] : memref<64x32xf32, #tpu.memory_space<vmem>>, vector<1x32xf32>
    %c2_11 = arith.constant 2 : index
    %c0_12 = arith.constant 0 : index
    %20 = vector.load %arg3[%c2_11, %c0_12] : memref<16x32xf32, #tpu.memory_space<vmem>>, vector<1x32xf32>
    %21 = arith.addf %19, %20 : vector<1x32xf32>
    %c2_13 = arith.constant 2 : index
    %c0_14 = arith.constant 0 : index
    %22 = vector.load %arg24[%c2_13, %c0_14] : memref<16x32xf32, #tpu.memory_space<vmem>>, vector<1x32xf32>
    tpu.vector_store %arg24[%c2_13, %c0_14], %21 {strides = array<i32>} : memref<16x32xf32, #tpu.memory_space<vmem>>, vector<1x32xf32>,
    %23 = arith.index_cast %1 : i32 to index
    %c3 = arith.constant 3 : index
    %24 = memref.load %arg1[%23, %c3] : memref<2x8xi32, #tpu.memory_space<smem>>
    %25 = arith.index_cast %24 : i32 to index
    %c0_15 = arith.constant 0 : index
    %26 = vector.load %arg2[%25, %c0_15] : memref<64x32xf32, #tpu.memory_space<vmem>>, vector<1x32xf32>
    %c3_16 = arith.constant 3 : index
    %c0_17 = arith.constant 0 : index
    %27 = vector.load %arg3[%c3_16, %c0_17] : memref<16x32xf32, #tpu.memory_space<vmem>>, vector<1x32xf32>
    %28 = arith.addf %26, %27 : vector<1x32xf32>
    %c3_18 = arith.constant 3 : index
    %c0_19 = arith.constant 0 : index
    %29 = vector.load %arg24[%c3_18, %c0_19] : memref<16x32xf32, #tpu.memory_space<vmem>>, vector<1x32xf32>
    tpu.vector_store %arg24[%c3_18, %c0_19], %28 {strides = array<i32>} : memref<16x32xf32, #tpu.memory_space<vmem>>, vector<1x32xf32>,
    %30 = arith.index_cast %1 : i32 to index
    %c4 = arith.constant 4 : index
    %31 = memref.load %arg1[%30, %c4] : memref<2x8xi32, #tpu.memory_space<smem>>
    %32 = arith.index_cast %31 : i32 to index
    %c0_20 = arith.constant 0 : index
    %33 = vector.load %arg2[%32, %c0_20] : memref<64x32xf32, #tpu.memory_space<vmem>>, vector<1x32xf32>
    %c4_21 = arith.constant 4 : index
    %c0_22 = arith.constant 0 : index
    %34 = vector.load %arg3[%c4_21, %c0_22] : memref<16x32xf32, #tpu.memory_space<vmem>>, vector<1x32xf32>
    %35 = arith.addf %33, %34 : vector<1x32xf32>
    %c4_23 = arith.constant 4 : index
    %c0_24 = arith.constant 0 : index
    %36 = vector.load %arg24[%c4_23, %c0_24] : memref<16x32xf32, #tpu.memory_space<vmem>>, vector<1x32xf32>
    tpu.vector_store %arg24[%c4_23, %c0_24], %35 {strides = array<i32>} : memref<16x32xf32, #tpu.memory_space<vmem>>, vector<1x32xf32>,
    %37 = arith.index_cast %1 : i32 to index
    %c5 = arith.constant 5 : index
    %38 = memref.load %arg1[%37, %c5] : memref<2x8xi32, #tpu.memory_space<smem>>
    %39 = arith.index_cast %38 : i32 to index
    %c0_25 = arith.constant 0 : index
    %40 = vector.load %arg2[%39, %c0_25] : memref<64x32xf32, #tpu.memory_space<vmem>>, vector<1x32xf32>
    %c5_26 = arith.constant 5 : index
    %c0_27 = arith.constant 0 : index
    %41 = vector.load %arg3[%c5_26, %c0_27] : memref<16x32xf32, #tpu.memory_space<vmem>>, vector<1x32xf32>
    %42 = arith.addf %40, %41 : vector<1x32xf32>
    %c5_28 = arith.constant 5 : index
    %c0_29 = arith.constant 0 : index
    %43 = vector.load %arg24[%c5_28, %c0_29] : memref<16x32xf32, #tpu.memory_space<vmem>>, vector<1x32xf32>
    tpu.vector_store %arg24[%c5_28, %c0_29], %42 {strides = array<i32>} : memref<16x32xf32, #tpu.memory_space<vmem>>, vector<1x32xf32>,
    %44 = arith.index_cast %1 : i32 to index
    %c6 = arith.constant 6 : index
    %45 = memref.load %arg1[%44, %c6] : memref<2x8xi32, #tpu.memory_space<smem>>
    %46 = arith.index_cast %45 : i32 to index
    %c0_30 = arith.constant 0 : index
    %47 = vector.load %arg2[%46, %c0_30] : memref<64x32xf32, #tpu.memory_space<vmem>>, vector<1x32xf32>
    %c6_31 = arith.constant 6 : index
    %c0_32 = arith.constant 0 : index
    %48 = vector.load %arg3[%c6_31, %c0_32] : memref<16x32xf32, #tpu.memory_space<vmem>>, vector<1x32xf32>
    %49 = arith.addf %47, %48 : vector<1x32xf32>
    %c6_33 = arith.constant 6 : index
    %c0_34 = arith.constant 0 : index
    %50 = vector.load %arg24[%c6_33, %c0_34] : memref<16x32xf32, #tpu.memory_space<vmem>>, vector<1x32xf32>
    tpu.vector_store %arg24[%c6_33, %c0_34], %49 {strides = array<i32>} : memref<16x32xf32, #tpu.memory_space<vmem>>, vector<1x32xf32>,
    %51 = arith.index_cast %1 : i32 to index
    %c7 = arith.constant 7 : index
    %52 = memref.load %arg1[%51, %c7] : memref<2x8xi32, #tpu.memory_space<smem>>
    %53 = arith.index_cast %52 : i32 to index
    %c0_35 = arith.constant 0 : index
    %54 = vector.load %arg2[%53, %c0_35] : memref<64x32xf32, #tpu.memory_space<vmem>>, vector<1x32xf32>
    %c7_36 = arith.constant 7 : index
    %c0_37 = arith.constant 0 : index
    %55 = vector.load %arg3[%c7_36, %c0_37] : memref<16x32xf32, #tpu.memory_space<vmem>>, vector<1x32xf32>
    %56 = arith.addf %54, %55 : vector<1x32xf32>
    %c7_38 = arith.constant 7 : index
    %c0_39 = arith.constant 0 : index
    %57 = vector.load %arg24[%c7_38, %c0_39] : memref<16x32xf32, #tpu.memory_space<vmem>>, vector<1x32xf32>
    tpu.vector_store %arg24[%c7_38, %c0_39], %56 {strides = array<i32>} : memref<16x32xf32, #tpu.memory_space<vmem>>, vector<1x32xf32>,
    %c2_i32_40 = arith.constant 2 : i32
    %58 = arith.muli %arg0, %c2_i32_40 : i32
    %c1_i32 = arith.constant 1 : i32
    %59 = arith.addi %58, %c1_i32 : i32
    %60 = arith.index_cast %59 : i32 to index
    %c0_41 = arith.constant 0 : index
    %61 = memref.load %arg1[%60, %c0_41] : memref<2x8xi32, #tpu.memory_space<smem>>
    %62 = arith.index_cast %61 : i32 to index
    %c0_42 = arith.constant 0 : index
    %63 = vector.load %arg2[%62, %c0_42] : memref<64x32xf32, #tpu.memory_space<vmem>>, vector<1x32xf32>
    %c0_43 = arith.constant 0 : index
    %c0_44 = arith.constant 0 : index
    %64 = vector.load %arg3[%c0_43, %c0_44] : memref<16x32xf32, #tpu.memory_space<vmem>>, vector<1x32xf32>
    %65 = arith.addf %63, %64 : vector<1x32xf32>
    %c8 = arith.constant 8 : index
    %c0_45 = arith.constant 0 : index
    %66 = vector.load %arg24[%c8, %c0_45] : memref<16x32xf32, #tpu.memory_space<vmem>>, vector<1x32xf32>
    tpu.vector_store %arg24[%c8, %c0_45], %65 {strides = array<i32>} : memref<16x32xf32, #tpu.memory_space<vmem>>, vector<1x32xf32>,
    %67 = arith.index_cast %59 : i32 to index
    %c1_46 = arith.constant 1 : index
    %68 = memref.load %arg1[%67, %c1_46] : memref<2x8xi32, #tpu.memory_space<smem>>
    %69 = arith.index_cast %68 : i32 to index
    %c0_47 = arith.constant 0 : index
    %70 = vector.load %arg2[%69, %c0_47] : memref<64x32xf32, #tpu.memory_space<vmem>>, vector<1x32xf32>
    %c1_48 = arith.constant 1 : index
    %c0_49 = arith.constant 0 : index
    %71 = vector.load %arg3[%c1_48, %c0_49] : memref<16x32xf32, #tpu.memory_space<vmem>>, vector<1x32xf32>
    %72 = arith.addf %70, %71 : vector<1x32xf32>
    %c9 = arith.constant 9 : index
    %c0_50 = arith.constant 0 : index
    %73 = vector.load %arg24[%c9, %c0_50] : memref<16x32xf32, #tpu.memory_space<vmem>>, vector<1x32xf32>
    tpu.vector_store %arg24[%c9, %c0_50], %72 {strides = array<i32>} : memref<16x32xf32, #tpu.memory_space<vmem>>, vector<1x32xf32>,
    %74 = arith.index_cast %59 : i32 to index
    %c2_51 = arith.constant 2 : index
    %75 = memref.load %arg1[%74, %c2_51] : memref<2x8xi32, #tpu.memory_space<smem>>
    %76 = arith.index_cast %75 : i32 to index
    %c0_52 = arith.constant 0 : index
    %77 = vector.load %arg2[%76, %c0_52] : memref<64x32xf32, #tpu.memory_space<vmem>>, vector<1x32xf32>
    %c2_53 = arith.constant 2 : index
    %c0_54 = arith.constant 0 : index
    %78 = vector.load %arg3[%c2_53, %c0_54] : memref<16x32xf32, #tpu.memory_space<vmem>>, vector<1x32xf32>
    %79 = arith.addf %77, %78 : vector<1x32xf32>
    %c10 = arith.constant 10 : index
    %c0_55 = arith.constant 0 : index
    %80 = vector.load %arg24[%c10, %c0_55] : memref<16x32xf32, #tpu.memory_space<vmem>>, vector<1x32xf32>
    tpu.vector_store %arg24[%c10, %c0_55], %79 {strides = array<i32>} : memref<16x32xf32, #tpu.memory_space<vmem>>, vector<1x32xf32>,
    %81 = arith.index_cast %59 : i32 to index
    %c3_56 = arith.constant 3 : index
    %82 = memref.load %arg1[%81, %c3_56] : memref<2x8xi32, #tpu.memory_space<smem>>
    %83 = arith.index_cast %82 : i32 to index
    %c0_57 = arith.constant 0 : index
    %84 = vector.load %arg2[%83, %c0_57] : memref<64x32xf32, #tpu.memory_space<vmem>>, vector<1x32xf32>
    %c3_58 = arith.constant 3 : index
    %c0_59 = arith.constant 0 : index
    %85 = vector.load %arg3[%c3_58, %c0_59] : memref<16x32xf32, #tpu.memory_space<vmem>>, vector<1x32xf32>
    %86 = arith.addf %84, %85 : vector<1x32xf32>
    %c11 = arith.constant 11 : index
    %c0_60 = arith.constant 0 : index
    %87 = vector.load %arg24[%c11, %c0_60] : memref<16x32xf32, #tpu.memory_space<vmem>>, vector<1x32xf32>
    tpu.vector_store %arg24[%c11, %c0_60], %86 {strides = array<i32>} : memref<16x32xf32, #tpu.memory_space<vmem>>, vector<1x32xf32>,
    %88 = arith.index_cast %59 : i32 to index
    %c4_61 = arith.constant 4 : index
    %89 = memref.load %arg1[%88, %c4_61] : memref<2x8xi32, #tpu.memory_space<smem>>
    %90 = arith.index_cast %89 : i32 to index
    %c0_62 = arith.constant 0 : index
    %91 = vector.load %arg2[%90, %c0_62] : memref<64x32xf32, #tpu.memory_space<vmem>>, vector<1x32xf32>
    %c4_63 = arith.constant 4 : index
    %c0_64 = arith.constant 0 : index
    %92 = vector.load %arg3[%c4_63, %c0_64] : memref<16x32xf32, #tpu.memory_space<vmem>>, vector<1x32xf32>
    %93 = arith.addf %91, %92 : vector<1x32xf32>
    %c12 = arith.constant 12 : index
    %c0_65 = arith.constant 0 : index
    %94 = vector.load %arg24[%c12, %c0_65] : memref<16x32xf32, #tpu.memory_space<vmem>>, vector<1x32xf32>
    tpu.vector_store %arg24[%c12, %c0_65], %93 {strides = array<i32>} : memref<16x32xf32, #tpu.memory_space<vmem>>, vector<1x32xf32>,
    %95 = arith.index_cast %59 : i32 to index
    %c5_66 = arith.constant 5 : index
    %96 = memref.load %arg1[%95, %c5_66] : memref<2x8xi32, #tpu.memory_space<smem>>
    %97 = arith.index_cast %96 : i32 to index
    %c0_67 = arith.constant 0 : index
    %98 = vector.load %arg2[%97, %c0_67] : memref<64x32xf32, #tpu.memory_space<vmem>>, vector<1x32xf32>
    %c5_68 = arith.constant 5 : index
    %c0_69 = arith.constant 0 : index
    %99 = vector.load %arg3[%c5_68, %c0_69] : memref<16x32xf32, #tpu.memory_space<vmem>>, vector<1x32xf32>
    %100 = arith.addf %98, %99 : vector<1x32xf32>
    %c13 = arith.constant 13 : index
    %c0_70 = arith.constant 0 : index
    %101 = vector.load %arg24[%c13, %c0_70] : memref<16x32xf32, #tpu.memory_space<vmem>>, vector<1x32xf32>
    tpu.vector_store %arg24[%c13, %c0_70], %100 {strides = array<i32>} : memref<16x32xf32, #tpu.memory_space<vmem>>, vector<1x32xf32>,
    %102 = arith.index_cast %59 : i32 to index
    %c6_71 = arith.constant 6 : index
    %103 = memref.load %arg1[%102, %c6_71] : memref<2x8xi32, #tpu.memory_space<smem>>
    %104 = arith.index_cast %103 : i32 to index
    %c0_72 = arith.constant 0 : index
    %105 = vector.load %arg2[%104, %c0_72] : memref<64x32xf32, #tpu.memory_space<vmem>>, vector<1x32xf32>
    %c6_73 = arith.constant 6 : index
    %c0_74 = arith.constant 0 : index
    %106 = vector.load %arg3[%c6_73, %c0_74] : memref<16x32xf32, #tpu.memory_space<vmem>>, vector<1x32xf32>
    %107 = arith.addf %105, %106 : vector<1x32xf32>
    %c14 = arith.constant 14 : index
    %c0_75 = arith.constant 0 : index
    %108 = vector.load %arg24[%c14, %c0_75] : memref<16x32xf32, #tpu.memory_space<vmem>>, vector<1x32xf32>
    tpu.vector_store %arg24[%c14, %c0_75], %107 {strides = array<i32>} : memref<16x32xf32, #tpu.memory_space<vmem>>, vector<1x32xf32>,
    %109 = arith.index_cast %59 : i32 to index
    %c7_76 = arith.constant 7 : index
    %110 = memref.load %arg1[%109, %c7_76] : memref<2x8xi32, #tpu.memory_space<smem>>
    %111 = arith.index_cast %110 : i32 to index
    %c0_77 = arith.constant 0 : index
    %112 = vector.load %arg2[%111, %c0_77] : memref<64x32xf32, #tpu.memory_space<vmem>>, vector<1x32xf32>
    %c7_78 = arith.constant 7 : index
    %c0_79 = arith.constant 0 : index
    %113 = vector.load %arg3[%c7_78, %c0_79] : memref<16x32xf32, #tpu.memory_space<vmem>>, vector<1x32xf32>
    %114 = arith.addf %112, %113 : vector<1x32xf32>
    %c15 = arith.constant 15 : index
    %c0_80 = arith.constant 0 : index
    %115 = vector.load %arg24[%c15, %c0_80] : memref<16x32xf32, #tpu.memory_space<vmem>>, vector<1x32xf32>
    tpu.vector_store %arg24[%c15, %c0_80], %114 {strides = array<i32>} : memref<16x32xf32, #tpu.memory_space<vmem>>, vector<1x32xf32>,
    %c0_81 = arith.constant 0 : index
    %c0_82 = arith.constant 0 : index
    %116 = vector.load %arg24[%c0_81, %c0_82] : memref<16x32xf32, #tpu.memory_space<vmem>>, vector<16x32xf32>
    %c0_83 = arith.constant 0 : index
    %c0_84 = arith.constant 0 : index
    %117 = vector.load %arg4[%c0_83, %c0_84] : memref<2x32xf32, #tpu.memory_space<vmem>>, vector<1x32xf32>
    %c0_85 = arith.constant 0 : index
    %c0_86 = arith.constant 0 : index
    %118 = vector.load %arg5[%c0_85, %c0_86] : memref<2x32xf32, #tpu.memory_space<vmem>>, vector<1x32xf32>
    %cst = arith.constant dense<0.000000e+00> : vector<16xf32>
    %119 = vector.multi_reduction <add>, %116, %cst [1] : vector<16x32xf32> to vector<16xf32>
    %120 = vector.shape_cast %119 : vector<16xf32> to vector<16x1xf32>
    %cst_87 = arith.constant 3.200000e+01 : f32
    %121 = vector.broadcast %cst_87 : f32 to vector<16x1xf32>
    %122 = arith.divf %120, %121 : vector<16x1xf32>
    %123 = vector.broadcast %122 : vector<16x1xf32> to vector<16x32xf32>
    %124 = arith.subf %116, %123 : vector<16x32xf32>
    %125 = arith.mulf %124, %124 : vector<16x32xf32>
    %cst_88 = arith.constant dense<0.000000e+00> : vector<16xf32>
    %126 = vector.multi_reduction <add>, %125, %cst_88 [1] : vector<16x32xf32> to vector<16xf32>
    %127 = vector.shape_cast %126 : vector<16xf32> to vector<16x1xf32>
    %cst_89 = arith.constant 3.200000e+01 : f32
    %128 = vector.broadcast %cst_89 : f32 to vector<16x1xf32>
    %129 = arith.divf %127, %128 : vector<16x1xf32>
    %130 = vector.broadcast %122 : vector<16x1xf32> to vector<16x32xf32>
    %131 = arith.subf %116, %130 : vector<16x32xf32>
    %cst_90 = arith.constant 9.99999974E-6 : f32
    %132 = vector.broadcast %cst_90 : f32 to vector<16x1xf32>
    %133 = arith.addf %129, %132 : vector<16x1xf32>
    %134 = math.rsqrt %133 : vector<16x1xf32>
    %135 = vector.broadcast %134 : vector<16x1xf32> to vector<16x32xf32>
    %136 = arith.mulf %131, %135 : vector<16x32xf32>
    %137 = vector.broadcast %117 : vector<1x32xf32> to vector<16x32xf32>
    %138 = arith.mulf %136, %137 : vector<16x32xf32>
    %139 = vector.broadcast %118 : vector<1x32xf32> to vector<16x32xf32>
    %140 = arith.addf %138, %139 : vector<16x32xf32>
    %cst_91 = arith.constant 0.000000e+00 : f32
    %141 = vector.broadcast %cst_91 : f32 to vector<8x32xf32>
    %cst_92 = arith.constant 0.000000e+00 : f32
    %142 = vector.broadcast %cst_92 : f32 to vector<8x32xf32>
    %c0_93 = arith.constant 0 : index
    %c0_94 = arith.constant 0 : index
    %c0_95 = arith.constant 0 : index
    %143 = vector.load %arg6[%c0_93, %c0_94, %c0_95] : memref<8x32x8xf32, #tpu.memory_space<vmem>>, vector<1x32x8xf32>
    %144 = vector.shape_cast %143 : vector<1x32x8xf32> to vector<32x8xf32>
    %cst_96 = arith.constant dense<0.000000e+00> : vector<16x8xf32>
    %145 = tpu.matmul %140, %144, %cst_96 {dimension_numbers = #tpu.dot_dimension_numbers<[1], [0], [0], [1], [0, 0, 1, 1], [], []>} : vector<16x32xf32>, vector<32x8xf32>, vector<16x8xf32> -> vector<16x8xf32>
    %c0_97 = arith.constant 0 : index
    %c0_98 = arith.constant 0 : index
    %c0_99 = arith.constant 0 : index
    %146 = vector.load %arg7[%c0_97, %c0_98, %c0_99] : memref<8x1x8xf32, #tpu.memory_space<vmem>>, vector<1x1x8xf32>
    %147 = vector.shape_cast %146 : vector<1x1x8xf32> to vector<1x8xf32>
    %148 = vector.broadcast %147 : vector<1x8xf32> to vector<16x8xf32>
    %149 = arith.addf %145, %148 : vector<16x8xf32>
    %c0_100 = arith.constant 0 : index
    %c0_101 = arith.constant 0 : index
    %c0_102 = arith.constant 0 : index
    %150 = vector.load %arg8[%c0_100, %c0_101, %c0_102] : memref<8x32x8xf32, #tpu.memory_space<vmem>>, vector<1x32x8xf32>
    %151 = vector.shape_cast %150 : vector<1x32x8xf32> to vector<32x8xf32>
    %cst_103 = arith.constant dense<0.000000e+00> : vector<16x8xf32>
    %152 = tpu.matmul %140, %151, %cst_103 {dimension_numbers = #tpu.dot_dimension_numbers<[1], [0], [0], [1], [0, 0, 1, 1], [], []>} : vector<16x32xf32>, vector<32x8xf32>, vector<16x8xf32> -> vector<16x8xf32>
    %c0_104 = arith.constant 0 : index
    %c0_105 = arith.constant 0 : index
    %c0_106 = arith.constant 0 : index
    %153 = vector.load %arg9[%c0_104, %c0_105, %c0_106] : memref<8x1x8xf32, #tpu.memory_space<vmem>>, vector<1x1x8xf32>
    %154 = vector.shape_cast %153 : vector<1x1x8xf32> to vector<1x8xf32>
    %155 = vector.broadcast %154 : vector<1x8xf32> to vector<16x8xf32>
    %156 = arith.addf %152, %155 : vector<16x8xf32>
    %c0_107 = arith.constant 0 : index
    %c0_108 = arith.constant 0 : index
    %c0_109 = arith.constant 0 : index
    %157 = vector.load %arg10[%c0_107, %c0_108, %c0_109] : memref<8x32x8xf32, #tpu.memory_space<vmem>>, vector<1x32x8xf32>
    %158 = vector.shape_cast %157 : vector<1x32x8xf32> to vector<32x8xf32>
    %cst_110 = arith.constant dense<0.000000e+00> : vector<16x8xf32>
    %159 = tpu.matmul %140, %158, %cst_110 {dimension_numbers = #tpu.dot_dimension_numbers<[1], [0], [0], [1], [0, 0, 1, 1], [], []>} : vector<16x32xf32>, vector<32x8xf32>, vector<16x8xf32> -> vector<16x8xf32>
    %c0_111 = arith.constant 0 : index
    %c0_112 = arith.constant 0 : index
    %c0_113 = arith.constant 0 : index
    %160 = vector.load %arg11[%c0_111, %c0_112, %c0_113] : memref<8x1x8xf32, #tpu.memory_space<vmem>>, vector<1x1x8xf32>
    %161 = vector.shape_cast %160 : vector<1x1x8xf32> to vector<1x8xf32>
    %162 = vector.broadcast %161 : vector<1x8xf32> to vector<16x8xf32>
    %163 = arith.addf %159, %162 : vector<16x8xf32>
    %164 = vector.extract_strided_slice %149 {offsets = [0, 0], sizes = [8, 8], strides = [1, 1]} : vector<16x8xf32> to vector<8x8xf32>
    %165 = vector.extract_strided_slice %156 {offsets = [0, 0], sizes = [8, 8], strides = [1, 1]} : vector<16x8xf32> to vector<8x8xf32>
    %cst_114 = arith.constant dense<0.000000e+00> : vector<8x8xf32>
    %166 = tpu.matmul %164, %165, %cst_114 {dimension_numbers = #tpu.dot_dimension_numbers<[1], [1], [0], [0], [0, 0, 1, 0], [], []>} : vector<8x8xf32>, vector<8x8xf32>, vector<8x8xf32> -> vector<8x8xf32>
    %cst_115 = arith.constant dense<0xFF800000> : vector<8xf32>
    %167 = vector.multi_reduction <maximumf>, %166, %cst_115 [1] : vector<8x8xf32> to vector<8xf32>
    %168 = vector.shape_cast %167 : vector<8xf32> to vector<8x1xf32>
    %169 = vector.broadcast %168 : vector<8x1xf32> to vector<8x8xf32>
    %170 = arith.subf %166, %169 : vector<8x8xf32>
    %171 = math.exp %170 : vector<8x8xf32>
    %cst_116 = arith.constant dense<0.000000e+00> : vector<8xf32>
    %172 = vector.multi_reduction <add>, %171, %cst_116 [1] : vector<8x8xf32> to vector<8xf32>
    %173 = vector.shape_cast %172 : vector<8xf32> to vector<8x1xf32>
    %174 = tpu.reciprocal %173 {approx = true} : vector<8x1xf32> -> vector<8x1xf32>
    %175 = vector.broadcast %174 : vector<8x1xf32> to vector<8x8xf32>
    %176 = arith.mulf %171, %175 : vector<8x8xf32>
    %177 = vector.extract_strided_slice %163 {offsets = [0, 0], sizes = [8, 8], strides = [1, 1]} : vector<16x8xf32> to vector<8x8xf32>
    %cst_117 = arith.constant dense<0.000000e+00> : vector<8x8xf32>
    %178 = tpu.matmul %176, %177, %cst_117 {dimension_numbers = #tpu.dot_dimension_numbers<[1], [0], [0], [1], [0, 0, 1, 1], [], []>} : vector<8x8xf32>, vector<8x8xf32>, vector<8x8xf32> -> vector<8x8xf32>
    %c0_118 = arith.constant 0 : index
    %c0_119 = arith.constant 0 : index
    %c0_120 = arith.constant 0 : index
    %179 = vector.load %arg12[%c0_118, %c0_119, %c0_120] : memref<8x8x32xf32, #tpu.memory_space<vmem>>, vector<1x8x32xf32>
    %180 = vector.shape_cast %179 : vector<1x8x32xf32> to vector<8x32xf32>
    %cst_121 = arith.constant dense<0.000000e+00> : vector<8x32xf32>
    %181 = tpu.matmul %178, %180, %cst_121 {dimension_numbers = #tpu.dot_dimension_numbers<[1], [0], [0], [1], [0, 0, 1, 1], [], []>} : vector<8x8xf32>, vector<8x32xf32>, vector<8x32xf32> -> vector<8x32xf32>
    %182 = arith.addf %141, %181 : vector<8x32xf32>
    %183 = vector.extract_strided_slice %149 {offsets = [8, 0], sizes = [8, 8], strides = [1, 1]} : vector<16x8xf32> to vector<8x8xf32>
    %184 = vector.extract_strided_slice %156 {offsets = [8, 0], sizes = [8, 8], strides = [1, 1]} : vector<16x8xf32> to vector<8x8xf32>
    %cst_122 = arith.constant dense<0.000000e+00> : vector<8x8xf32>
    %185 = tpu.matmul %183, %184, %cst_122 {dimension_numbers = #tpu.dot_dimension_numbers<[1], [1], [0], [0], [0, 0, 1, 0], [], []>} : vector<8x8xf32>, vector<8x8xf32>, vector<8x8xf32> -> vector<8x8xf32>
    %cst_123 = arith.constant dense<0xFF800000> : vector<8xf32>
    %186 = vector.multi_reduction <maximumf>, %185, %cst_123 [1] : vector<8x8xf32> to vector<8xf32>
    %187 = vector.shape_cast %186 : vector<8xf32> to vector<8x1xf32>
    %188 = vector.broadcast %187 : vector<8x1xf32> to vector<8x8xf32>
    %189 = arith.subf %185, %188 : vector<8x8xf32>
    %190 = math.exp %189 : vector<8x8xf32>
    %cst_124 = arith.constant dense<0.000000e+00> : vector<8xf32>
    %191 = vector.multi_reduction <add>, %190, %cst_124 [1] : vector<8x8xf32> to vector<8xf32>
    %192 = vector.shape_cast %191 : vector<8xf32> to vector<8x1xf32>
    %193 = tpu.reciprocal %192 {approx = true} : vector<8x1xf32> -> vector<8x1xf32>
    %194 = vector.broadcast %193 : vector<8x1xf32> to vector<8x8xf32>
    %195 = arith.mulf %190, %194 : vector<8x8xf32>
    %196 = vector.extract_strided_slice %163 {offsets = [8, 0], sizes = [8, 8], strides = [1, 1]} : vector<16x8xf32> to vector<8x8xf32>
    %cst_125 = arith.constant dense<0.000000e+00> : vector<8x8xf32>
    %197 = tpu.matmul %195, %196, %cst_125 {dimension_numbers = #tpu.dot_dimension_numbers<[1], [0], [0], [1], [0, 0, 1, 1], [], []>} : vector<8x8xf32>, vector<8x8xf32>, vector<8x8xf32> -> vector<8x8xf32>
    %c0_126 = arith.constant 0 : index
    %c0_127 = arith.constant 0 : index
    %c0_128 = arith.constant 0 : index
    %198 = vector.load %arg12[%c0_126, %c0_127, %c0_128] : memref<8x8x32xf32, #tpu.memory_space<vmem>>, vector<1x8x32xf32>
    %199 = vector.shape_cast %198 : vector<1x8x32xf32> to vector<8x32xf32>
    %cst_129 = arith.constant dense<0.000000e+00> : vector<8x32xf32>
    %200 = tpu.matmul %197, %199, %cst_129 {dimension_numbers = #tpu.dot_dimension_numbers<[1], [0], [0], [1], [0, 0, 1, 1], [], []>} : vector<8x8xf32>, vector<8x32xf32>, vector<8x32xf32> -> vector<8x32xf32>
    %201 = arith.addf %142, %200 : vector<8x32xf32>
    %c1_130 = arith.constant 1 : index
    %c0_131 = arith.constant 0 : index
    %c0_132 = arith.constant 0 : index
    %202 = vector.load %arg6[%c1_130, %c0_131, %c0_132] : memref<8x32x8xf32, #tpu.memory_space<vmem>>, vector<1x32x8xf32>
    %203 = vector.shape_cast %202 : vector<1x32x8xf32> to vector<32x8xf32>
    %cst_133 = arith.constant dense<0.000000e+00> : vector<16x8xf32>
    %204 = tpu.matmul %140, %203, %cst_133 {dimension_numbers = #tpu.dot_dimension_numbers<[1], [0], [0], [1], [0, 0, 1, 1], [], []>} : vector<16x32xf32>, vector<32x8xf32>, vector<16x8xf32> -> vector<16x8xf32>
    %c1_134 = arith.constant 1 : index
    %c0_135 = arith.constant 0 : index
    %c0_136 = arith.constant 0 : index
    %205 = vector.load %arg7[%c1_134, %c0_135, %c0_136] : memref<8x1x8xf32, #tpu.memory_space<vmem>>, vector<1x1x8xf32>
    %206 = vector.shape_cast %205 : vector<1x1x8xf32> to vector<1x8xf32>
    %207 = vector.broadcast %206 : vector<1x8xf32> to vector<16x8xf32>
    %208 = arith.addf %204, %207 : vector<16x8xf32>
    %c1_137 = arith.constant 1 : index
    %c0_138 = arith.constant 0 : index
    %c0_139 = arith.constant 0 : index
    %209 = vector.load %arg8[%c1_137, %c0_138, %c0_139] : memref<8x32x8xf32, #tpu.memory_space<vmem>>, vector<1x32x8xf32>
    %210 = vector.shape_cast %209 : vector<1x32x8xf32> to vector<32x8xf32>
    %cst_140 = arith.constant dense<0.000000e+00> : vector<16x8xf32>
    %211 = tpu.matmul %140, %210, %cst_140 {dimension_numbers = #tpu.dot_dimension_numbers<[1], [0], [0], [1], [0, 0, 1, 1], [], []>} : vector<16x32xf32>, vector<32x8xf32>, vector<16x8xf32> -> vector<16x8xf32>
    %c1_141 = arith.constant 1 : index
    %c0_142 = arith.constant 0 : index
    %c0_143 = arith.constant 0 : index
    %212 = vector.load %arg9[%c1_141, %c0_142, %c0_143] : memref<8x1x8xf32, #tpu.memory_space<vmem>>, vector<1x1x8xf32>
    %213 = vector.shape_cast %212 : vector<1x1x8xf32> to vector<1x8xf32>
    %214 = vector.broadcast %213 : vector<1x8xf32> to vector<16x8xf32>
    %215 = arith.addf %211, %214 : vector<16x8xf32>
    %c1_144 = arith.constant 1 : index
    %c0_145 = arith.constant 0 : index
    %c0_146 = arith.constant 0 : index
    %216 = vector.load %arg10[%c1_144, %c0_145, %c0_146] : memref<8x32x8xf32, #tpu.memory_space<vmem>>, vector<1x32x8xf32>
    %217 = vector.shape_cast %216 : vector<1x32x8xf32> to vector<32x8xf32>
    %cst_147 = arith.constant dense<0.000000e+00> : vector<16x8xf32>
    %218 = tpu.matmul %140, %217, %cst_147 {dimension_numbers = #tpu.dot_dimension_numbers<[1], [0], [0], [1], [0, 0, 1, 1], [], []>} : vector<16x32xf32>, vector<32x8xf32>, vector<16x8xf32> -> vector<16x8xf32>
    %c1_148 = arith.constant 1 : index
    %c0_149 = arith.constant 0 : index
    %c0_150 = arith.constant 0 : index
    %219 = vector.load %arg11[%c1_148, %c0_149, %c0_150] : memref<8x1x8xf32, #tpu.memory_space<vmem>>, vector<1x1x8xf32>
    %220 = vector.shape_cast %219 : vector<1x1x8xf32> to vector<1x8xf32>
    %221 = vector.broadcast %220 : vector<1x8xf32> to vector<16x8xf32>
    %222 = arith.addf %218, %221 : vector<16x8xf32>
    %223 = vector.extract_strided_slice %208 {offsets = [0, 0], sizes = [8, 8], strides = [1, 1]} : vector<16x8xf32> to vector<8x8xf32>
    %224 = vector.extract_strided_slice %215 {offsets = [0, 0], sizes = [8, 8], strides = [1, 1]} : vector<16x8xf32> to vector<8x8xf32>
    %cst_151 = arith.constant dense<0.000000e+00> : vector<8x8xf32>
    %225 = tpu.matmul %223, %224, %cst_151 {dimension_numbers = #tpu.dot_dimension_numbers<[1], [1], [0], [0], [0, 0, 1, 0], [], []>} : vector<8x8xf32>, vector<8x8xf32>, vector<8x8xf32> -> vector<8x8xf32>
    %cst_152 = arith.constant dense<0xFF800000> : vector<8xf32>
    %226 = vector.multi_reduction <maximumf>, %225, %cst_152 [1] : vector<8x8xf32> to vector<8xf32>
    %227 = vector.shape_cast %226 : vector<8xf32> to vector<8x1xf32>
    %228 = vector.broadcast %227 : vector<8x1xf32> to vector<8x8xf32>
    %229 = arith.subf %225, %228 : vector<8x8xf32>
    %230 = math.exp %229 : vector<8x8xf32>
    %cst_153 = arith.constant dense<0.000000e+00> : vector<8xf32>
    %231 = vector.multi_reduction <add>, %230, %cst_153 [1] : vector<8x8xf32> to vector<8xf32>
    %232 = vector.shape_cast %231 : vector<8xf32> to vector<8x1xf32>
    %233 = tpu.reciprocal %232 {approx = true} : vector<8x1xf32> -> vector<8x1xf32>
    %234 = vector.broadcast %233 : vector<8x1xf32> to vector<8x8xf32>
    %235 = arith.mulf %230, %234 : vector<8x8xf32>
    %236 = vector.extract_strided_slice %222 {offsets = [0, 0], sizes = [8, 8], strides = [1, 1]} : vector<16x8xf32> to vector<8x8xf32>
    %cst_154 = arith.constant dense<0.000000e+00> : vector<8x8xf32>
    %237 = tpu.matmul %235, %236, %cst_154 {dimension_numbers = #tpu.dot_dimension_numbers<[1], [0], [0], [1], [0, 0, 1, 1], [], []>} : vector<8x8xf32>, vector<8x8xf32>, vector<8x8xf32> -> vector<8x8xf32>
    %c1_155 = arith.constant 1 : index
    %c0_156 = arith.constant 0 : index
    %c0_157 = arith.constant 0 : index
    %238 = vector.load %arg12[%c1_155, %c0_156, %c0_157] : memref<8x8x32xf32, #tpu.memory_space<vmem>>, vector<1x8x32xf32>
    %239 = vector.shape_cast %238 : vector<1x8x32xf32> to vector<8x32xf32>
    %cst_158 = arith.constant dense<0.000000e+00> : vector<8x32xf32>
    %240 = tpu.matmul %237, %239, %cst_158 {dimension_numbers = #tpu.dot_dimension_numbers<[1], [0], [0], [1], [0, 0, 1, 1], [], []>} : vector<8x8xf32>, vector<8x32xf32>, vector<8x32xf32> -> vector<8x32xf32>
    %241 = arith.addf %182, %240 : vector<8x32xf32>
    %242 = vector.extract_strided_slice %208 {offsets = [8, 0], sizes = [8, 8], strides = [1, 1]} : vector<16x8xf32> to vector<8x8xf32>
    %243 = vector.extract_strided_slice %215 {offsets = [8, 0], sizes = [8, 8], strides = [1, 1]} : vector<16x8xf32> to vector<8x8xf32>
    %cst_159 = arith.constant dense<0.000000e+00> : vector<8x8xf32>
    %244 = tpu.matmul %242, %243, %cst_159 {dimension_numbers = #tpu.dot_dimension_numbers<[1], [1], [0], [0], [0, 0, 1, 0], [], []>} : vector<8x8xf32>, vector<8x8xf32>, vector<8x8xf32> -> vector<8x8xf32>
    %cst_160 = arith.constant dense<0xFF800000> : vector<8xf32>
    %245 = vector.multi_reduction <maximumf>, %244, %cst_160 [1] : vector<8x8xf32> to vector<8xf32>
    %246 = vector.shape_cast %245 : vector<8xf32> to vector<8x1xf32>
    %247 = vector.broadcast %246 : vector<8x1xf32> to vector<8x8xf32>
    %248 = arith.subf %244, %247 : vector<8x8xf32>
    %249 = math.exp %248 : vector<8x8xf32>
    %cst_161 = arith.constant dense<0.000000e+00> : vector<8xf32>
    %250 = vector.multi_reduction <add>, %249, %cst_161 [1] : vector<8x8xf32> to vector<8xf32>
    %251 = vector.shape_cast %250 : vector<8xf32> to vector<8x1xf32>
    %252 = tpu.reciprocal %251 {approx = true} : vector<8x1xf32> -> vector<8x1xf32>
    %253 = vector.broadcast %252 : vector<8x1xf32> to vector<8x8xf32>
    %254 = arith.mulf %249, %253 : vector<8x8xf32>
    %255 = vector.extract_strided_slice %222 {offsets = [8, 0], sizes = [8, 8], strides = [1, 1]} : vector<16x8xf32> to vector<8x8xf32>
    %cst_162 = arith.constant dense<0.000000e+00> : vector<8x8xf32>
    %256 = tpu.matmul %254, %255, %cst_162 {dimension_numbers = #tpu.dot_dimension_numbers<[1], [0], [0], [1], [0, 0, 1, 1], [], []>} : vector<8x8xf32>, vector<8x8xf32>, vector<8x8xf32> -> vector<8x8xf32>
    %c1_163 = arith.constant 1 : index
    %c0_164 = arith.constant 0 : index
    %c0_165 = arith.constant 0 : index
    %257 = vector.load %arg12[%c1_163, %c0_164, %c0_165] : memref<8x8x32xf32, #tpu.memory_space<vmem>>, vector<1x8x32xf32>
    %258 = vector.shape_cast %257 : vector<1x8x32xf32> to vector<8x32xf32>
    %cst_166 = arith.constant dense<0.000000e+00> : vector<8x32xf32>
    %259 = tpu.matmul %256, %258, %cst_166 {dimension_numbers = #tpu.dot_dimension_numbers<[1], [0], [0], [1], [0, 0, 1, 1], [], []>} : vector<8x8xf32>, vector<8x32xf32>, vector<8x32xf32> -> vector<8x32xf32>
    %260 = arith.addf %201, %259 : vector<8x32xf32>
    %c2_167 = arith.constant 2 : index
    %c0_168 = arith.constant 0 : index
    %c0_169 = arith.constant 0 : index
    %261 = vector.load %arg6[%c2_167, %c0_168, %c0_169] : memref<8x32x8xf32, #tpu.memory_space<vmem>>, vector<1x32x8xf32>
    %262 = vector.shape_cast %261 : vector<1x32x8xf32> to vector<32x8xf32>
    %cst_170 = arith.constant dense<0.000000e+00> : vector<16x8xf32>
    %263 = tpu.matmul %140, %262, %cst_170 {dimension_numbers = #tpu.dot_dimension_numbers<[1], [0], [0], [1], [0, 0, 1, 1], [], []>} : vector<16x32xf32>, vector<32x8xf32>, vector<16x8xf32> -> vector<16x8xf32>
    %c2_171 = arith.constant 2 : index
    %c0_172 = arith.constant 0 : index
    %c0_173 = arith.constant 0 : index
    %264 = vector.load %arg7[%c2_171, %c0_172, %c0_173] : memref<8x1x8xf32, #tpu.memory_space<vmem>>, vector<1x1x8xf32>
    %265 = vector.shape_cast %264 : vector<1x1x8xf32> to vector<1x8xf32>
    %266 = vector.broadcast %265 : vector<1x8xf32> to vector<16x8xf32>
    %267 = arith.addf %263, %266 : vector<16x8xf32>
    %c2_174 = arith.constant 2 : index
    %c0_175 = arith.constant 0 : index
    %c0_176 = arith.constant 0 : index
    %268 = vector.load %arg8[%c2_174, %c0_175, %c0_176] : memref<8x32x8xf32, #tpu.memory_space<vmem>>, vector<1x32x8xf32>
    %269 = vector.shape_cast %268 : vector<1x32x8xf32> to vector<32x8xf32>
    %cst_177 = arith.constant dense<0.000000e+00> : vector<16x8xf32>
    %270 = tpu.matmul %140, %269, %cst_177 {dimension_numbers = #tpu.dot_dimension_numbers<[1], [0], [0], [1], [0, 0, 1, 1], [], []>} : vector<16x32xf32>, vector<32x8xf32>, vector<16x8xf32> -> vector<16x8xf32>
    %c2_178 = arith.constant 2 : index
    %c0_179 = arith.constant 0 : index
    %c0_180 = arith.constant 0 : index
    %271 = vector.load %arg9[%c2_178, %c0_179, %c0_180] : memref<8x1x8xf32, #tpu.memory_space<vmem>>, vector<1x1x8xf32>
    %272 = vector.shape_cast %271 : vector<1x1x8xf32> to vector<1x8xf32>
    %273 = vector.broadcast %272 : vector<1x8xf32> to vector<16x8xf32>
    %274 = arith.addf %270, %273 : vector<16x8xf32>
    %c2_181 = arith.constant 2 : index
    %c0_182 = arith.constant 0 : index
    %c0_183 = arith.constant 0 : index
    %275 = vector.load %arg10[%c2_181, %c0_182, %c0_183] : memref<8x32x8xf32, #tpu.memory_space<vmem>>, vector<1x32x8xf32>
    %276 = vector.shape_cast %275 : vector<1x32x8xf32> to vector<32x8xf32>
    %cst_184 = arith.constant dense<0.000000e+00> : vector<16x8xf32>
    %277 = tpu.matmul %140, %276, %cst_184 {dimension_numbers = #tpu.dot_dimension_numbers<[1], [0], [0], [1], [0, 0, 1, 1], [], []>} : vector<16x32xf32>, vector<32x8xf32>, vector<16x8xf32> -> vector<16x8xf32>
    %c2_185 = arith.constant 2 : index
    %c0_186 = arith.constant 0 : index
    %c0_187 = arith.constant 0 : index
    %278 = vector.load %arg11[%c2_185, %c0_186, %c0_187] : memref<8x1x8xf32, #tpu.memory_space<vmem>>, vector<1x1x8xf32>
    %279 = vector.shape_cast %278 : vector<1x1x8xf32> to vector<1x8xf32>
    %280 = vector.broadcast %279 : vector<1x8xf32> to vector<16x8xf32>
    %281 = arith.addf %277, %280 : vector<16x8xf32>
    %282 = vector.extract_strided_slice %267 {offsets = [0, 0], sizes = [8, 8], strides = [1, 1]} : vector<16x8xf32> to vector<8x8xf32>
    %283 = vector.extract_strided_slice %274 {offsets = [0, 0], sizes = [8, 8], strides = [1, 1]} : vector<16x8xf32> to vector<8x8xf32>
    %cst_188 = arith.constant dense<0.000000e+00> : vector<8x8xf32>
    %284 = tpu.matmul %282, %283, %cst_188 {dimension_numbers = #tpu.dot_dimension_numbers<[1], [1], [0], [0], [0, 0, 1, 0], [], []>} : vector<8x8xf32>, vector<8x8xf32>, vector<8x8xf32> -> vector<8x8xf32>
    %cst_189 = arith.constant dense<0xFF800000> : vector<8xf32>
    %285 = vector.multi_reduction <maximumf>, %284, %cst_189 [1] : vector<8x8xf32> to vector<8xf32>
    %286 = vector.shape_cast %285 : vector<8xf32> to vector<8x1xf32>
    %287 = vector.broadcast %286 : vector<8x1xf32> to vector<8x8xf32>
    %288 = arith.subf %284, %287 : vector<8x8xf32>
    %289 = math.exp %288 : vector<8x8xf32>
    %cst_190 = arith.constant dense<0.000000e+00> : vector<8xf32>
    %290 = vector.multi_reduction <add>, %289, %cst_190 [1] : vector<8x8xf32> to vector<8xf32>
    %291 = vector.shape_cast %290 : vector<8xf32> to vector<8x1xf32>
    %292 = tpu.reciprocal %291 {approx = true} : vector<8x1xf32> -> vector<8x1xf32>
    %293 = vector.broadcast %292 : vector<8x1xf32> to vector<8x8xf32>
    %294 = arith.mulf %289, %293 : vector<8x8xf32>
    %295 = vector.extract_strided_slice %281 {offsets = [0, 0], sizes = [8, 8], strides = [1, 1]} : vector<16x8xf32> to vector<8x8xf32>
    %cst_191 = arith.constant dense<0.000000e+00> : vector<8x8xf32>
    %296 = tpu.matmul %294, %295, %cst_191 {dimension_numbers = #tpu.dot_dimension_numbers<[1], [0], [0], [1], [0, 0, 1, 1], [], []>} : vector<8x8xf32>, vector<8x8xf32>, vector<8x8xf32> -> vector<8x8xf32>
    %c2_192 = arith.constant 2 : index
    %c0_193 = arith.constant 0 : index
    %c0_194 = arith.constant 0 : index
    %297 = vector.load %arg12[%c2_192, %c0_193, %c0_194] : memref<8x8x32xf32, #tpu.memory_space<vmem>>, vector<1x8x32xf32>
    %298 = vector.shape_cast %297 : vector<1x8x32xf32> to vector<8x32xf32>
    %cst_195 = arith.constant dense<0.000000e+00> : vector<8x32xf32>
    %299 = tpu.matmul %296, %298, %cst_195 {dimension_numbers = #tpu.dot_dimension_numbers<[1], [0], [0], [1], [0, 0, 1, 1], [], []>} : vector<8x8xf32>, vector<8x32xf32>, vector<8x32xf32> -> vector<8x32xf32>
    %300 = arith.addf %241, %299 : vector<8x32xf32>
    %301 = vector.extract_strided_slice %267 {offsets = [8, 0], sizes = [8, 8], strides = [1, 1]} : vector<16x8xf32> to vector<8x8xf32>
    %302 = vector.extract_strided_slice %274 {offsets = [8, 0], sizes = [8, 8], strides = [1, 1]} : vector<16x8xf32> to vector<8x8xf32>
    %cst_196 = arith.constant dense<0.000000e+00> : vector<8x8xf32>
    %303 = tpu.matmul %301, %302, %cst_196 {dimension_numbers = #tpu.dot_dimension_numbers<[1], [1], [0], [0], [0, 0, 1, 0], [], []>} : vector<8x8xf32>, vector<8x8xf32>, vector<8x8xf32> -> vector<8x8xf32>
    %cst_197 = arith.constant dense<0xFF800000> : vector<8xf32>
    %304 = vector.multi_reduction <maximumf>, %303, %cst_197 [1] : vector<8x8xf32> to vector<8xf32>
    %305 = vector.shape_cast %304 : vector<8xf32> to vector<8x1xf32>
    %306 = vector.broadcast %305 : vector<8x1xf32> to vector<8x8xf32>
    %307 = arith.subf %303, %306 : vector<8x8xf32>
    %308 = math.exp %307 : vector<8x8xf32>
    %cst_198 = arith.constant dense<0.000000e+00> : vector<8xf32>
    %309 = vector.multi_reduction <add>, %308, %cst_198 [1] : vector<8x8xf32> to vector<8xf32>
    %310 = vector.shape_cast %309 : vector<8xf32> to vector<8x1xf32>
    %311 = tpu.reciprocal %310 {approx = true} : vector<8x1xf32> -> vector<8x1xf32>
    %312 = vector.broadcast %311 : vector<8x1xf32> to vector<8x8xf32>
    %313 = arith.mulf %308, %312 : vector<8x8xf32>
    %314 = vector.extract_strided_slice %281 {offsets = [8, 0], sizes = [8, 8], strides = [1, 1]} : vector<16x8xf32> to vector<8x8xf32>
    %cst_199 = arith.constant dense<0.000000e+00> : vector<8x8xf32>
    %315 = tpu.matmul %313, %314, %cst_199 {dimension_numbers = #tpu.dot_dimension_numbers<[1], [0], [0], [1], [0, 0, 1, 1], [], []>} : vector<8x8xf32>, vector<8x8xf32>, vector<8x8xf32> -> vector<8x8xf32>
    %c2_200 = arith.constant 2 : index
    %c0_201 = arith.constant 0 : index
    %c0_202 = arith.constant 0 : index
    %316 = vector.load %arg12[%c2_200, %c0_201, %c0_202] : memref<8x8x32xf32, #tpu.memory_space<vmem>>, vector<1x8x32xf32>
    %317 = vector.shape_cast %316 : vector<1x8x32xf32> to vector<8x32xf32>
    %cst_203 = arith.constant dense<0.000000e+00> : vector<8x32xf32>
    %318 = tpu.matmul %315, %317, %cst_203 {dimension_numbers = #tpu.dot_dimension_numbers<[1], [0], [0], [1], [0, 0, 1, 1], [], []>} : vector<8x8xf32>, vector<8x32xf32>, vector<8x32xf32> -> vector<8x32xf32>
    %319 = arith.addf %260, %318 : vector<8x32xf32>
    %c3_204 = arith.constant 3 : index
    %c0_205 = arith.constant 0 : index
    %c0_206 = arith.constant 0 : index
    %320 = vector.load %arg6[%c3_204, %c0_205, %c0_206] : memref<8x32x8xf32, #tpu.memory_space<vmem>>, vector<1x32x8xf32>
    %321 = vector.shape_cast %320 : vector<1x32x8xf32> to vector<32x8xf32>
    %cst_207 = arith.constant dense<0.000000e+00> : vector<16x8xf32>
    %322 = tpu.matmul %140, %321, %cst_207 {dimension_numbers = #tpu.dot_dimension_numbers<[1], [0], [0], [1], [0, 0, 1, 1], [], []>} : vector<16x32xf32>, vector<32x8xf32>, vector<16x8xf32> -> vector<16x8xf32>
    %c3_208 = arith.constant 3 : index
    %c0_209 = arith.constant 0 : index
    %c0_210 = arith.constant 0 : index
    %323 = vector.load %arg7[%c3_208, %c0_209, %c0_210] : memref<8x1x8xf32, #tpu.memory_space<vmem>>, vector<1x1x8xf32>
    %324 = vector.shape_cast %323 : vector<1x1x8xf32> to vector<1x8xf32>
    %325 = vector.broadcast %324 : vector<1x8xf32> to vector<16x8xf32>
    %326 = arith.addf %322, %325 : vector<16x8xf32>
    %c3_211 = arith.constant 3 : index
    %c0_212 = arith.constant 0 : index
    %c0_213 = arith.constant 0 : index
    %327 = vector.load %arg8[%c3_211, %c0_212, %c0_213] : memref<8x32x8xf32, #tpu.memory_space<vmem>>, vector<1x32x8xf32>
    %328 = vector.shape_cast %327 : vector<1x32x8xf32> to vector<32x8xf32>
    %cst_214 = arith.constant dense<0.000000e+00> : vector<16x8xf32>
    %329 = tpu.matmul %140, %328, %cst_214 {dimension_numbers = #tpu.dot_dimension_numbers<[1], [0], [0], [1], [0, 0, 1, 1], [], []>} : vector<16x32xf32>, vector<32x8xf32>, vector<16x8xf32> -> vector<16x8xf32>
    %c3_215 = arith.constant 3 : index
    %c0_216 = arith.constant 0 : index
    %c0_217 = arith.constant 0 : index
    %330 = vector.load %arg9[%c3_215, %c0_216, %c0_217] : memref<8x1x8xf32, #tpu.memory_space<vmem>>, vector<1x1x8xf32>
    %331 = vector.shape_cast %330 : vector<1x1x8xf32> to vector<1x8xf32>
    %332 = vector.broadcast %331 : vector<1x8xf32> to vector<16x8xf32>
    %333 = arith.addf %329, %332 : vector<16x8xf32>
    %c3_218 = arith.constant 3 : index
    %c0_219 = arith.constant 0 : index
    %c0_220 = arith.constant 0 : index
    %334 = vector.load %arg10[%c3_218, %c0_219, %c0_220] : memref<8x32x8xf32, #tpu.memory_space<vmem>>, vector<1x32x8xf32>
    %335 = vector.shape_cast %334 : vector<1x32x8xf32> to vector<32x8xf32>
    %cst_221 = arith.constant dense<0.000000e+00> : vector<16x8xf32>
    %336 = tpu.matmul %140, %335, %cst_221 {dimension_numbers = #tpu.dot_dimension_numbers<[1], [0], [0], [1], [0, 0, 1, 1], [], []>} : vector<16x32xf32>, vector<32x8xf32>, vector<16x8xf32> -> vector<16x8xf32>
    %c3_222 = arith.constant 3 : index
    %c0_223 = arith.constant 0 : index
    %c0_224 = arith.constant 0 : index
    %337 = vector.load %arg11[%c3_222, %c0_223, %c0_224] : memref<8x1x8xf32, #tpu.memory_space<vmem>>, vector<1x1x8xf32>
    %338 = vector.shape_cast %337 : vector<1x1x8xf32> to vector<1x8xf32>
    %339 = vector.broadcast %338 : vector<1x8xf32> to vector<16x8xf32>
    %340 = arith.addf %336, %339 : vector<16x8xf32>
    %341 = vector.extract_strided_slice %326 {offsets = [0, 0], sizes = [8, 8], strides = [1, 1]} : vector<16x8xf32> to vector<8x8xf32>
    %342 = vector.extract_strided_slice %333 {offsets = [0, 0], sizes = [8, 8], strides = [1, 1]} : vector<16x8xf32> to vector<8x8xf32>
    %cst_225 = arith.constant dense<0.000000e+00> : vector<8x8xf32>
    %343 = tpu.matmul %341, %342, %cst_225 {dimension_numbers = #tpu.dot_dimension_numbers<[1], [1], [0], [0], [0, 0, 1, 0], [], []>} : vector<8x8xf32>, vector<8x8xf32>, vector<8x8xf32> -> vector<8x8xf32>
    %cst_226 = arith.constant dense<0xFF800000> : vector<8xf32>
    %344 = vector.multi_reduction <maximumf>, %343, %cst_226 [1] : vector<8x8xf32> to vector<8xf32>
    %345 = vector.shape_cast %344 : vector<8xf32> to vector<8x1xf32>
    %346 = vector.broadcast %345 : vector<8x1xf32> to vector<8x8xf32>
    %347 = arith.subf %343, %346 : vector<8x8xf32>
    %348 = math.exp %347 : vector<8x8xf32>
    %cst_227 = arith.constant dense<0.000000e+00> : vector<8xf32>
    %349 = vector.multi_reduction <add>, %348, %cst_227 [1] : vector<8x8xf32> to vector<8xf32>
    %350 = vector.shape_cast %349 : vector<8xf32> to vector<8x1xf32>
    %351 = tpu.reciprocal %350 {approx = true} : vector<8x1xf32> -> vector<8x1xf32>
    %352 = vector.broadcast %351 : vector<8x1xf32> to vector<8x8xf32>
    %353 = arith.mulf %348, %352 : vector<8x8xf32>
    %354 = vector.extract_strided_slice %340 {offsets = [0, 0], sizes = [8, 8], strides = [1, 1]} : vector<16x8xf32> to vector<8x8xf32>
    %cst_228 = arith.constant dense<0.000000e+00> : vector<8x8xf32>
    %355 = tpu.matmul %353, %354, %cst_228 {dimension_numbers = #tpu.dot_dimension_numbers<[1], [0], [0], [1], [0, 0, 1, 1], [], []>} : vector<8x8xf32>, vector<8x8xf32>, vector<8x8xf32> -> vector<8x8xf32>
    %c3_229 = arith.constant 3 : index
    %c0_230 = arith.constant 0 : index
    %c0_231 = arith.constant 0 : index
    %356 = vector.load %arg12[%c3_229, %c0_230, %c0_231] : memref<8x8x32xf32, #tpu.memory_space<vmem>>, vector<1x8x32xf32>
    %357 = vector.shape_cast %356 : vector<1x8x32xf32> to vector<8x32xf32>
    %cst_232 = arith.constant dense<0.000000e+00> : vector<8x32xf32>
    %358 = tpu.matmul %355, %357, %cst_232 {dimension_numbers = #tpu.dot_dimension_numbers<[1], [0], [0], [1], [0, 0, 1, 1], [], []>} : vector<8x8xf32>, vector<8x32xf32>, vector<8x32xf32> -> vector<8x32xf32>
    %359 = arith.addf %300, %358 : vector<8x32xf32>
    %360 = vector.extract_strided_slice %326 {offsets = [8, 0], sizes = [8, 8], strides = [1, 1]} : vector<16x8xf32> to vector<8x8xf32>
    %361 = vector.extract_strided_slice %333 {offsets = [8, 0], sizes = [8, 8], strides = [1, 1]} : vector<16x8xf32> to vector<8x8xf32>
    %cst_233 = arith.constant dense<0.000000e+00> : vector<8x8xf32>
    %362 = tpu.matmul %360, %361, %cst_233 {dimension_numbers = #tpu.dot_dimension_numbers<[1], [1], [0], [0], [0, 0, 1, 0], [], []>} : vector<8x8xf32>, vector<8x8xf32>, vector<8x8xf32> -> vector<8x8xf32>
    %cst_234 = arith.constant dense<0xFF800000> : vector<8xf32>
    %363 = vector.multi_reduction <maximumf>, %362, %cst_234 [1] : vector<8x8xf32> to vector<8xf32>
    %364 = vector.shape_cast %363 : vector<8xf32> to vector<8x1xf32>
    %365 = vector.broadcast %364 : vector<8x1xf32> to vector<8x8xf32>
    %366 = arith.subf %362, %365 : vector<8x8xf32>
    %367 = math.exp %366 : vector<8x8xf32>
    %cst_235 = arith.constant dense<0.000000e+00> : vector<8xf32>
    %368 = vector.multi_reduction <add>, %367, %cst_235 [1] : vector<8x8xf32> to vector<8xf32>
    %369 = vector.shape_cast %368 : vector<8xf32> to vector<8x1xf32>
    %370 = tpu.reciprocal %369 {approx = true} : vector<8x1xf32> -> vector<8x1xf32>
    %371 = vector.broadcast %370 : vector<8x1xf32> to vector<8x8xf32>
    %372 = arith.mulf %367, %371 : vector<8x8xf32>
    %373 = vector.extract_strided_slice %340 {offsets = [8, 0], sizes = [8, 8], strides = [1, 1]} : vector<16x8xf32> to vector<8x8xf32>
    %cst_236 = arith.constant dense<0.000000e+00> : vector<8x8xf32>
    %374 = tpu.matmul %372, %373, %cst_236 {dimension_numbers = #tpu.dot_dimension_numbers<[1], [0], [0], [1], [0, 0, 1, 1], [], []>} : vector<8x8xf32>, vector<8x8xf32>, vector<8x8xf32> -> vector<8x8xf32>
    %c3_237 = arith.constant 3 : index
    %c0_238 = arith.constant 0 : index
    %c0_239 = arith.constant 0 : index
    %375 = vector.load %arg12[%c3_237, %c0_238, %c0_239] : memref<8x8x32xf32, #tpu.memory_space<vmem>>, vector<1x8x32xf32>
    %376 = vector.shape_cast %375 : vector<1x8x32xf32> to vector<8x32xf32>
    %cst_240 = arith.constant dense<0.000000e+00> : vector<8x32xf32>
    %377 = tpu.matmul %374, %376, %cst_240 {dimension_numbers = #tpu.dot_dimension_numbers<[1], [0], [0], [1], [0, 0, 1, 1], [], []>} : vector<8x8xf32>, vector<8x32xf32>, vector<8x32xf32> -> vector<8x32xf32>
    %378 = arith.addf %319, %377 : vector<8x32xf32>
    %379 = tpu.concatenate %359, %378 in 0 : vector<8x32xf32>, vector<8x32xf32> -> vector<16x32xf32>
    %380 = arith.addf %116, %379 : vector<16x32xf32>
    %c0_241 = arith.constant 0 : index
    %c0_242 = arith.constant 0 : index
    %381 = vector.load %arg13[%c0_241, %c0_242] : memref<2x32xf32, #tpu.memory_space<vmem>>, vector<1x32xf32>
    %382 = vector.broadcast %381 : vector<1x32xf32> to vector<16x32xf32>
    %383 = arith.addf %380, %382 : vector<16x32xf32>
    %c0_243 = arith.constant 0 : index
    %c0_244 = arith.constant 0 : index
    %384 = vector.load %arg14[%c0_243, %c0_244] : memref<2x32xf32, #tpu.memory_space<vmem>>, vector<1x32xf32>
    %c0_245 = arith.constant 0 : index
    %c0_246 = arith.constant 0 : index
    %385 = vector.load %arg15[%c0_245, %c0_246] : memref<2x32xf32, #tpu.memory_space<vmem>>, vector<1x32xf32>
    %cst_247 = arith.constant dense<0.000000e+00> : vector<16xf32>
    %386 = vector.multi_reduction <add>, %383, %cst_247 [1] : vector<16x32xf32> to vector<16xf32>
    %387 = vector.shape_cast %386 : vector<16xf32> to vector<16x1xf32>
    %cst_248 = arith.constant 3.200000e+01 : f32
    %388 = vector.broadcast %cst_248 : f32 to vector<16x1xf32>
    %389 = arith.divf %387, %388 : vector<16x1xf32>
    %390 = vector.broadcast %389 : vector<16x1xf32> to vector<16x32xf32>
    %391 = arith.subf %383, %390 : vector<16x32xf32>
    %392 = arith.mulf %391, %391 : vector<16x32xf32>
    %cst_249 = arith.constant dense<0.000000e+00> : vector<16xf32>
    %393 = vector.multi_reduction <add>, %392, %cst_249 [1] : vector<16x32xf32> to vector<16xf32>
    %394 = vector.shape_cast %393 : vector<16xf32> to vector<16x1xf32>
    %cst_250 = arith.constant 3.200000e+01 : f32
    %395 = vector.broadcast %cst_250 : f32 to vector<16x1xf32>
    %396 = arith.divf %394, %395 : vector<16x1xf32>
    %397 = vector.broadcast %389 : vector<16x1xf32> to vector<16x32xf32>
    %398 = arith.subf %383, %397 : vector<16x32xf32>
    %cst_251 = arith.constant 9.99999974E-6 : f32
    %399 = vector.broadcast %cst_251 : f32 to vector<16x1xf32>
    %400 = arith.addf %396, %399 : vector<16x1xf32>
    %401 = math.rsqrt %400 : vector<16x1xf32>
    %402 = vector.broadcast %401 : vector<16x1xf32> to vector<16x32xf32>
    %403 = arith.mulf %398, %402 : vector<16x32xf32>
    %404 = vector.broadcast %384 : vector<1x32xf32> to vector<16x32xf32>
    %405 = arith.mulf %403, %404 : vector<16x32xf32>
    %406 = vector.broadcast %385 : vector<1x32xf32> to vector<16x32xf32>
    %407 = arith.addf %405, %406 : vector<16x32xf32>
    %c0_252 = arith.constant 0 : index
    %c0_253 = arith.constant 0 : index
    %c0_254 = arith.constant 0 : index
    %408 = vector.load %arg16[%c0_252, %c0_253, %c0_254] : memref<2x32x128xf32, #tpu.memory_space<vmem>>, vector<1x32x128xf32>
    %409 = vector.shape_cast %408 : vector<1x32x128xf32> to vector<32x128xf32>
    %cst_255 = arith.constant dense<0.000000e+00> : vector<16x128xf32>
    %410 = tpu.matmul %407, %409, %cst_255 {dimension_numbers = #tpu.dot_dimension_numbers<[1], [0], [0], [1], [0, 0, 1, 1], [], []>} : vector<16x32xf32>, vector<32x128xf32>, vector<16x128xf32> -> vector<16x128xf32>
    %c0_256 = arith.constant 0 : index
    %c0_257 = arith.constant 0 : index
    %411 = vector.load %arg17[%c0_256, %c0_257] : memref<2x128xf32, #tpu.memory_space<vmem>>, vector<1x128xf32>
    %412 = vector.broadcast %411 : vector<1x128xf32> to vector<16x128xf32>
    %413 = arith.addf %410, %412 : vector<16x128xf32>
    %cst_258 = arith.constant 5.000000e-01 : f32
    %414 = vector.broadcast %cst_258 : f32 to vector<16x128xf32>
    %415 = arith.mulf %414, %413 : vector<16x128xf32>
    %cst_259 = arith.constant 0.707106769 : f32
    %416 = vector.broadcast %cst_259 : f32 to vector<16x128xf32>
    %417 = arith.mulf %413, %416 : vector<16x128xf32>
    %cst_260 = arith.constant 0.000000e+00 : f32
    %418 = vector.broadcast %cst_260 : f32 to vector<16x128xf32>
    %419 = arith.cmpf oge, %417, %418 : vector<16x128xf32>
    %cst_261 = arith.constant 1.000000e+00 : f32
    %cst_262 = arith.constant -1.000000e+00 : f32
    %420 = vector.broadcast %cst_261 : f32 to vector<16x128xf32>
    %421 = vector.broadcast %cst_262 : f32 to vector<16x128xf32>
    %422 = arith.select %419, %420, %421 : vector<16x128xi1>, vector<16x128xf32>
    %423 = math.absf %417 : vector<16x128xf32>
    %cst_263 = arith.constant 0.327591091 : f32
    %424 = vector.broadcast %cst_263 : f32 to vector<16x128xf32>
    %425 = arith.mulf %424, %423 : vector<16x128xf32>
    %cst_264 = arith.constant 1.000000e+00 : f32
    %426 = vector.broadcast %cst_264 : f32 to vector<16x128xf32>
    %427 = arith.addf %426, %425 : vector<16x128xf32>
    %cst_265 = arith.constant 1.000000e+00 : f32
    %428 = vector.broadcast %cst_265 : f32 to vector<16x128xf32>
    %429 = arith.divf %428, %427 : vector<16x128xf32>
    %cst_266 = arith.constant 1.06140542 : f32
    %430 = vector.broadcast %cst_266 : f32 to vector<16x128xf32>
    %431 = arith.mulf %430, %429 : vector<16x128xf32>
    %cst_267 = arith.constant -1.45315206 : f32
    %432 = vector.broadcast %cst_267 : f32 to vector<16x128xf32>
    %433 = arith.addf %431, %432 : vector<16x128xf32>
    %434 = arith.mulf %433, %429 : vector<16x128xf32>
    %cst_268 = arith.constant 1.42141378 : f32
    %435 = vector.broadcast %cst_268 : f32 to vector<16x128xf32>
    %436 = arith.addf %434, %435 : vector<16x128xf32>
    %437 = arith.mulf %436, %429 : vector<16x128xf32>
    %cst_269 = arith.constant -0.284496725 : f32
    %438 = vector.broadcast %cst_269 : f32 to vector<16x128xf32>
    %439 = arith.addf %437, %438 : vector<16x128xf32>
    %440 = arith.mulf %439, %429 : vector<16x128xf32>
    %cst_270 = arith.constant 0.254829586 : f32
    %441 = vector.broadcast %cst_270 : f32 to vector<16x128xf32>
    %442 = arith.addf %440, %441 : vector<16x128xf32>
    %443 = arith.mulf %442, %429 : vector<16x128xf32>
    %cst_271 = arith.constant 0.000000e+00 : f32
    %444 = vector.broadcast %cst_271 : f32 to vector<16x128xf32>
    %445 = arith.subf %444, %423 : vector<16x128xf32>
    %446 = arith.mulf %445, %423 : vector<16x128xf32>
    %447 = math.exp %446 : vector<16x128xf32>
    %448 = arith.mulf %443, %447 : vector<16x128xf32>
    %cst_272 = arith.constant 1.000000e+00 : f32
    %449 = vector.broadcast %cst_272 : f32 to vector<16x128xf32>
    %450 = arith.subf %449, %448 : vector<16x128xf32>
    %451 = arith.mulf %422, %450 : vector<16x128xf32>
    %cst_273 = arith.constant 1.000000e+00 : f32
    %452 = vector.broadcast %cst_273 : f32 to vector<16x128xf32>
    %453 = arith.addf %452, %451 : vector<16x128xf32>
    %454 = arith.mulf %415, %453 : vector<16x128xf32>
    %c0_274 = arith.constant 0 : index
    %c0_275 = arith.constant 0 : index
    %c0_276 = arith.constant 0 : index
    %455 = vector.load %arg18[%c0_274, %c0_275, %c0_276] : memref<2x128x32xf32, #tpu.memory_space<vmem>>, vector<1x128x32xf32>
    %456 = vector.shape_cast %455 : vector<1x128x32xf32> to vector<128x32xf32>
    %cst_277 = arith.constant dense<0.000000e+00> : vector<16x32xf32>
    %457 = tpu.matmul %454, %456, %cst_277 {dimension_numbers = #tpu.dot_dimension_numbers<[1], [0], [0], [1], [0, 0, 1, 1], [], []>} : vector<16x128xf32>, vector<128x32xf32>, vector<16x32xf32> -> vector<16x32xf32>
    %458 = arith.addf %383, %457 : vector<16x32xf32>
    %c0_278 = arith.constant 0 : index
    %c0_279 = arith.constant 0 : index
    %459 = vector.load %arg19[%c0_278, %c0_279] : memref<2x32xf32, #tpu.memory_space<vmem>>, vector<1x32xf32>
    %460 = vector.broadcast %459 : vector<1x32xf32> to vector<16x32xf32>
    %461 = arith.addf %458, %460 : vector<16x32xf32>
    %c1_280 = arith.constant 1 : index
    %c0_281 = arith.constant 0 : index
    %462 = vector.load %arg4[%c1_280, %c0_281] : memref<2x32xf32, #tpu.memory_space<vmem>>, vector<1x32xf32>
    %c1_282 = arith.constant 1 : index
    %c0_283 = arith.constant 0 : index
    %463 = vector.load %arg5[%c1_282, %c0_283] : memref<2x32xf32, #tpu.memory_space<vmem>>, vector<1x32xf32>
    %cst_284 = arith.constant dense<0.000000e+00> : vector<16xf32>
    %464 = vector.multi_reduction <add>, %461, %cst_284 [1] : vector<16x32xf32> to vector<16xf32>
    %465 = vector.shape_cast %464 : vector<16xf32> to vector<16x1xf32>
    %cst_285 = arith.constant 3.200000e+01 : f32
    %466 = vector.broadcast %cst_285 : f32 to vector<16x1xf32>
    %467 = arith.divf %465, %466 : vector<16x1xf32>
    %468 = vector.broadcast %467 : vector<16x1xf32> to vector<16x32xf32>
    %469 = arith.subf %461, %468 : vector<16x32xf32>
    %470 = arith.mulf %469, %469 : vector<16x32xf32>
    %cst_286 = arith.constant dense<0.000000e+00> : vector<16xf32>
    %471 = vector.multi_reduction <add>, %470, %cst_286 [1] : vector<16x32xf32> to vector<16xf32>
    %472 = vector.shape_cast %471 : vector<16xf32> to vector<16x1xf32>
    %cst_287 = arith.constant 3.200000e+01 : f32
    %473 = vector.broadcast %cst_287 : f32 to vector<16x1xf32>
    %474 = arith.divf %472, %473 : vector<16x1xf32>
    %475 = vector.broadcast %467 : vector<16x1xf32> to vector<16x32xf32>
    %476 = arith.subf %461, %475 : vector<16x32xf32>
    %cst_288 = arith.constant 9.99999974E-6 : f32
    %477 = vector.broadcast %cst_288 : f32 to vector<16x1xf32>
    %478 = arith.addf %474, %477 : vector<16x1xf32>
    %479 = math.rsqrt %478 : vector<16x1xf32>
    %480 = vector.broadcast %479 : vector<16x1xf32> to vector<16x32xf32>
    %481 = arith.mulf %476, %480 : vector<16x32xf32>
    %482 = vector.broadcast %462 : vector<1x32xf32> to vector<16x32xf32>
    %483 = arith.mulf %481, %482 : vector<16x32xf32>
    %484 = vector.broadcast %463 : vector<1x32xf32> to vector<16x32xf32>
    %485 = arith.addf %483, %484 : vector<16x32xf32>
    %cst_289 = arith.constant 0.000000e+00 : f32
    %486 = vector.broadcast %cst_289 : f32 to vector<8x32xf32>
    %cst_290 = arith.constant 0.000000e+00 : f32
    %487 = vector.broadcast %cst_290 : f32 to vector<8x32xf32>
    %c4_291 = arith.constant 4 : index
    %c0_292 = arith.constant 0 : index
    %c0_293 = arith.constant 0 : index
    %488 = vector.load %arg6[%c4_291, %c0_292, %c0_293] : memref<8x32x8xf32, #tpu.memory_space<vmem>>, vector<1x32x8xf32>
    %489 = vector.shape_cast %488 : vector<1x32x8xf32> to vector<32x8xf32>
    %cst_294 = arith.constant dense<0.000000e+00> : vector<16x8xf32>
    %490 = tpu.matmul %485, %489, %cst_294 {dimension_numbers = #tpu.dot_dimension_numbers<[1], [0], [0], [1], [0, 0, 1, 1], [], []>} : vector<16x32xf32>, vector<32x8xf32>, vector<16x8xf32> -> vector<16x8xf32>
    %c4_295 = arith.constant 4 : index
    %c0_296 = arith.constant 0 : index
    %c0_297 = arith.constant 0 : index
    %491 = vector.load %arg7[%c4_295, %c0_296, %c0_297] : memref<8x1x8xf32, #tpu.memory_space<vmem>>, vector<1x1x8xf32>
    %492 = vector.shape_cast %491 : vector<1x1x8xf32> to vector<1x8xf32>
    %493 = vector.broadcast %492 : vector<1x8xf32> to vector<16x8xf32>
    %494 = arith.addf %490, %493 : vector<16x8xf32>
    %c4_298 = arith.constant 4 : index
    %c0_299 = arith.constant 0 : index
    %c0_300 = arith.constant 0 : index
    %495 = vector.load %arg8[%c4_298, %c0_299, %c0_300] : memref<8x32x8xf32, #tpu.memory_space<vmem>>, vector<1x32x8xf32>
    %496 = vector.shape_cast %495 : vector<1x32x8xf32> to vector<32x8xf32>
    %cst_301 = arith.constant dense<0.000000e+00> : vector<16x8xf32>
    %497 = tpu.matmul %485, %496, %cst_301 {dimension_numbers = #tpu.dot_dimension_numbers<[1], [0], [0], [1], [0, 0, 1, 1], [], []>} : vector<16x32xf32>, vector<32x8xf32>, vector<16x8xf32> -> vector<16x8xf32>
    %c4_302 = arith.constant 4 : index
    %c0_303 = arith.constant 0 : index
    %c0_304 = arith.constant 0 : index
    %498 = vector.load %arg9[%c4_302, %c0_303, %c0_304] : memref<8x1x8xf32, #tpu.memory_space<vmem>>, vector<1x1x8xf32>
    %499 = vector.shape_cast %498 : vector<1x1x8xf32> to vector<1x8xf32>
    %500 = vector.broadcast %499 : vector<1x8xf32> to vector<16x8xf32>
    %501 = arith.addf %497, %500 : vector<16x8xf32>
    %c4_305 = arith.constant 4 : index
    %c0_306 = arith.constant 0 : index
    %c0_307 = arith.constant 0 : index
    %502 = vector.load %arg10[%c4_305, %c0_306, %c0_307] : memref<8x32x8xf32, #tpu.memory_space<vmem>>, vector<1x32x8xf32>
    %503 = vector.shape_cast %502 : vector<1x32x8xf32> to vector<32x8xf32>
    %cst_308 = arith.constant dense<0.000000e+00> : vector<16x8xf32>
    %504 = tpu.matmul %485, %503, %cst_308 {dimension_numbers = #tpu.dot_dimension_numbers<[1], [0], [0], [1], [0, 0, 1, 1], [], []>} : vector<16x32xf32>, vector<32x8xf32>, vector<16x8xf32> -> vector<16x8xf32>
    %c4_309 = arith.constant 4 : index
    %c0_310 = arith.constant 0 : index
    %c0_311 = arith.constant 0 : index
    %505 = vector.load %arg11[%c4_309, %c0_310, %c0_311] : memref<8x1x8xf32, #tpu.memory_space<vmem>>, vector<1x1x8xf32>
    %506 = vector.shape_cast %505 : vector<1x1x8xf32> to vector<1x8xf32>
    %507 = vector.broadcast %506 : vector<1x8xf32> to vector<16x8xf32>
    %508 = arith.addf %504, %507 : vector<16x8xf32>
    %509 = vector.extract_strided_slice %494 {offsets = [0, 0], sizes = [8, 8], strides = [1, 1]} : vector<16x8xf32> to vector<8x8xf32>
    %510 = vector.extract_strided_slice %501 {offsets = [0, 0], sizes = [8, 8], strides = [1, 1]} : vector<16x8xf32> to vector<8x8xf32>
    %cst_312 = arith.constant dense<0.000000e+00> : vector<8x8xf32>
    %511 = tpu.matmul %509, %510, %cst_312 {dimension_numbers = #tpu.dot_dimension_numbers<[1], [1], [0], [0], [0, 0, 1, 0], [], []>} : vector<8x8xf32>, vector<8x8xf32>, vector<8x8xf32> -> vector<8x8xf32>
    %cst_313 = arith.constant dense<0xFF800000> : vector<8xf32>
    %512 = vector.multi_reduction <maximumf>, %511, %cst_313 [1] : vector<8x8xf32> to vector<8xf32>
    %513 = vector.shape_cast %512 : vector<8xf32> to vector<8x1xf32>
    %514 = vector.broadcast %513 : vector<8x1xf32> to vector<8x8xf32>
    %515 = arith.subf %511, %514 : vector<8x8xf32>
    %516 = math.exp %515 : vector<8x8xf32>
    %cst_314 = arith.constant dense<0.000000e+00> : vector<8xf32>
    %517 = vector.multi_reduction <add>, %516, %cst_314 [1] : vector<8x8xf32> to vector<8xf32>
    %518 = vector.shape_cast %517 : vector<8xf32> to vector<8x1xf32>
    %519 = tpu.reciprocal %518 {approx = true} : vector<8x1xf32> -> vector<8x1xf32>
    %520 = vector.broadcast %519 : vector<8x1xf32> to vector<8x8xf32>
    %521 = arith.mulf %516, %520 : vector<8x8xf32>
    %522 = vector.extract_strided_slice %508 {offsets = [0, 0], sizes = [8, 8], strides = [1, 1]} : vector<16x8xf32> to vector<8x8xf32>
    %cst_315 = arith.constant dense<0.000000e+00> : vector<8x8xf32>
    %523 = tpu.matmul %521, %522, %cst_315 {dimension_numbers = #tpu.dot_dimension_numbers<[1], [0], [0], [1], [0, 0, 1, 1], [], []>} : vector<8x8xf32>, vector<8x8xf32>, vector<8x8xf32> -> vector<8x8xf32>
    %c4_316 = arith.constant 4 : index
    %c0_317 = arith.constant 0 : index
    %c0_318 = arith.constant 0 : index
    %524 = vector.load %arg12[%c4_316, %c0_317, %c0_318] : memref<8x8x32xf32, #tpu.memory_space<vmem>>, vector<1x8x32xf32>
    %525 = vector.shape_cast %524 : vector<1x8x32xf32> to vector<8x32xf32>
    %cst_319 = arith.constant dense<0.000000e+00> : vector<8x32xf32>
    %526 = tpu.matmul %523, %525, %cst_319 {dimension_numbers = #tpu.dot_dimension_numbers<[1], [0], [0], [1], [0, 0, 1, 1], [], []>} : vector<8x8xf32>, vector<8x32xf32>, vector<8x32xf32> -> vector<8x32xf32>
    %527 = arith.addf %486, %526 : vector<8x32xf32>
    %528 = vector.extract_strided_slice %494 {offsets = [8, 0], sizes = [8, 8], strides = [1, 1]} : vector<16x8xf32> to vector<8x8xf32>
    %529 = vector.extract_strided_slice %501 {offsets = [8, 0], sizes = [8, 8], strides = [1, 1]} : vector<16x8xf32> to vector<8x8xf32>
    %cst_320 = arith.constant dense<0.000000e+00> : vector<8x8xf32>
    %530 = tpu.matmul %528, %529, %cst_320 {dimension_numbers = #tpu.dot_dimension_numbers<[1], [1], [0], [0], [0, 0, 1, 0], [], []>} : vector<8x8xf32>, vector<8x8xf32>, vector<8x8xf32> -> vector<8x8xf32>
    %cst_321 = arith.constant dense<0xFF800000> : vector<8xf32>
    %531 = vector.multi_reduction <maximumf>, %530, %cst_321 [1] : vector<8x8xf32> to vector<8xf32>
    %532 = vector.shape_cast %531 : vector<8xf32> to vector<8x1xf32>
    %533 = vector.broadcast %532 : vector<8x1xf32> to vector<8x8xf32>
    %534 = arith.subf %530, %533 : vector<8x8xf32>
    %535 = math.exp %534 : vector<8x8xf32>
    %cst_322 = arith.constant dense<0.000000e+00> : vector<8xf32>
    %536 = vector.multi_reduction <add>, %535, %cst_322 [1] : vector<8x8xf32> to vector<8xf32>
    %537 = vector.shape_cast %536 : vector<8xf32> to vector<8x1xf32>
    %538 = tpu.reciprocal %537 {approx = true} : vector<8x1xf32> -> vector<8x1xf32>
    %539 = vector.broadcast %538 : vector<8x1xf32> to vector<8x8xf32>
    %540 = arith.mulf %535, %539 : vector<8x8xf32>
    %541 = vector.extract_strided_slice %508 {offsets = [8, 0], sizes = [8, 8], strides = [1, 1]} : vector<16x8xf32> to vector<8x8xf32>
    %cst_323 = arith.constant dense<0.000000e+00> : vector<8x8xf32>
    %542 = tpu.matmul %540, %541, %cst_323 {dimension_numbers = #tpu.dot_dimension_numbers<[1], [0], [0], [1], [0, 0, 1, 1], [], []>} : vector<8x8xf32>, vector<8x8xf32>, vector<8x8xf32> -> vector<8x8xf32>
    %c4_324 = arith.constant 4 : index
    %c0_325 = arith.constant 0 : index
    %c0_326 = arith.constant 0 : index
    %543 = vector.load %arg12[%c4_324, %c0_325, %c0_326] : memref<8x8x32xf32, #tpu.memory_space<vmem>>, vector<1x8x32xf32>
    %544 = vector.shape_cast %543 : vector<1x8x32xf32> to vector<8x32xf32>
    %cst_327 = arith.constant dense<0.000000e+00> : vector<8x32xf32>
    %545 = tpu.matmul %542, %544, %cst_327 {dimension_numbers = #tpu.dot_dimension_numbers<[1], [0], [0], [1], [0, 0, 1, 1], [], []>} : vector<8x8xf32>, vector<8x32xf32>, vector<8x32xf32> -> vector<8x32xf32>
    %546 = arith.addf %487, %545 : vector<8x32xf32>
    %c5_328 = arith.constant 5 : index
    %c0_329 = arith.constant 0 : index
    %c0_330 = arith.constant 0 : index
    %547 = vector.load %arg6[%c5_328, %c0_329, %c0_330] : memref<8x32x8xf32, #tpu.memory_space<vmem>>, vector<1x32x8xf32>
    %548 = vector.shape_cast %547 : vector<1x32x8xf32> to vector<32x8xf32>
    %cst_331 = arith.constant dense<0.000000e+00> : vector<16x8xf32>
    %549 = tpu.matmul %485, %548, %cst_331 {dimension_numbers = #tpu.dot_dimension_numbers<[1], [0], [0], [1], [0, 0, 1, 1], [], []>} : vector<16x32xf32>, vector<32x8xf32>, vector<16x8xf32> -> vector<16x8xf32>
    %c5_332 = arith.constant 5 : index
    %c0_333 = arith.constant 0 : index
    %c0_334 = arith.constant 0 : index
    %550 = vector.load %arg7[%c5_332, %c0_333, %c0_334] : memref<8x1x8xf32, #tpu.memory_space<vmem>>, vector<1x1x8xf32>
    %551 = vector.shape_cast %550 : vector<1x1x8xf32> to vector<1x8xf32>
    %552 = vector.broadcast %551 : vector<1x8xf32> to vector<16x8xf32>
    %553 = arith.addf %549, %552 : vector<16x8xf32>
    %c5_335 = arith.constant 5 : index
    %c0_336 = arith.constant 0 : index
    %c0_337 = arith.constant 0 : index
    %554 = vector.load %arg8[%c5_335, %c0_336, %c0_337] : memref<8x32x8xf32, #tpu.memory_space<vmem>>, vector<1x32x8xf32>
    %555 = vector.shape_cast %554 : vector<1x32x8xf32> to vector<32x8xf32>
    %cst_338 = arith.constant dense<0.000000e+00> : vector<16x8xf32>
    %556 = tpu.matmul %485, %555, %cst_338 {dimension_numbers = #tpu.dot_dimension_numbers<[1], [0], [0], [1], [0, 0, 1, 1], [], []>} : vector<16x32xf32>, vector<32x8xf32>, vector<16x8xf32> -> vector<16x8xf32>
    %c5_339 = arith.constant 5 : index
    %c0_340 = arith.constant 0 : index
    %c0_341 = arith.constant 0 : index
    %557 = vector.load %arg9[%c5_339, %c0_340, %c0_341] : memref<8x1x8xf32, #tpu.memory_space<vmem>>, vector<1x1x8xf32>
    %558 = vector.shape_cast %557 : vector<1x1x8xf32> to vector<1x8xf32>
    %559 = vector.broadcast %558 : vector<1x8xf32> to vector<16x8xf32>
    %560 = arith.addf %556, %559 : vector<16x8xf32>
    %c5_342 = arith.constant 5 : index
    %c0_343 = arith.constant 0 : index
    %c0_344 = arith.constant 0 : index
    %561 = vector.load %arg10[%c5_342, %c0_343, %c0_344] : memref<8x32x8xf32, #tpu.memory_space<vmem>>, vector<1x32x8xf32>
    %562 = vector.shape_cast %561 : vector<1x32x8xf32> to vector<32x8xf32>
    %cst_345 = arith.constant dense<0.000000e+00> : vector<16x8xf32>
    %563 = tpu.matmul %485, %562, %cst_345 {dimension_numbers = #tpu.dot_dimension_numbers<[1], [0], [0], [1], [0, 0, 1, 1], [], []>} : vector<16x32xf32>, vector<32x8xf32>, vector<16x8xf32> -> vector<16x8xf32>
    %c5_346 = arith.constant 5 : index
    %c0_347 = arith.constant 0 : index
    %c0_348 = arith.constant 0 : index
    %564 = vector.load %arg11[%c5_346, %c0_347, %c0_348] : memref<8x1x8xf32, #tpu.memory_space<vmem>>, vector<1x1x8xf32>
    %565 = vector.shape_cast %564 : vector<1x1x8xf32> to vector<1x8xf32>
    %566 = vector.broadcast %565 : vector<1x8xf32> to vector<16x8xf32>
    %567 = arith.addf %563, %566 : vector<16x8xf32>
    %568 = vector.extract_strided_slice %553 {offsets = [0, 0], sizes = [8, 8], strides = [1, 1]} : vector<16x8xf32> to vector<8x8xf32>
    %569 = vector.extract_strided_slice %560 {offsets = [0, 0], sizes = [8, 8], strides = [1, 1]} : vector<16x8xf32> to vector<8x8xf32>
    %cst_349 = arith.constant dense<0.000000e+00> : vector<8x8xf32>
    %570 = tpu.matmul %568, %569, %cst_349 {dimension_numbers = #tpu.dot_dimension_numbers<[1], [1], [0], [0], [0, 0, 1, 0], [], []>} : vector<8x8xf32>, vector<8x8xf32>, vector<8x8xf32> -> vector<8x8xf32>
    %cst_350 = arith.constant dense<0xFF800000> : vector<8xf32>
    %571 = vector.multi_reduction <maximumf>, %570, %cst_350 [1] : vector<8x8xf32> to vector<8xf32>
    %572 = vector.shape_cast %571 : vector<8xf32> to vector<8x1xf32>
    %573 = vector.broadcast %572 : vector<8x1xf32> to vector<8x8xf32>
    %574 = arith.subf %570, %573 : vector<8x8xf32>
    %575 = math.exp %574 : vector<8x8xf32>
    %cst_351 = arith.constant dense<0.000000e+00> : vector<8xf32>
    %576 = vector.multi_reduction <add>, %575, %cst_351 [1] : vector<8x8xf32> to vector<8xf32>
    %577 = vector.shape_cast %576 : vector<8xf32> to vector<8x1xf32>
    %578 = tpu.reciprocal %577 {approx = true} : vector<8x1xf32> -> vector<8x1xf32>
    %579 = vector.broadcast %578 : vector<8x1xf32> to vector<8x8xf32>
    %580 = arith.mulf %575, %579 : vector<8x8xf32>
    %581 = vector.extract_strided_slice %567 {offsets = [0, 0], sizes = [8, 8], strides = [1, 1]} : vector<16x8xf32> to vector<8x8xf32>
    %cst_352 = arith.constant dense<0.000000e+00> : vector<8x8xf32>
    %582 = tpu.matmul %580, %581, %cst_352 {dimension_numbers = #tpu.dot_dimension_numbers<[1], [0], [0], [1], [0, 0, 1, 1], [], []>} : vector<8x8xf32>, vector<8x8xf32>, vector<8x8xf32> -> vector<8x8xf32>
    %c5_353 = arith.constant 5 : index
    %c0_354 = arith.constant 0 : index
    %c0_355 = arith.constant 0 : index
    %583 = vector.load %arg12[%c5_353, %c0_354, %c0_355] : memref<8x8x32xf32, #tpu.memory_space<vmem>>, vector<1x8x32xf32>
    %584 = vector.shape_cast %583 : vector<1x8x32xf32> to vector<8x32xf32>
    %cst_356 = arith.constant dense<0.000000e+00> : vector<8x32xf32>
    %585 = tpu.matmul %582, %584, %cst_356 {dimension_numbers = #tpu.dot_dimension_numbers<[1], [0], [0], [1], [0, 0, 1, 1], [], []>} : vector<8x8xf32>, vector<8x32xf32>, vector<8x32xf32> -> vector<8x32xf32>
    %586 = arith.addf %527, %585 : vector<8x32xf32>
    %587 = vector.extract_strided_slice %553 {offsets = [8, 0], sizes = [8, 8], strides = [1, 1]} : vector<16x8xf32> to vector<8x8xf32>
    %588 = vector.extract_strided_slice %560 {offsets = [8, 0], sizes = [8, 8], strides = [1, 1]} : vector<16x8xf32> to vector<8x8xf32>
    %cst_357 = arith.constant dense<0.000000e+00> : vector<8x8xf32>
    %589 = tpu.matmul %587, %588, %cst_357 {dimension_numbers = #tpu.dot_dimension_numbers<[1], [1], [0], [0], [0, 0, 1, 0], [], []>} : vector<8x8xf32>, vector<8x8xf32>, vector<8x8xf32> -> vector<8x8xf32>
    %cst_358 = arith.constant dense<0xFF800000> : vector<8xf32>
    %590 = vector.multi_reduction <maximumf>, %589, %cst_358 [1] : vector<8x8xf32> to vector<8xf32>
    %591 = vector.shape_cast %590 : vector<8xf32> to vector<8x1xf32>
    %592 = vector.broadcast %591 : vector<8x1xf32> to vector<8x8xf32>
    %593 = arith.subf %589, %592 : vector<8x8xf32>
    %594 = math.exp %593 : vector<8x8xf32>
    %cst_359 = arith.constant dense<0.000000e+00> : vector<8xf32>
    %595 = vector.multi_reduction <add>, %594, %cst_359 [1] : vector<8x8xf32> to vector<8xf32>
    %596 = vector.shape_cast %595 : vector<8xf32> to vector<8x1xf32>
    %597 = tpu.reciprocal %596 {approx = true} : vector<8x1xf32> -> vector<8x1xf32>
    %598 = vector.broadcast %597 : vector<8x1xf32> to vector<8x8xf32>
    %599 = arith.mulf %594, %598 : vector<8x8xf32>
    %600 = vector.extract_strided_slice %567 {offsets = [8, 0], sizes = [8, 8], strides = [1, 1]} : vector<16x8xf32> to vector<8x8xf32>
    %cst_360 = arith.constant dense<0.000000e+00> : vector<8x8xf32>
    %601 = tpu.matmul %599, %600, %cst_360 {dimension_numbers = #tpu.dot_dimension_numbers<[1], [0], [0], [1], [0, 0, 1, 1], [], []>} : vector<8x8xf32>, vector<8x8xf32>, vector<8x8xf32> -> vector<8x8xf32>
    %c5_361 = arith.constant 5 : index
    %c0_362 = arith.constant 0 : index
    %c0_363 = arith.constant 0 : index
    %602 = vector.load %arg12[%c5_361, %c0_362, %c0_363] : memref<8x8x32xf32, #tpu.memory_space<vmem>>, vector<1x8x32xf32>
    %603 = vector.shape_cast %602 : vector<1x8x32xf32> to vector<8x32xf32>
    %cst_364 = arith.constant dense<0.000000e+00> : vector<8x32xf32>
    %604 = tpu.matmul %601, %603, %cst_364 {dimension_numbers = #tpu.dot_dimension_numbers<[1], [0], [0], [1], [0, 0, 1, 1], [], []>} : vector<8x8xf32>, vector<8x32xf32>, vector<8x32xf32> -> vector<8x32xf32>
    %605 = arith.addf %546, %604 : vector<8x32xf32>
    %c6_365 = arith.constant 6 : index
    %c0_366 = arith.constant 0 : index
    %c0_367 = arith.constant 0 : index
    %606 = vector.load %arg6[%c6_365, %c0_366, %c0_367] : memref<8x32x8xf32, #tpu.memory_space<vmem>>, vector<1x32x8xf32>
    %607 = vector.shape_cast %606 : vector<1x32x8xf32> to vector<32x8xf32>
    %cst_368 = arith.constant dense<0.000000e+00> : vector<16x8xf32>
    %608 = tpu.matmul %485, %607, %cst_368 {dimension_numbers = #tpu.dot_dimension_numbers<[1], [0], [0], [1], [0, 0, 1, 1], [], []>} : vector<16x32xf32>, vector<32x8xf32>, vector<16x8xf32> -> vector<16x8xf32>
    %c6_369 = arith.constant 6 : index
    %c0_370 = arith.constant 0 : index
    %c0_371 = arith.constant 0 : index
    %609 = vector.load %arg7[%c6_369, %c0_370, %c0_371] : memref<8x1x8xf32, #tpu.memory_space<vmem>>, vector<1x1x8xf32>
    %610 = vector.shape_cast %609 : vector<1x1x8xf32> to vector<1x8xf32>
    %611 = vector.broadcast %610 : vector<1x8xf32> to vector<16x8xf32>
    %612 = arith.addf %608, %611 : vector<16x8xf32>
    %c6_372 = arith.constant 6 : index
    %c0_373 = arith.constant 0 : index
    %c0_374 = arith.constant 0 : index
    %613 = vector.load %arg8[%c6_372, %c0_373, %c0_374] : memref<8x32x8xf32, #tpu.memory_space<vmem>>, vector<1x32x8xf32>
    %614 = vector.shape_cast %613 : vector<1x32x8xf32> to vector<32x8xf32>
    %cst_375 = arith.constant dense<0.000000e+00> : vector<16x8xf32>
    %615 = tpu.matmul %485, %614, %cst_375 {dimension_numbers = #tpu.dot_dimension_numbers<[1], [0], [0], [1], [0, 0, 1, 1], [], []>} : vector<16x32xf32>, vector<32x8xf32>, vector<16x8xf32> -> vector<16x8xf32>
    %c6_376 = arith.constant 6 : index
    %c0_377 = arith.constant 0 : index
    %c0_378 = arith.constant 0 : index
    %616 = vector.load %arg9[%c6_376, %c0_377, %c0_378] : memref<8x1x8xf32, #tpu.memory_space<vmem>>, vector<1x1x8xf32>
    %617 = vector.shape_cast %616 : vector<1x1x8xf32> to vector<1x8xf32>
    %618 = vector.broadcast %617 : vector<1x8xf32> to vector<16x8xf32>
    %619 = arith.addf %615, %618 : vector<16x8xf32>
    %c6_379 = arith.constant 6 : index
    %c0_380 = arith.constant 0 : index
    %c0_381 = arith.constant 0 : index
    %620 = vector.load %arg10[%c6_379, %c0_380, %c0_381] : memref<8x32x8xf32, #tpu.memory_space<vmem>>, vector<1x32x8xf32>
    %621 = vector.shape_cast %620 : vector<1x32x8xf32> to vector<32x8xf32>
    %cst_382 = arith.constant dense<0.000000e+00> : vector<16x8xf32>
    %622 = tpu.matmul %485, %621, %cst_382 {dimension_numbers = #tpu.dot_dimension_numbers<[1], [0], [0], [1], [0, 0, 1, 1], [], []>} : vector<16x32xf32>, vector<32x8xf32>, vector<16x8xf32> -> vector<16x8xf32>
    %c6_383 = arith.constant 6 : index
    %c0_384 = arith.constant 0 : index
    %c0_385 = arith.constant 0 : index
    %623 = vector.load %arg11[%c6_383, %c0_384, %c0_385] : memref<8x1x8xf32, #tpu.memory_space<vmem>>, vector<1x1x8xf32>
    %624 = vector.shape_cast %623 : vector<1x1x8xf32> to vector<1x8xf32>
    %625 = vector.broadcast %624 : vector<1x8xf32> to vector<16x8xf32>
    %626 = arith.addf %622, %625 : vector<16x8xf32>
    %627 = vector.extract_strided_slice %612 {offsets = [0, 0], sizes = [8, 8], strides = [1, 1]} : vector<16x8xf32> to vector<8x8xf32>
    %628 = vector.extract_strided_slice %619 {offsets = [0, 0], sizes = [8, 8], strides = [1, 1]} : vector<16x8xf32> to vector<8x8xf32>
    %cst_386 = arith.constant dense<0.000000e+00> : vector<8x8xf32>
    %629 = tpu.matmul %627, %628, %cst_386 {dimension_numbers = #tpu.dot_dimension_numbers<[1], [1], [0], [0], [0, 0, 1, 0], [], []>} : vector<8x8xf32>, vector<8x8xf32>, vector<8x8xf32> -> vector<8x8xf32>
    %cst_387 = arith.constant dense<0xFF800000> : vector<8xf32>
    %630 = vector.multi_reduction <maximumf>, %629, %cst_387 [1] : vector<8x8xf32> to vector<8xf32>
    %631 = vector.shape_cast %630 : vector<8xf32> to vector<8x1xf32>
    %632 = vector.broadcast %631 : vector<8x1xf32> to vector<8x8xf32>
    %633 = arith.subf %629, %632 : vector<8x8xf32>
    %634 = math.exp %633 : vector<8x8xf32>
    %cst_388 = arith.constant dense<0.000000e+00> : vector<8xf32>
    %635 = vector.multi_reduction <add>, %634, %cst_388 [1] : vector<8x8xf32> to vector<8xf32>
    %636 = vector.shape_cast %635 : vector<8xf32> to vector<8x1xf32>
    %637 = tpu.reciprocal %636 {approx = true} : vector<8x1xf32> -> vector<8x1xf32>
    %638 = vector.broadcast %637 : vector<8x1xf32> to vector<8x8xf32>
    %639 = arith.mulf %634, %638 : vector<8x8xf32>
    %640 = vector.extract_strided_slice %626 {offsets = [0, 0], sizes = [8, 8], strides = [1, 1]} : vector<16x8xf32> to vector<8x8xf32>
    %cst_389 = arith.constant dense<0.000000e+00> : vector<8x8xf32>
    %641 = tpu.matmul %639, %640, %cst_389 {dimension_numbers = #tpu.dot_dimension_numbers<[1], [0], [0], [1], [0, 0, 1, 1], [], []>} : vector<8x8xf32>, vector<8x8xf32>, vector<8x8xf32> -> vector<8x8xf32>
    %c6_390 = arith.constant 6 : index
    %c0_391 = arith.constant 0 : index
    %c0_392 = arith.constant 0 : index
    %642 = vector.load %arg12[%c6_390, %c0_391, %c0_392] : memref<8x8x32xf32, #tpu.memory_space<vmem>>, vector<1x8x32xf32>
    %643 = vector.shape_cast %642 : vector<1x8x32xf32> to vector<8x32xf32>
    %cst_393 = arith.constant dense<0.000000e+00> : vector<8x32xf32>
    %644 = tpu.matmul %641, %643, %cst_393 {dimension_numbers = #tpu.dot_dimension_numbers<[1], [0], [0], [1], [0, 0, 1, 1], [], []>} : vector<8x8xf32>, vector<8x32xf32>, vector<8x32xf32> -> vector<8x32xf32>
    %645 = arith.addf %586, %644 : vector<8x32xf32>
    %646 = vector.extract_strided_slice %612 {offsets = [8, 0], sizes = [8, 8], strides = [1, 1]} : vector<16x8xf32> to vector<8x8xf32>
    %647 = vector.extract_strided_slice %619 {offsets = [8, 0], sizes = [8, 8], strides = [1, 1]} : vector<16x8xf32> to vector<8x8xf32>
    %cst_394 = arith.constant dense<0.000000e+00> : vector<8x8xf32>
    %648 = tpu.matmul %646, %647, %cst_394 {dimension_numbers = #tpu.dot_dimension_numbers<[1], [1], [0], [0], [0, 0, 1, 0], [], []>} : vector<8x8xf32>, vector<8x8xf32>, vector<8x8xf32> -> vector<8x8xf32>
    %cst_395 = arith.constant dense<0xFF800000> : vector<8xf32>
    %649 = vector.multi_reduction <maximumf>, %648, %cst_395 [1] : vector<8x8xf32> to vector<8xf32>
    %650 = vector.shape_cast %649 : vector<8xf32> to vector<8x1xf32>
    %651 = vector.broadcast %650 : vector<8x1xf32> to vector<8x8xf32>
    %652 = arith.subf %648, %651 : vector<8x8xf32>
    %653 = math.exp %652 : vector<8x8xf32>
    %cst_396 = arith.constant dense<0.000000e+00> : vector<8xf32>
    %654 = vector.multi_reduction <add>, %653, %cst_396 [1] : vector<8x8xf32> to vector<8xf32>
    %655 = vector.shape_cast %654 : vector<8xf32> to vector<8x1xf32>
    %656 = tpu.reciprocal %655 {approx = true} : vector<8x1xf32> -> vector<8x1xf32>
    %657 = vector.broadcast %656 : vector<8x1xf32> to vector<8x8xf32>
    %658 = arith.mulf %653, %657 : vector<8x8xf32>
    %659 = vector.extract_strided_slice %626 {offsets = [8, 0], sizes = [8, 8], strides = [1, 1]} : vector<16x8xf32> to vector<8x8xf32>
    %cst_397 = arith.constant dense<0.000000e+00> : vector<8x8xf32>
    %660 = tpu.matmul %658, %659, %cst_397 {dimension_numbers = #tpu.dot_dimension_numbers<[1], [0], [0], [1], [0, 0, 1, 1], [], []>} : vector<8x8xf32>, vector<8x8xf32>, vector<8x8xf32> -> vector<8x8xf32>
    %c6_398 = arith.constant 6 : index
    %c0_399 = arith.constant 0 : index
    %c0_400 = arith.constant 0 : index
    %661 = vector.load %arg12[%c6_398, %c0_399, %c0_400] : memref<8x8x32xf32, #tpu.memory_space<vmem>>, vector<1x8x32xf32>
    %662 = vector.shape_cast %661 : vector<1x8x32xf32> to vector<8x32xf32>
    %cst_401 = arith.constant dense<0.000000e+00> : vector<8x32xf32>
    %663 = tpu.matmul %660, %662, %cst_401 {dimension_numbers = #tpu.dot_dimension_numbers<[1], [0], [0], [1], [0, 0, 1, 1], [], []>} : vector<8x8xf32>, vector<8x32xf32>, vector<8x32xf32> -> vector<8x32xf32>
    %664 = arith.addf %605, %663 : vector<8x32xf32>
    %c7_402 = arith.constant 7 : index
    %c0_403 = arith.constant 0 : index
    %c0_404 = arith.constant 0 : index
    %665 = vector.load %arg6[%c7_402, %c0_403, %c0_404] : memref<8x32x8xf32, #tpu.memory_space<vmem>>, vector<1x32x8xf32>
    %666 = vector.shape_cast %665 : vector<1x32x8xf32> to vector<32x8xf32>
    %cst_405 = arith.constant dense<0.000000e+00> : vector<16x8xf32>
    %667 = tpu.matmul %485, %666, %cst_405 {dimension_numbers = #tpu.dot_dimension_numbers<[1], [0], [0], [1], [0, 0, 1, 1], [], []>} : vector<16x32xf32>, vector<32x8xf32>, vector<16x8xf32> -> vector<16x8xf32>
    %c7_406 = arith.constant 7 : index
    %c0_407 = arith.constant 0 : index
    %c0_408 = arith.constant 0 : index
    %668 = vector.load %arg7[%c7_406, %c0_407, %c0_408] : memref<8x1x8xf32, #tpu.memory_space<vmem>>, vector<1x1x8xf32>
    %669 = vector.shape_cast %668 : vector<1x1x8xf32> to vector<1x8xf32>
    %670 = vector.broadcast %669 : vector<1x8xf32> to vector<16x8xf32>
    %671 = arith.addf %667, %670 : vector<16x8xf32>
    %c7_409 = arith.constant 7 : index
    %c0_410 = arith.constant 0 : index
    %c0_411 = arith.constant 0 : index
    %672 = vector.load %arg8[%c7_409, %c0_410, %c0_411] : memref<8x32x8xf32, #tpu.memory_space<vmem>>, vector<1x32x8xf32>
    %673 = vector.shape_cast %672 : vector<1x32x8xf32> to vector<32x8xf32>
    %cst_412 = arith.constant dense<0.000000e+00> : vector<16x8xf32>
    %674 = tpu.matmul %485, %673, %cst_412 {dimension_numbers = #tpu.dot_dimension_numbers<[1], [0], [0], [1], [0, 0, 1, 1], [], []>} : vector<16x32xf32>, vector<32x8xf32>, vector<16x8xf32> -> vector<16x8xf32>
    %c7_413 = arith.constant 7 : index
    %c0_414 = arith.constant 0 : index
    %c0_415 = arith.constant 0 : index
    %675 = vector.load %arg9[%c7_413, %c0_414, %c0_415] : memref<8x1x8xf32, #tpu.memory_space<vmem>>, vector<1x1x8xf32>
    %676 = vector.shape_cast %675 : vector<1x1x8xf32> to vector<1x8xf32>
    %677 = vector.broadcast %676 : vector<1x8xf32> to vector<16x8xf32>
    %678 = arith.addf %674, %677 : vector<16x8xf32>
    %c7_416 = arith.constant 7 : index
    %c0_417 = arith.constant 0 : index
    %c0_418 = arith.constant 0 : index
    %679 = vector.load %arg10[%c7_416, %c0_417, %c0_418] : memref<8x32x8xf32, #tpu.memory_space<vmem>>, vector<1x32x8xf32>
    %680 = vector.shape_cast %679 : vector<1x32x8xf32> to vector<32x8xf32>
    %cst_419 = arith.constant dense<0.000000e+00> : vector<16x8xf32>
    %681 = tpu.matmul %485, %680, %cst_419 {dimension_numbers = #tpu.dot_dimension_numbers<[1], [0], [0], [1], [0, 0, 1, 1], [], []>} : vector<16x32xf32>, vector<32x8xf32>, vector<16x8xf32> -> vector<16x8xf32>
    %c7_420 = arith.constant 7 : index
    %c0_421 = arith.constant 0 : index
    %c0_422 = arith.constant 0 : index
    %682 = vector.load %arg11[%c7_420, %c0_421, %c0_422] : memref<8x1x8xf32, #tpu.memory_space<vmem>>, vector<1x1x8xf32>
    %683 = vector.shape_cast %682 : vector<1x1x8xf32> to vector<1x8xf32>
    %684 = vector.broadcast %683 : vector<1x8xf32> to vector<16x8xf32>
    %685 = arith.addf %681, %684 : vector<16x8xf32>
    %686 = vector.extract_strided_slice %671 {offsets = [0, 0], sizes = [8, 8], strides = [1, 1]} : vector<16x8xf32> to vector<8x8xf32>
    %687 = vector.extract_strided_slice %678 {offsets = [0, 0], sizes = [8, 8], strides = [1, 1]} : vector<16x8xf32> to vector<8x8xf32>
    %cst_423 = arith.constant dense<0.000000e+00> : vector<8x8xf32>
    %688 = tpu.matmul %686, %687, %cst_423 {dimension_numbers = #tpu.dot_dimension_numbers<[1], [1], [0], [0], [0, 0, 1, 0], [], []>} : vector<8x8xf32>, vector<8x8xf32>, vector<8x8xf32> -> vector<8x8xf32>
    %cst_424 = arith.constant dense<0xFF800000> : vector<8xf32>
    %689 = vector.multi_reduction <maximumf>, %688, %cst_424 [1] : vector<8x8xf32> to vector<8xf32>
    %690 = vector.shape_cast %689 : vector<8xf32> to vector<8x1xf32>
    %691 = vector.broadcast %690 : vector<8x1xf32> to vector<8x8xf32>
    %692 = arith.subf %688, %691 : vector<8x8xf32>
    %693 = math.exp %692 : vector<8x8xf32>
    %cst_425 = arith.constant dense<0.000000e+00> : vector<8xf32>
    %694 = vector.multi_reduction <add>, %693, %cst_425 [1] : vector<8x8xf32> to vector<8xf32>
    %695 = vector.shape_cast %694 : vector<8xf32> to vector<8x1xf32>
    %696 = tpu.reciprocal %695 {approx = true} : vector<8x1xf32> -> vector<8x1xf32>
    %697 = vector.broadcast %696 : vector<8x1xf32> to vector<8x8xf32>
    %698 = arith.mulf %693, %697 : vector<8x8xf32>
    %699 = vector.extract_strided_slice %685 {offsets = [0, 0], sizes = [8, 8], strides = [1, 1]} : vector<16x8xf32> to vector<8x8xf32>
    %cst_426 = arith.constant dense<0.000000e+00> : vector<8x8xf32>
    %700 = tpu.matmul %698, %699, %cst_426 {dimension_numbers = #tpu.dot_dimension_numbers<[1], [0], [0], [1], [0, 0, 1, 1], [], []>} : vector<8x8xf32>, vector<8x8xf32>, vector<8x8xf32> -> vector<8x8xf32>
    %c7_427 = arith.constant 7 : index
    %c0_428 = arith.constant 0 : index
    %c0_429 = arith.constant 0 : index
    %701 = vector.load %arg12[%c7_427, %c0_428, %c0_429] : memref<8x8x32xf32, #tpu.memory_space<vmem>>, vector<1x8x32xf32>
    %702 = vector.shape_cast %701 : vector<1x8x32xf32> to vector<8x32xf32>
    %cst_430 = arith.constant dense<0.000000e+00> : vector<8x32xf32>
    %703 = tpu.matmul %700, %702, %cst_430 {dimension_numbers = #tpu.dot_dimension_numbers<[1], [0], [0], [1], [0, 0, 1, 1], [], []>} : vector<8x8xf32>, vector<8x32xf32>, vector<8x32xf32> -> vector<8x32xf32>
    %704 = arith.addf %645, %703 : vector<8x32xf32>
    %705 = vector.extract_strided_slice %671 {offsets = [8, 0], sizes = [8, 8], strides = [1, 1]} : vector<16x8xf32> to vector<8x8xf32>
    %706 = vector.extract_strided_slice %678 {offsets = [8, 0], sizes = [8, 8], strides = [1, 1]} : vector<16x8xf32> to vector<8x8xf32>
    %cst_431 = arith.constant dense<0.000000e+00> : vector<8x8xf32>
    %707 = tpu.matmul %705, %706, %cst_431 {dimension_numbers = #tpu.dot_dimension_numbers<[1], [1], [0], [0], [0, 0, 1, 0], [], []>} : vector<8x8xf32>, vector<8x8xf32>, vector<8x8xf32> -> vector<8x8xf32>
    %cst_432 = arith.constant dense<0xFF800000> : vector<8xf32>
    %708 = vector.multi_reduction <maximumf>, %707, %cst_432 [1] : vector<8x8xf32> to vector<8xf32>
    %709 = vector.shape_cast %708 : vector<8xf32> to vector<8x1xf32>
    %710 = vector.broadcast %709 : vector<8x1xf32> to vector<8x8xf32>
    %711 = arith.subf %707, %710 : vector<8x8xf32>
    %712 = math.exp %711 : vector<8x8xf32>
    %cst_433 = arith.constant dense<0.000000e+00> : vector<8xf32>
    %713 = vector.multi_reduction <add>, %712, %cst_433 [1] : vector<8x8xf32> to vector<8xf32>
    %714 = vector.shape_cast %713 : vector<8xf32> to vector<8x1xf32>
    %715 = tpu.reciprocal %714 {approx = true} : vector<8x1xf32> -> vector<8x1xf32>
    %716 = vector.broadcast %715 : vector<8x1xf32> to vector<8x8xf32>
    %717 = arith.mulf %712, %716 : vector<8x8xf32>
    %718 = vector.extract_strided_slice %685 {offsets = [8, 0], sizes = [8, 8], strides = [1, 1]} : vector<16x8xf32> to vector<8x8xf32>
    %cst_434 = arith.constant dense<0.000000e+00> : vector<8x8xf32>
    %719 = tpu.matmul %717, %718, %cst_434 {dimension_numbers = #tpu.dot_dimension_numbers<[1], [0], [0], [1], [0, 0, 1, 1], [], []>} : vector<8x8xf32>, vector<8x8xf32>, vector<8x8xf32> -> vector<8x8xf32>
    %c7_435 = arith.constant 7 : index
    %c0_436 = arith.constant 0 : index
    %c0_437 = arith.constant 0 : index
    %720 = vector.load %arg12[%c7_435, %c0_436, %c0_437] : memref<8x8x32xf32, #tpu.memory_space<vmem>>, vector<1x8x32xf32>
    %721 = vector.shape_cast %720 : vector<1x8x32xf32> to vector<8x32xf32>
    %cst_438 = arith.constant dense<0.000000e+00> : vector<8x32xf32>
    %722 = tpu.matmul %719, %721, %cst_438 {dimension_numbers = #tpu.dot_dimension_numbers<[1], [0], [0], [1], [0, 0, 1, 1], [], []>} : vector<8x8xf32>, vector<8x32xf32>, vector<8x32xf32> -> vector<8x32xf32>
    %723 = arith.addf %664, %722 : vector<8x32xf32>
    %724 = tpu.concatenate %704, %723 in 0 : vector<8x32xf32>, vector<8x32xf32> -> vector<16x32xf32>
    %725 = arith.addf %461, %724 : vector<16x32xf32>
    %c1_439 = arith.constant 1 : index
    %c0_440 = arith.constant 0 : index
    %726 = vector.load %arg13[%c1_439, %c0_440] : memref<2x32xf32, #tpu.memory_space<vmem>>, vector<1x32xf32>
    %727 = vector.broadcast %726 : vector<1x32xf32> to vector<16x32xf32>
    %728 = arith.addf %725, %727 : vector<16x32xf32>
    %c1_441 = arith.constant 1 : index
    %c0_442 = arith.constant 0 : index
    %729 = vector.load %arg14[%c1_441, %c0_442] : memref<2x32xf32, #tpu.memory_space<vmem>>, vector<1x32xf32>
    %c1_443 = arith.constant 1 : index
    %c0_444 = arith.constant 0 : index
    %730 = vector.load %arg15[%c1_443, %c0_444] : memref<2x32xf32, #tpu.memory_space<vmem>>, vector<1x32xf32>
    %cst_445 = arith.constant dense<0.000000e+00> : vector<16xf32>
    %731 = vector.multi_reduction <add>, %728, %cst_445 [1] : vector<16x32xf32> to vector<16xf32>
    %732 = vector.shape_cast %731 : vector<16xf32> to vector<16x1xf32>
    %cst_446 = arith.constant 3.200000e+01 : f32
    %733 = vector.broadcast %cst_446 : f32 to vector<16x1xf32>
    %734 = arith.divf %732, %733 : vector<16x1xf32>
    %735 = vector.broadcast %734 : vector<16x1xf32> to vector<16x32xf32>
    %736 = arith.subf %728, %735 : vector<16x32xf32>
    %737 = arith.mulf %736, %736 : vector<16x32xf32>
    %cst_447 = arith.constant dense<0.000000e+00> : vector<16xf32>
    %738 = vector.multi_reduction <add>, %737, %cst_447 [1] : vector<16x32xf32> to vector<16xf32>
    %739 = vector.shape_cast %738 : vector<16xf32> to vector<16x1xf32>
    %cst_448 = arith.constant 3.200000e+01 : f32
    %740 = vector.broadcast %cst_448 : f32 to vector<16x1xf32>
    %741 = arith.divf %739, %740 : vector<16x1xf32>
    %742 = vector.broadcast %734 : vector<16x1xf32> to vector<16x32xf32>
    %743 = arith.subf %728, %742 : vector<16x32xf32>
    %cst_449 = arith.constant 9.99999974E-6 : f32
    %744 = vector.broadcast %cst_449 : f32 to vector<16x1xf32>
    %745 = arith.addf %741, %744 : vector<16x1xf32>
    %746 = math.rsqrt %745 : vector<16x1xf32>
    %747 = vector.broadcast %746 : vector<16x1xf32> to vector<16x32xf32>
    %748 = arith.mulf %743, %747 : vector<16x32xf32>
    %749 = vector.broadcast %729 : vector<1x32xf32> to vector<16x32xf32>
    %750 = arith.mulf %748, %749 : vector<16x32xf32>
    %751 = vector.broadcast %730 : vector<1x32xf32> to vector<16x32xf32>
    %752 = arith.addf %750, %751 : vector<16x32xf32>
    %c1_450 = arith.constant 1 : index
    %c0_451 = arith.constant 0 : index
    %c0_452 = arith.constant 0 : index
    %753 = vector.load %arg16[%c1_450, %c0_451, %c0_452] : memref<2x32x128xf32, #tpu.memory_space<vmem>>, vector<1x32x128xf32>
    %754 = vector.shape_cast %753 : vector<1x32x128xf32> to vector<32x128xf32>
    %cst_453 = arith.constant dense<0.000000e+00> : vector<16x128xf32>
    %755 = tpu.matmul %752, %754, %cst_453 {dimension_numbers = #tpu.dot_dimension_numbers<[1], [0], [0], [1], [0, 0, 1, 1], [], []>} : vector<16x32xf32>, vector<32x128xf32>, vector<16x128xf32> -> vector<16x128xf32>
    %c1_454 = arith.constant 1 : index
    %c0_455 = arith.constant 0 : index
    %756 = vector.load %arg17[%c1_454, %c0_455] : memref<2x128xf32, #tpu.memory_space<vmem>>, vector<1x128xf32>
    %757 = vector.broadcast %756 : vector<1x128xf32> to vector<16x128xf32>
    %758 = arith.addf %755, %757 : vector<16x128xf32>
    %cst_456 = arith.constant 5.000000e-01 : f32
    %759 = vector.broadcast %cst_456 : f32 to vector<16x128xf32>
    %760 = arith.mulf %759, %758 : vector<16x128xf32>
    %cst_457 = arith.constant 0.707106769 : f32
    %761 = vector.broadcast %cst_457 : f32 to vector<16x128xf32>
    %762 = arith.mulf %758, %761 : vector<16x128xf32>
    %cst_458 = arith.constant 0.000000e+00 : f32
    %763 = vector.broadcast %cst_458 : f32 to vector<16x128xf32>
    %764 = arith.cmpf oge, %762, %763 : vector<16x128xf32>
    %cst_459 = arith.constant 1.000000e+00 : f32
    %cst_460 = arith.constant -1.000000e+00 : f32
    %765 = vector.broadcast %cst_459 : f32 to vector<16x128xf32>
    %766 = vector.broadcast %cst_460 : f32 to vector<16x128xf32>
    %767 = arith.select %764, %765, %766 : vector<16x128xi1>, vector<16x128xf32>
    %768 = math.absf %762 : vector<16x128xf32>
    %cst_461 = arith.constant 0.327591091 : f32
    %769 = vector.broadcast %cst_461 : f32 to vector<16x128xf32>
    %770 = arith.mulf %769, %768 : vector<16x128xf32>
    %cst_462 = arith.constant 1.000000e+00 : f32
    %771 = vector.broadcast %cst_462 : f32 to vector<16x128xf32>
    %772 = arith.addf %771, %770 : vector<16x128xf32>
    %cst_463 = arith.constant 1.000000e+00 : f32
    %773 = vector.broadcast %cst_463 : f32 to vector<16x128xf32>
    %774 = arith.divf %773, %772 : vector<16x128xf32>
    %cst_464 = arith.constant 1.06140542 : f32
    %775 = vector.broadcast %cst_464 : f32 to vector<16x128xf32>
    %776 = arith.mulf %775, %774 : vector<16x128xf32>
    %cst_465 = arith.constant -1.45315206 : f32
    %777 = vector.broadcast %cst_465 : f32 to vector<16x128xf32>
    %778 = arith.addf %776, %777 : vector<16x128xf32>
    %779 = arith.mulf %778, %774 : vector<16x128xf32>
    %cst_466 = arith.constant 1.42141378 : f32
    %780 = vector.broadcast %cst_466 : f32 to vector<16x128xf32>
    %781 = arith.addf %779, %780 : vector<16x128xf32>
    %782 = arith.mulf %781, %774 : vector<16x128xf32>
    %cst_467 = arith.constant -0.284496725 : f32
    %783 = vector.broadcast %cst_467 : f32 to vector<16x128xf32>
    %784 = arith.addf %782, %783 : vector<16x128xf32>
    %785 = arith.mulf %784, %774 : vector<16x128xf32>
    %cst_468 = arith.constant 0.254829586 : f32
    %786 = vector.broadcast %cst_468 : f32 to vector<16x128xf32>
    %787 = arith.addf %785, %786 : vector<16x128xf32>
    %788 = arith.mulf %787, %774 : vector<16x128xf32>
    %cst_469 = arith.constant 0.000000e+00 : f32
    %789 = vector.broadcast %cst_469 : f32 to vector<16x128xf32>
    %790 = arith.subf %789, %768 : vector<16x128xf32>
    %791 = arith.mulf %790, %768 : vector<16x128xf32>
    %792 = math.exp %791 : vector<16x128xf32>
    %793 = arith.mulf %788, %792 : vector<16x128xf32>
    %cst_470 = arith.constant 1.000000e+00 : f32
    %794 = vector.broadcast %cst_470 : f32 to vector<16x128xf32>
    %795 = arith.subf %794, %793 : vector<16x128xf32>
    %796 = arith.mulf %767, %795 : vector<16x128xf32>
    %cst_471 = arith.constant 1.000000e+00 : f32
    %797 = vector.broadcast %cst_471 : f32 to vector<16x128xf32>
    %798 = arith.addf %797, %796 : vector<16x128xf32>
    %799 = arith.mulf %760, %798 : vector<16x128xf32>
    %c1_472 = arith.constant 1 : index
    %c0_473 = arith.constant 0 : index
    %c0_474 = arith.constant 0 : index
    %800 = vector.load %arg18[%c1_472, %c0_473, %c0_474] : memref<2x128x32xf32, #tpu.memory_space<vmem>>, vector<1x128x32xf32>
    %801 = vector.shape_cast %800 : vector<1x128x32xf32> to vector<128x32xf32>
    %cst_475 = arith.constant dense<0.000000e+00> : vector<16x32xf32>
    %802 = tpu.matmul %799, %801, %cst_475 {dimension_numbers = #tpu.dot_dimension_numbers<[1], [0], [0], [1], [0, 0, 1, 1], [], []>} : vector<16x128xf32>, vector<128x32xf32>, vector<16x32xf32> -> vector<16x32xf32>
    %803 = arith.addf %728, %802 : vector<16x32xf32>
    %c1_476 = arith.constant 1 : index
    %c0_477 = arith.constant 0 : index
    %804 = vector.load %arg19[%c1_476, %c0_477] : memref<2x32xf32, #tpu.memory_space<vmem>>, vector<1x32xf32>
    %805 = vector.broadcast %804 : vector<1x32xf32> to vector<16x32xf32>
    %806 = arith.addf %803, %805 : vector<16x32xf32>
    %c0_478 = arith.constant 0 : index
    %c0_479 = arith.constant 0 : index
    %807 = vector.load %arg20[%c0_478, %c0_479] : memref<1x32xf32, #tpu.memory_space<vmem>>, vector<1x32xf32>
    %c0_480 = arith.constant 0 : index
    %c0_481 = arith.constant 0 : index
    %808 = vector.load %arg21[%c0_480, %c0_481] : memref<1x32xf32, #tpu.memory_space<vmem>>, vector<1x32xf32>
    %cst_482 = arith.constant dense<0.000000e+00> : vector<16xf32>
    %809 = vector.multi_reduction <add>, %806, %cst_482 [1] : vector<16x32xf32> to vector<16xf32>
    %810 = vector.shape_cast %809 : vector<16xf32> to vector<16x1xf32>
    %cst_483 = arith.constant 3.200000e+01 : f32
    %811 = vector.broadcast %cst_483 : f32 to vector<16x1xf32>
    %812 = arith.divf %810, %811 : vector<16x1xf32>
    %813 = vector.broadcast %812 : vector<16x1xf32> to vector<16x32xf32>
    %814 = arith.subf %806, %813 : vector<16x32xf32>
    %815 = arith.mulf %814, %814 : vector<16x32xf32>
    %cst_484 = arith.constant dense<0.000000e+00> : vector<16xf32>
    %816 = vector.multi_reduction <add>, %815, %cst_484 [1] : vector<16x32xf32> to vector<16xf32>
    %817 = vector.shape_cast %816 : vector<16xf32> to vector<16x1xf32>
    %cst_485 = arith.constant 3.200000e+01 : f32
    %818 = vector.broadcast %cst_485 : f32 to vector<16x1xf32>
    %819 = arith.divf %817, %818 : vector<16x1xf32>
    %820 = vector.broadcast %812 : vector<16x1xf32> to vector<16x32xf32>
    %821 = arith.subf %806, %820 : vector<16x32xf32>
    %cst_486 = arith.constant 9.99999974E-6 : f32
    %822 = vector.broadcast %cst_486 : f32 to vector<16x1xf32>
    %823 = arith.addf %819, %822 : vector<16x1xf32>
    %824 = math.rsqrt %823 : vector<16x1xf32>
    %825 = vector.broadcast %824 : vector<16x1xf32> to vector<16x32xf32>
    %826 = arith.mulf %821, %825 : vector<16x32xf32>
    %827 = vector.broadcast %807 : vector<1x32xf32> to vector<16x32xf32>
    %828 = arith.mulf %826, %827 : vector<16x32xf32>
    %829 = vector.broadcast %808 : vector<1x32xf32> to vector<16x32xf32>
    %830 = arith.addf %828, %829 : vector<16x32xf32>
    %c0_487 = arith.constant 0 : index
    %c0_488 = arith.constant 0 : index
    %831 = vector.load %arg22[%c0_487, %c0_488] : memref<32x128xf32, #tpu.memory_space<vmem>>, vector<32x128xf32>
    %cst_489 = arith.constant dense<0.000000e+00> : vector<16x128xf32>
    %832 = tpu.matmul %830, %831, %cst_489 {dimension_numbers = #tpu.dot_dimension_numbers<[1], [0], [0], [1], [0, 0, 1, 1], [], []>} : vector<16x32xf32>, vector<32x128xf32>, vector<16x128xf32> -> vector<16x128xf32>
    %833 = vector.extract_strided_slice %832 {offsets = [0, 0], sizes = [8, 128], strides = [1, 1]} : vector<16x128xf32> to vector<8x128xf32>
    %c0_490 = arith.constant 0 : index
    %c0_491 = arith.constant 0 : index
    %c0_492 = arith.constant 0 : index
    %834 = vector.load %arg23[%c0_490, %c0_491, %c0_492] : memref<2x8x128xf32, #tpu.memory_space<vmem>>, vector<1x8x128xf32>
    %835 = vector.shape_cast %834 : vector<1x8x128xf32> to vector<8x128xf32>
    %836 = vector.shape_cast %833 : vector<8x128xf32> to vector<1x8x128xf32>
    tpu.vector_store %arg23[%c0_490, %c0_491, %c0_492], %836 {strides = array<i32>} : memref<2x8x128xf32, #tpu.memory_space<vmem>>, vector<1x8x128xf32>,
    %837 = vector.extract_strided_slice %832 {offsets = [8, 0], sizes = [8, 128], strides = [1, 1]} : vector<16x128xf32> to vector<8x128xf32>
    %c1_493 = arith.constant 1 : index
    %c0_494 = arith.constant 0 : index
    %c0_495 = arith.constant 0 : index
    %838 = vector.load %arg23[%c1_493, %c0_494, %c0_495] : memref<2x8x128xf32, #tpu.memory_space<vmem>>, vector<1x8x128xf32>
    %839 = vector.shape_cast %838 : vector<1x8x128xf32> to vector<8x128xf32>
    %840 = vector.shape_cast %837 : vector<8x128xf32> to vector<1x8x128xf32>
    tpu.vector_store %arg23[%c1_493, %c0_494, %c0_495], %840 {strides = array<i32>} : memref<2x8x128xf32, #tpu.memory_space<vmem>>, vector<1x8x128xf32>,
    return
  }
  func.func @transform_0(%arg0: i32, %arg1: memref<2x8xi32, #tpu.memory_space<smem>>) -> (i32, i32) {
    %c0_i32 = arith.constant 0 : i32
    %c0_i32_0 = arith.constant 0 : i32
    %c0_i32_1 = arith.constant 0 : i32
    return %c0_i32, %c0_i32_0 : i32, i32
  }
  func.func @transform_1(%arg0: i32, %arg1: memref<2x8xi32, #tpu.memory_space<smem>>) -> (i32, i32) {
    %c0_i32 = arith.constant 0 : i32
    %c0_i32_0 = arith.constant 0 : i32
    %c0_i32_1 = arith.constant 0 : i32
    return %c0_i32, %c0_i32_0 : i32, i32
  }
  func.func @transform_2(%arg0: i32, %arg1: memref<2x8xi32, #tpu.memory_space<smem>>) -> (i32, i32) {
    %c0_i32 = arith.constant 0 : i32
    %c0_i32_0 = arith.constant 0 : i32
    %c0_i32_1 = arith.constant 0 : i32
    return %c0_i32, %c0_i32_0 : i32, i32
  }
  func.func @transform_3(%arg0: i32, %arg1: memref<2x8xi32, #tpu.memory_space<smem>>) -> (i32, i32) {
    %c0_i32 = arith.constant 0 : i32
    %c0_i32_0 = arith.constant 0 : i32
    %c0_i32_1 = arith.constant 0 : i32
    return %c0_i32, %c0_i32_0 : i32, i32
  }
  func.func @transform_4(%arg0: i32, %arg1: memref<2x8xi32, #tpu.memory_space<smem>>) -> (i32, i32, i32) {
    %c0_i32 = arith.constant 0 : i32
    %c0_i32_0 = arith.constant 0 : i32
    %c0_i32_1 = arith.constant 0 : i32
    %c0_i32_2 = arith.constant 0 : i32
    return %c0_i32, %c0_i32_0, %c0_i32_1 : i32, i32, i32
  }
  func.func @transform_5(%arg0: i32, %arg1: memref<2x8xi32, #tpu.memory_space<smem>>) -> (i32, i32, i32) {
    %c0_i32 = arith.constant 0 : i32
    %c0_i32_0 = arith.constant 0 : i32
    %c0_i32_1 = arith.constant 0 : i32
    %c0_i32_2 = arith.constant 0 : i32
    return %c0_i32, %c0_i32_0, %c0_i32_1 : i32, i32, i32
  }
  func.func @transform_6(%arg0: i32, %arg1: memref<2x8xi32, #tpu.memory_space<smem>>) -> (i32, i32, i32) {
    %c0_i32 = arith.constant 0 : i32
    %c0_i32_0 = arith.constant 0 : i32
    %c0_i32_1 = arith.constant 0 : i32
    %c0_i32_2 = arith.constant 0 : i32
    return %c0_i32, %c0_i32_0, %c0_i32_1 : i32, i32, i32
  }
  func.func @transform_7(%arg0: i32, %arg1: memref<2x8xi32, #tpu.memory_space<smem>>) -> (i32, i32, i32) {
    %c0_i32 = arith.constant 0 : i32
    %c0_i32_0 = arith.constant 0 : i32
    %c0_i32_1 = arith.constant 0 : i32
    %c0_i32_2 = arith.constant 0 : i32
    return %c0_i32, %c0_i32_0, %c0_i32_1 : i32, i32, i32
  }
  func.func @transform_8(%arg0: i32, %arg1: memref<2x8xi32, #tpu.memory_space<smem>>) -> (i32, i32, i32) {
    %c0_i32 = arith.constant 0 : i32
    %c0_i32_0 = arith.constant 0 : i32
    %c0_i32_1 = arith.constant 0 : i32
    %c0_i32_2 = arith.constant 0 : i32
    return %c0_i32, %c0_i32_0, %c0_i32_1 : i32, i32, i32
  }
  func.func @transform_9(%arg0: i32, %arg1: memref<2x8xi32, #tpu.memory_space<smem>>) -> (i32, i32, i32) {
    %c0_i32 = arith.constant 0 : i32
    %c0_i32_0 = arith.constant 0 : i32
    %c0_i32_1 = arith.constant 0 : i32
    %c0_i32_2 = arith.constant 0 : i32
    return %c0_i32, %c0_i32_0, %c0_i32_1 : i32, i32, i32
  }
  func.func @transform_10(%arg0: i32, %arg1: memref<2x8xi32, #tpu.memory_space<smem>>) -> (i32, i32, i32) {
    %c0_i32 = arith.constant 0 : i32
    %c0_i32_0 = arith.constant 0 : i32
    %c0_i32_1 = arith.constant 0 : i32
    %c0_i32_2 = arith.constant 0 : i32
    return %c0_i32, %c0_i32_0, %c0_i32_1 : i32, i32, i32
  }
  func.func @transform_11(%arg0: i32, %arg1: memref<2x8xi32, #tpu.memory_space<smem>>) -> (i32, i32) {
    %c0_i32 = arith.constant 0 : i32
    %c0_i32_0 = arith.constant 0 : i32
    %c0_i32_1 = arith.constant 0 : i32
    return %c0_i32, %c0_i32_0 : i32, i32
  }
  func.func @transform_12(%arg0: i32, %arg1: memref<2x8xi32, #tpu.memory_space<smem>>) -> (i32, i32) {
    %c0_i32 = arith.constant 0 : i32
    %c0_i32_0 = arith.constant 0 : i32
    %c0_i32_1 = arith.constant 0 : i32
    return %c0_i32, %c0_i32_0 : i32, i32
  }
  func.func @transform_13(%arg0: i32, %arg1: memref<2x8xi32, #tpu.memory_space<smem>>) -> (i32, i32) {
    %c0_i32 = arith.constant 0 : i32
    %c0_i32_0 = arith.constant 0 : i32
    %c0_i32_1 = arith.constant 0 : i32
    return %c0_i32, %c0_i32_0 : i32, i32
  }
  func.func @transform_14(%arg0: i32, %arg1: memref<2x8xi32, #tpu.memory_space<smem>>) -> (i32, i32, i32) {
    %c0_i32 = arith.constant 0 : i32
    %c0_i32_0 = arith.constant 0 : i32
    %c0_i32_1 = arith.constant 0 : i32
    %c0_i32_2 = arith.constant 0 : i32
    return %c0_i32, %c0_i32_0, %c0_i32_1 : i32, i32, i32
  }
  func.func @transform_15(%arg0: i32, %arg1: memref<2x8xi32, #tpu.memory_space<smem>>) -> (i32, i32) {
    %c0_i32 = arith.constant 0 : i32
    %c0_i32_0 = arith.constant 0 : i32
    %c0_i32_1 = arith.constant 0 : i32
    return %c0_i32, %c0_i32_0 : i32, i32
  }
  func.func @transform_16(%arg0: i32, %arg1: memref<2x8xi32, #tpu.memory_space<smem>>) -> (i32, i32, i32) {
    %c0_i32 = arith.constant 0 : i32
    %c0_i32_0 = arith.constant 0 : i32
    %c0_i32_1 = arith.constant 0 : i32
    %c0_i32_2 = arith.constant 0 : i32
    return %c0_i32, %c0_i32_0, %c0_i32_1 : i32, i32, i32
  }
  func.func @transform_17(%arg0: i32, %arg1: memref<2x8xi32, #tpu.memory_space<smem>>) -> (i32, i32) {
    %c0_i32 = arith.constant 0 : i32
    %c0_i32_0 = arith.constant 0 : i32
    %c0_i32_1 = arith.constant 0 : i32
    return %c0_i32, %c0_i32_0 : i32, i32
  }
  func.func @transform_18(%arg0: i32, %arg1: memref<2x8xi32, #tpu.memory_space<smem>>) -> (i32, i32) {
    %c0_i32 = arith.constant 0 : i32
    %c0_i32_0 = arith.constant 0 : i32
    %c0_i32_1 = arith.constant 0 : i32
    return %c0_i32, %c0_i32_0 : i32, i32
  }
  func.func @transform_19(%arg0: i32, %arg1: memref<2x8xi32, #tpu.memory_space<smem>>) -> (i32, i32) {
    %c0_i32 = arith.constant 0 : i32
    %c0_i32_0 = arith.constant 0 : i32
    %c0_i32_1 = arith.constant 0 : i32
    return %c0_i32, %c0_i32_0 : i32, i32
  }
  func.func @transform_20(%arg0: i32, %arg1: memref<2x8xi32, #tpu.memory_space<smem>>) -> (i32, i32) {
    %c0_i32 = arith.constant 0 : i32
    %c0_i32_0 = arith.constant 0 : i32
    %c0_i32_1 = arith.constant 0 : i32
    return %c0_i32, %c0_i32_0 : i32, i32
  }
  func.func @transform_21(%arg0: i32, %arg1: memref<2x8xi32, #tpu.memory_space<smem>>) -> (i32, i32, i32) {
    %c0_i32 = arith.constant 0 : i32
    %c0_i32_0 = arith.constant 0 : i32
    %c0_i32_1 = arith.constant 0 : i32
    return %arg0, %c0_i32, %c0_i32_0 : i32, i32, i32
  }
}

</mosaic_0001>

<bundles_post_ra>
// kernel: _lambda_.1
= control target key start
LH: loop header
LB: loop body
LE: loop exit
PB: predicated region body
PF: predicated region fallthrough
CT: control target
= control target key end

     0   :  { %s9820_s0 = inlined_call_operand.vmem [shape: s32[2,8], index: 0, kind: input, shape index: {}]   ;;  %s9821_s1 = inlined_call_operand.vmem [shape: f32[64,32], index: 1, kind: input, shape index: {}]   ;;  %s9822_s2 = inlined_call_operand.vmem [shape: f32[16,32], index: 2, kind: input, shape index: {}]   ;;  %s9823_s3 = inlined_call_operand.vmem [shape: f32[2,32], index: 3, kind: input, shape index: {}]   ;;  %s9824_s4 = inlined_call_operand.vmem [shape: f32[2,32], index: 4, kind: input, shape index: {}]   ;;  %s9825_s5 = inlined_call_operand.vmem [shape: f32[8,32,8], index: 5, kind: input, shape index: {}]   ;;  %s9826_s6 = inlined_call_operand.vmem [shape: f32[8,1,8], index: 6, kind: input, shape index: {}]   ;;  %s9827_s7 = inlined_call_operand.vmem [shape: f32[8,32,8], index: 7, kind: input, shape index: {}]   ;;  %s9828_s8 = inlined_call_operand.vmem [shape: f32[8,1,8], index: 8, kind: input, shape index: {}]   ;;  %s9829_s9 = inlined_call_operand.vmem [shape: f32[8,32,8], index: 9, kind: input, shape index: {}]   ;;  %s9830_s10 = inlined_call_operand.vmem [shape: f32[8,1,8], index: 10, kind: input, shape index: {}]   ;;  %s9831_s11 = inlined_call_operand.vmem [shape: f32[8,8,32], index: 11, kind: input, shape index: {}]   ;;  %s9832_s12 = inlined_call_operand.vmem [shape: f32[2,32], index: 12, kind: input, shape index: {}]   ;;  %s9833_s13 = inlined_call_operand.vmem [shape: f32[2,32], index: 13, kind: input, shape index: {}]   ;;  %s9834_s14 = inlined_call_operand.vmem [shape: f32[2,32], index: 14, kind: input, shape index: {}]   ;;  %s9835_s15 = inlined_call_operand.vmem [shape: f32[2,32,128], index: 15, kind: input, shape index: {}]   ;;  %s9836_s16 = inlined_call_operand.vmem [shape: f32[2,128], index: 16, kind: input, shape index: {}]   ;;  %s9837_s17 = inlined_call_operand.vmem [shape: f32[2,128,32], index: 17, kind: input, shape index: {}]   ;;  %s9838_s18 = inlined_call_operand.vmem [shape: f32[2,32], index: 18, kind: input, shape index: {}]   ;;  %s9839_s19 = inlined_call_operand.vmem [shape: f32[1,32], index: 19, kind: input, shape index: {}]   ;;  %s9840_s20 = inlined_call_operand.vmem [shape: f32[1,32], index: 20, kind: input, shape index: {}]   ;;  %s9841_s21 = inlined_call_operand.vmem [shape: f32[32,128], index: 21, kind: input, shape index: {}]   ;;  %s9842_s22 = inlined_call_operand.hbm [shape: f32[2,8,128], index: 22, kind: output, shape index: {}]  }
   0x1   :  { %9855 = sst [smem:[#allocation9_spill]] %s9820_s0 }
   0x2   :  { %9856 = sst [smem:[#allocation10_spill]] %s9821_s1  ;;  %s9870_s29 = sld [smem:[#allocation9_spill]] }
   0x3   :  { %9857 = sst [smem:[#allocation11_spill]] %s9822_s2 }
   0x4   :  { %9858 = sst [smem:[#allocation12_spill]] %s9823_s3 }
   0x5   :  { %9859 = sst [smem:[#allocation13_spill]] %s9824_s4 }
   0x6   :  { %9860 = sst [smem:[#allocation14_spill]] %s9825_s5 }
   0x7   :  { %9861 = sst [smem:[#allocation15_spill]] %s9826_s6 }
   0x8   :  { %9862 = sst [smem:[#allocation16_spill]] %s9835_s15 }
   0x9   :  { %9863 = sst [smem:[#allocation17_spill]] %s9836_s16  ;;  %s27_s16 = sshll.u32 %s9870_s29, 4  ;;  %s28_s16 = int_to_ptr.vmem [resolvable:$true] %s27_s16 }
   0xa   :  { %9864 = sst [smem:[#allocation18_spill]] %s9837_s17  ;;  %s8491_s30 = scalar_lea.vmem %s28_s16, 32 }
   0xb   :  { %9865 = sst [smem:[#allocation19_spill]] %s9838_s18  ;;  %p8492_p0 = scmp.ne.s32.totalorder %s28_s16, %s8491_s30 }
   0xc   :  { %9866 = sst [smem:[#allocation20_spill]] %s9839_s19  ;;  %p8496_p1 = scmp.lt.s32.totalorder %s28_s16, %s28_s16 }
   0xd   :  { %9867 = sst [smem:[#allocation21_spill]] %s9840_s20  ;;  %p8497_p2 = scmp.lt.s32.totalorder %s8491_s30, %s8491_s30 }
   0xe   :  { %9868 = sst [smem:[#allocation22_spill]] %s9841_s21 }
   0xf   :  { %9869 = sst [smem:[#allocation23_spill]] %s9842_s22  ;;  %p8498_p3 = por %p8497_p2, %p8496_p1 }
  0x11   :  { %p8499_p4 = pnand %p8498_p3, %p8492_p0 }
  0x13   :  { %8502 = shalt.err (!%p8499_p4)  }
  0x14   :  { %s8529_s4 = smov [#allocation4]  }
  0x15   :  { %30 = dma.vmem_to_smem %s28_s16, 32, %s8529_s4, [#allocation3] }
  0x16   :  { %8525 = dma.done.wait [#allocation3], 32 }
  0x17   :  { %8526 = vsyncadd [#allocation3], 4294967264 }
  0x18   :  { %32 = sfence }
  0x19   :  { %s78_s0 = sld [smem:[#allocation4]]  ;;  %s6897_s23 = sld [smem:[#allocation4 + $0x1]]  ;;  %vm83_vm0 = vcmask 253952  }
  0x1a   :  { %s6898_s1 = sld [smem:[#allocation4 + $0x2]]  ;;  %s6899_s5 = sld [smem:[#allocation4 + $0x3]] }
  0x1b   :  { %s9871_s25 = sld [smem:[#allocation11_spill]]  ;;  %s8657_s26 = sld [smem:[#allocation4 + $0x4]] }
  0x1c   :  { %s8659_s2 = sld [smem:[#allocation4 + $0x5]]  ;;  %s8664_s16 = sld [smem:[#allocation4 + $0x6]] }
  0x1d   :  { %s8669_s30 = sld [smem:[#allocation4 + $0x7]]  ;;  %s8671_s4 = sld [smem:[#allocation4 + $0x80]] }
  0x1e   :  { %s9872_s22 = sld [smem:[#allocation10_spill]]  ;;  %s8720_s3 = sld [smem:[#allocation4 + $0x83]] }
  0x1f   :  { %s8682_s28 = sld [smem:[#allocation4 + $0x81]]  ;;  %s6908_s21 = sld [smem:[#allocation4 + $0x84]] }
  0x20   :  { %s6910_s27 = sld [smem:[#allocation4 + $0x86]] }
  0x21   :  { %v81_v0 = vld [vmem:[%s9871_s25] sm:$0x1]  ;;  %v89_v1 = vld [vmem:[%s9871_s25 + $0x1] sm:$0x1]  ;;  %v96_v2 = vld [vmem:[%s9871_s25 + $0x2] sm:$0x1] }
  0x22   :  { %v103_v3 = vld [vmem:[%s9871_s25 + $0x3] sm:$0x1]  ;;  %v110_v4 = vld [vmem:[%s9871_s25 + $0x4] sm:$0x1]  ;;  %v117_v6 = vld [vmem:[%s9871_s25 + $0x5] sm:$0x1] }
  0x23   :  { %v124_v7 = vld [vmem:[%s9871_s25 + $0x6] sm:$0x1]  ;;  %v131_v14 = vld [vmem:[%s9871_s25 + $0x7] sm:$0x1]  ;;  %v139_v15 = vld [vmem:[%s9871_s25] sm:$0x1] }
  0x24   :  { %s79_s20 = scalar_lea.vmem %s9872_s22, %s78_s0  ;;  %s87_s17 = scalar_lea.vmem %s9872_s22, %s6897_s23  ;;  %v146_v22 = vld [vmem:[%s9871_s25 + $0x1] sm:$0x1]  ;;  %v153_v23 = vld [vmem:[%s9871_s25 + $0x2] sm:$0x1] }
  0x25   :  { %v80_v5 = vld [vmem:[%s79_s20] sm:$0x1]  ;;  %s94_s0 = scalar_lea.vmem %s9872_s22, %s6898_s1  ;;  %s101_s18 = scalar_lea.vmem %s9872_s22, %s6899_s5 }
  0x26   :  { %v82_v8 = vadd.f32 %v81_v0, %v80_v5  ;;  %v88_v9 = vld [vmem:[%s87_s17] sm:$0x1]  ;;  %s8699_s23 = sld [smem:[#allocation4 + $0x82]]  ;;  %s108_s29 = scalar_lea.vmem %s9872_s22, %s8657_s26 }
  0x27   :  { %v95_v10 = vld [vmem:[%s94_s0] sm:$0x1]  ;;  %v90_v11 = vadd.f32 %v89_v1, %v88_v9  ;;  %s115_s17 = scalar_lea.vmem %s9872_s22, %s8659_s2  ;;  %s122_s20 = scalar_lea.vmem %s9872_s22, %s8664_s16 }
  0x28   :  { %v97_v12 = vadd.f32 %v96_v2, %v95_v10  ;;  %v102_v13 = vld [vmem:[%s101_s18] sm:$0x1]  ;;  %84 = vst.msk [vmem:[#allocation2] sm:$0x1] %vm83_vm0, %v82_v8  ;;  %s129_s15 = scalar_lea.vmem %s9872_s22, %s8669_s30  ;;  %s137_s24 = scalar_lea.vmem %s9872_s22, %s8671_s4 }
  0x29   :  { %v104_v16 = vadd.f32 %v103_v3, %v102_v13  ;;  %v109_v17 = vld [vmem:[%s108_s29] sm:$0x1]  ;;  %91 = vst.msk [vmem:[#allocation2 + $0x1] sm:$0x1] %vm83_vm0, %v90_v11  ;;  %s144_s5 = scalar_lea.vmem %s9872_s22, %s8682_s28  ;;  %s6909_s4 = sld [smem:[#allocation4 + $0x85]] }
  0x2a   :  { %v116_v18 = vld [vmem:[%s115_s17] sm:$0x1]  ;;  %98 = vst.msk [vmem:[#allocation2 + $0x2] sm:$0x1] %vm83_vm0, %v97_v12  ;;  %v111_v19 = vadd.f32 %v110_v4, %v109_v17  ;;  %s6911_s18 = sld [smem:[#allocation4 + $0x87]] }
  0x2b   :  { %v118_v20 = vadd.f32 %v117_v6, %v116_v18  ;;  %v123_v21 = vld [vmem:[%s122_s20] sm:$0x1]  ;;  %105 = vst.msk [vmem:[#allocation2 + $0x3] sm:$0x1] %vm83_vm0, %v104_v16 }
  0x2c   :  { %v125_v24 = vadd.f32 %v124_v7, %v123_v21  ;;  %v130_v25 = vld [vmem:[%s129_s15] sm:$0x1]  ;;  %112 = vst.msk [vmem:[#allocation2 + $0x4] sm:$0x1] %vm83_vm0, %v111_v19  ;;  %s151_s2 = scalar_lea.vmem %s9872_s22, %s8699_s23 }
  0x2d   :  { %v138_v26 = vld [vmem:[%s137_s24] sm:$0x1]  ;;  %119 = vst.msk [vmem:[#allocation2 + $0x5] sm:$0x1] %vm83_vm0, %v118_v20  ;;  %v132_v27 = vadd.f32 %v131_v14, %v130_v25 }
  0x2e   :  { %v140_v28 = vadd.f32 %v139_v15, %v138_v26  ;;  %v145_v29 = vld [vmem:[%s144_s5] sm:$0x1]  ;;  %126 = vst.msk [vmem:[#allocation2 + $0x6] sm:$0x1] %vm83_vm0, %v125_v24 }
  0x2f   :  { %v147_v30 = vadd.f32 %v146_v22, %v145_v29 }
  0x30   :  { %33 = vsyncpa [#allocation6], 0  ;;  %133 = vst.msk [vmem:[#allocation2 + $0x7] sm:$0x1] %vm83_vm0, %v132_v27  ;;  %v152_v31 = vld [vmem:[%s151_s2] sm:$0x1]  ;;  %s158_s24 = scalar_lea.vmem %s9872_s22, %s8720_s3  ;;  %s165_s0 = scalar_lea.vmem %s9872_s22, %s6908_s21 }
  0x31   :  { %141 = vst.msk [vmem:[#allocation2 + $0x8] sm:$0x1] %vm83_vm0, %v140_v28  ;;  %v160_v32 = vld [vmem:[%s9871_s25 + $0x3] sm:$0x1]  ;;  %148 = vst.msk [vmem:[#allocation2 + $0x9] sm:$0x1] %vm83_vm0, %v147_v30  ;;  %v154_v33 = vadd.f32 %v153_v23, %v152_v31  ;;  %s172_s2 = scalar_lea.vmem %s9872_s22, %s6909_s4  ;;  %s179_s1 = scalar_lea.vmem %s9872_s22, %s6910_s27 }
  0x32   :  { %v159_v34 = vld [vmem:[%s158_s24] sm:$0x1]  ;;  %v167_v35 = vld [vmem:[%s9871_s25 + $0x4] sm:$0x1]  ;;  %v174_v37 = vld [vmem:[%s9871_s25 + $0x5] sm:$0x1]  ;;  %s186_s6 = scalar_lea.vmem %s9872_s22, %s6911_s18 }
  0x33   :  { %155 = vst.msk [vmem:[#allocation2 + $0xa] sm:$0x1] %vm83_vm0, %v154_v33  ;;  %v161_v36 = vadd.f32 %v160_v32, %v159_v34  ;;  %v181_v38 = vld [vmem:[%s9871_s25 + $0x6] sm:$0x1]  ;;  %v166_v39 = vld [vmem:[%s165_s0] sm:$0x1] }
  0x34   :  { %v188_v40 = vld [vmem:[%s9871_s25 + $0x7] sm:$0x1]  ;;  %vm195_vm1 = vcmask 261120   ;;  %v168_v41 = vadd.f32 %v167_v35, %v166_v39  ;;  %v173_v42 = vld [vmem:[%s172_s2] sm:$0x1]  ;;  %s9873_s4 = sld [smem:[#allocation14_spill]] }
  0x35   :  { %162 = vst.msk [vmem:[#allocation2 + $0xb] sm:$0x1] %vm83_vm0, %v161_v36  ;;  %v180_v43 = vld [vmem:[%s179_s1] sm:$0x1]  ;;  %v175_v44 = vadd.f32 %v174_v37, %v173_v42  ;;  %v328_v5 = vld [vmem:[%s9827_s7 + $0x8] sm:$0xff]  ;;  %s9874_s28 = sld [smem:[#allocation12_spill]] }
  0x36   :  { %v182_v45 = vadd.f32 %v181_v38, %v180_v43  ;;  %v187_v46 = vld [vmem:[%s186_s6] sm:$0x1]  ;;  %169 = vst.msk [vmem:[#allocation2 + $0xc] sm:$0x1] %vm83_vm0, %v168_v41  ;;  %s9875_s29 = sld [smem:[#allocation13_spill]]  ;;  %v329_v21 = vld [vmem:[%s9827_s7 + $0x10] sm:$0xff] }
  0x37   :  { %v8786_v47 = vld [vmem:[#allocation2] sm:$0xff]  ;;  %v189_v48 = vadd.f32 %v188_v40, %v187_v46  ;;  %176 = vst.msk [vmem:[#allocation2 + $0xd] sm:$0x1] %vm83_vm0, %v175_v44  ;;  %v330_v22 = vld [vmem:[%s9827_s7 + $0x18] sm:$0xff]  ;;  %v414_v27 = vld [vmem:[%s9829_s9 + $0x8] sm:$0xff]  ;;  %v8530_v32 = vmov 0.0  }
  0x38   :  { %v196_v49 = vsel %vm195_vm1, %v8786_v47, 0.0  ;;  %183 = vst.msk [vmem:[#allocation2 + $0xe] sm:$0x1] %vm83_vm0, %v182_v45  ;;  %v327_v4 = vld [vmem:[%s9827_s7] sm:$0xff]  ;;  %v8115_v25 = vpack.c.bf16 %v330_v22, %v329_v21  ;;  %v415_v29 = vld [vmem:[%s9829_s9 + $0x10] sm:$0xff]  ;;  %v416_v30 = vld [vmem:[%s9829_s9 + $0x18] sm:$0xff]  ;;  %7529 = vmatprep.subr.mxu1 %v8530_v32 }
  0x39   :  { %197 = vadd.xlane.f32.xlu0 %v196_v49  ;;  %190 = vst.msk [vmem:[#allocation2 + $0xf] sm:$0x1] %vm83_vm0, %v189_v48  ;;  %v8111_v6 = vpack.c.bf16 %v328_v5, %v327_v4  ;;  %v413_v26 = vld [vmem:[%s9829_s9] sm:$0xff]  ;;  %v8123_v31 = vpack.c.bf16 %v416_v30, %v415_v29  ;;  %vm8531_vm2 = vmmov 0   ;;  %vm499_vm3 = vcmask 64512   ;;  %s9876_s24 = sld [smem:[#allocation15_spill]] }
  0x3a   :  { %v235_v62 = vld [vmem:[%s9873_s4] sm:$0xff]  ;;  %v236_v63 = vld [vmem:[%s9873_s4 + $0x8] sm:$0xff]  ;;  %v237_v1 = vld [vmem:[%s9873_s4 + $0x10] sm:$0xff]  ;;  %v8119_v28 = vpack.c.bf16 %v414_v27, %v413_v26  ;;  %7531 = vmatprep.mubr.msk.f32.mxu1 %vm8531_vm2, %v8530_v32  ;;  %s9877_s0 = sld [smem:[#allocation16_spill]]  ;;  %s9878_s1 = sld [smem:[#allocation18_spill]] }
  0x3b   :  { %v8103_v0 = vpack.c.bf16 %v236_v63, %v235_v62  ;;  %v238_v2 = vld [vmem:[%s9873_s4 + $0x18] sm:$0xff]  ;;  %v6912_v14 = vld [vmem:[%s9874_s28] ss:$0 sm:$0xff]  ;;  %v6930_v36 = vld [vmem:[%s9873_s4 + $0x28] sm:$0xff]  ;;  %s9879_s2 = sld [smem:[#allocation17_spill]]  ;;  %s9880_s23 = sld [smem:[#allocation19_spill]] }
  0x3c   :  { %v8107_v3 = vpack.c.bf16 %v238_v2, %v237_v1  ;;  %v6913_v16 = vld [vmem:[%s9875_s29] ss:$0 sm:$0xff]  ;;  %v6931_v43 = vld [vmem:[%s9873_s4 + $0x30] sm:$0xff]  ;;  %v6932_v44 = vld [vmem:[%s9873_s4 + $0x38] sm:$0xff] }
  0x3d   :  { %8104 = vmatprep.subr.bf16.mxu0 %v8103_v0  ;;  %v6929_v35 = vld [vmem:[%s9873_s4 + $0x20] sm:$0xff]  ;;  %v8131_v48 = vpack.c.bf16 %v6932_v44, %v6931_v43  ;;  %v6938_v26 = vld [vmem:[%s9827_s7 + $0x28] sm:$0xff] }
  0x3e   :  { %8106 = vmatpush3.bf16.msra.mxu0 %v8103_v0  ;;  %v6917_v37 = vld [vmem:[%s9828_s8] ss:$0 sm:$0xff]  ;;  %v8127_v39 = vpack.c.bf16 %v6930_v36, %v6929_v35 }
  0x3f   :  { %8108 = vmatprep.subr.bf16.mxu0 %v8107_v3  ;;  %v6914_v40 = vld [vmem:[%s9876_s24] ss:$0 sm:$0xff] }
  0x40   :  { %v192_v50 = vld [vmem:[#allocation2 + $0x8] sm:$0xff] }
  0x41   :  { %v199_v51 = vsel %vm195_vm1, %v192_v50, 0.0 }
  0x42   :  { %200 = vadd.xlane.f32.xlu0 %v199_v51  ;;  %8110 = vmatpush3.bf16.msra.mxu0 %v8107_v3  ;;  %v6946_v51 = vld [vmem:[%s9829_s9 + $0x28] sm:$0xff]  ;;  %v6934_v3 = vld [vmem:[%s9876_s24 + $0x1] ss:$0 sm:$0xff] }
  0x43   :  { %8112 = vmatprep.subr.bf16.mxu0 %v8111_v6 }
  0xc6   :  { %v198_v52 = vpop.xlane.xlu0 %197 }
  0xc7   :  { %v203_v53 = vmul.f32 0.03125, %v198_v52  ;;  %v6920_v52 = vld [vmem:[%s9830_s10] ss:$0 sm:$0xff] }
  0xc9   :  { %v205_v54 = vsub.f32 %v8786_v47, %v203_v53 }
  0xcb   :  { %v207_v55 = vmul.f32 %v205_v54, %v205_v54 }
  0xcd   :  { %v209_v56 = vsel %vm195_vm1, %v207_v55, 0.0 }
  0xce   :  { %210 = vadd.xlane.f32.xlu1 %v209_v56 }
  0xcf   :  { %v201_v57 = vpop.xlane.xlu0 %200 }
  0xd0   :  { %v204_v58 = vmul.f32 0.03125, %v201_v57  ;;  %v6947_v57 = vld [vmem:[%s9829_s9 + $0x30] sm:$0xff] }
  0xd2   :  { %v206_v59 = vsub.f32 %v192_v50, %v204_v58  ;;  %v6945_v50 = vld [vmem:[%s9829_s9 + $0x20] sm:$0xff]  ;;  %v6948_v58 = vld [vmem:[%s9829_s9 + $0x38] sm:$0xff] }
  0xd4   :  { %v208_v60 = vmul.f32 %v206_v59, %v206_v59 }
  0xd6   :  { %v212_v61 = vsel %vm195_vm1, %v208_v60, 0.0  ;;  %v8147_v60 = vpack.c.bf16 %v6948_v58, %v6947_v57 }
  0xd7   :  { %213 = vadd.xlane.f32.xlu1 %v212_v61 }
 0x15b   :  { %v211_v7 = vpop.xlane.xlu1 %210 }
 0x15c   :  { %v215_v8 = vmul.f32 0.03125, %v211_v7  ;;  %v6950_v7 = vld [vmem:[%s9830_s10 + $0x1] ss:$0 sm:$0xff] }
 0x15e   :  { %v217_v9 = vadd.f32 1e-05, %v215_v8 }
 0x160   :  { %8390 = vrsqrt.f32 %v217_v9 }
 0x164   :  { %v214_v10 = vpop.xlane.xlu1 %213 }
 0x165   :  { %v216_v11 = vmul.f32 0.03125, %v214_v10 }
 0x167   :  { %v218_v12 = vadd.f32 1e-05, %v216_v11 }
 0x169   :  { %8392 = vrsqrt.f32 %v218_v12 }
 0x16a   :  { %v8391_v13 = vpop.eup %8390 }
 0x16b   :  { %v221_v15 = vmul.f32 %v8391_v13, %v205_v54  ;;  %v8143_v54 = vpack.c.bf16 %v6946_v51, %v6945_v50 }
 0x16d   :  { %v227_v17 = vmul.f32 %v6912_v14, %v221_v15 }
 0x16f   :  { %v8822_v18 = vadd.f32 %v6913_v16, %v227_v17 }
 0x171   :  { %7504 = vmatprep.mubr.msk.f32.mxu0 %vm195_vm1, %v8822_v18 }
 0x173   :  { %v8393_v19 = vpop.eup %8392 }
 0x174   :  { %v222_v20 = vmul.f32 %v8393_v19, %v206_v59 }
 0x176   :  { %v228_v23 = vmul.f32 %v6912_v14, %v222_v20 }
 0x178   :  { %v8832_v24 = vadd.f32 %v6913_v16, %v228_v23 }
 0x17a   :  { %7505 = vmatmul.mubr.msk.f32.vlgmr.msra.gmra.mrb[0].mxu0 %vm195_vm1, %v8832_v24 }
 0x17b   :  { %8114 = vmatpush3.bf16.msra.mxu0 %v8111_v6  ;;  %7515 = vmatprep.mubr.msk.f32.mxu0 %vm195_vm1, %v8822_v18 }
 0x17c   :  { %8116 = vmatprep.subr.bf16.mxu0 %v8115_v25 }
 0x17f   :  { %8118 = vmatpush3.bf16.msra.mxu0 %v8115_v25  ;;  %v6937_v25 = vld [vmem:[%s9827_s7 + $0x20] sm:$0xff] }
 0x180   :  { %8120 = vmatprep.subr.bf16.mxu0 %v8119_v28  ;;  %v8135_v29 = vpack.c.bf16 %v6938_v26, %v6937_v25  ;;  %v6966_v26 = vld [vmem:[%s9873_s4 + $0x50] sm:$0xff] }
 0x182   :  { %7516 = vmatmul.mubr.msk.f32.vlgmr.msra.gmra.mrb[2].mxu0 %vm195_vm1, %v8832_v24 }
 0x183   :  { %8122 = vmatpush3.bf16.msra.mxu0 %v8119_v28  ;;  %7526 = vmatprep.mubr.msk.f32.mxu0 %vm195_vm1, %v8822_v18 }
 0x184   :  { %8124 = vmatprep.subr.bf16.mxu0 %v8123_v31 }
 0x187   :  { %8126 = vmatpush3.bf16.msra.mxu0 %v8123_v31  ;;  %v6939_v31 = vld [vmem:[%s9827_s7 + $0x30] sm:$0xff] }
 0x188   :  { %7539 = vmatprep.subr.mxu0 %v8530_v32 }
 0x18a   :  { %7527 = vmatmul.mubr.msk.f32.vlgmr.msra.gmra.mrb[4].mxu0 %vm195_vm1, %v8832_v24 }
 0x18b   :  { %7541 = vmatprep.mubr.msk.f32.mxu0 %vm8531_vm2, %v8530_v32 }
 0x24d   :  { %v7506_v33 = vpop.f32.mrb[0].mxu0 }
 0x24e   :  { %v318_v34 = vpop.f32.mrb[1].mxu0  ;;  %v324_v46 = vadd.f32 %v7506_v33, %v6914_v40  ;;  %v6940_v33 = vld [vmem:[%s9827_s7 + $0x38] sm:$0xff] }
 0x24f   :  { %v319_v49 = vadd.f32 %v6914_v40, %v318_v34  ;;  %v8139_v35 = vpack.c.bf16 %v6940_v33, %v6939_v31  ;;  %v6942_v40 = vld [vmem:[%s9828_s8 + $0x1] ss:$0 sm:$0xff]  ;;  %v6981_v31 = vld [vmem:[%s9829_s9 + $0x48] sm:$0xff] }
 0x255   :  { %v7517_v38 = vpop.f32.mrb[2].mxu0 }
 0x256   :  { %v410_v41 = vadd.f32 %v7517_v38, %v6917_v37  ;;  %v404_v42 = vpop.f32.mrb[3].mxu0 }
 0x257   :  { %v405_v45 = vadd.f32 %v6917_v37, %v404_v42 }
 0x258   :  { %7540 = vmatpush3.xpose.msk.msra.mxu0 %vm499_vm3, %v410_v41 }
 0x259   :  { %7530 = vmatpush3.xpose.msk.msra.mxu1 %vm499_vm3, %v405_v45  ;;  %8128 = vmatprep.subr.bf16.mxu0 %v8127_v39 }
 0x25a   :  { %7534 = vmatprep.subr.mxu1 %v8530_v32 }
 0x25b   :  { %7542 = vmatmul.mubr.msk.f32.vlgmr.msra.gmra.mrb[6].mxu0 %vm499_vm3, %v324_v46 }
 0x25c   :  { %7532 = vmatmul.mubr.msk.f32.vlgmr.msra.gmra.mrb[0].mxu1 %vm499_vm3, %v319_v49  ;;  %8130 = vmatpush3.bf16.msra.mxu0 %v8127_v39 }
 0x25d   :  { %7557 = vmatprep.mubr.msk.f32.mxu0 %vm195_vm1, %v8822_v18  ;;  %v7528_v53 = vpop.f32.mrb[4].mxu0  ;;  %8132 = vmatprep.subr.bf16.mxu0 %v8131_v48 }
 0x25e   :  { %v496_v55 = vadd.f32 %v7528_v53, %v6920_v52  ;;  %v490_v56 = vpop.f32.mrb[5].mxu0  ;;  %7536 = vmatprep.mubr.msk.f32.mxu1 %vm8531_vm2, %v8530_v32 }
 0x25f   :  { %v491_v59 = vadd.f32 %v6920_v52, %v490_v56  ;;  %v6956_v56 = vld [vmem:[%s9831_s11 + $0x8] sm:$0xff] }
 0x260   :  { %8134 = vmatpush3.bf16.msra.mxu0 %v8131_v48 }
 0x261   :  { %7535 = vmatpush3.msra.mxu1 %v491_v59  ;;  %8144 = vmatprep.subr.bf16.mxu0 %v8143_v54 }
 0x262   :  { %7544 = vmatprep.subr.mxu1 %v8530_v32 }
 0x263   :  { %7558 = vmatmul.mubr.msk.f32.vlgmr.msra.gmra.mrb[8].mxu0 %vm195_vm1, %v8832_v24 }
 0x264   :  { %8146 = vmatpush3.bf16.msra.mxu0 %v8143_v54  ;;  %7579 = vmatprep.mubr.msk.f32.mxu0 %vm195_vm1, %v8822_v18 }
 0x265   :  { %8148 = vmatprep.subr.bf16.mxu0 %v8147_v60 }
 0x268   :  { %8150 = vmatpush3.bf16.msra.mxu0 %v8147_v60  ;;  %v660_v60 = vld [vmem:[%s9831_s11] sm:$0xff] }
 0x269   :  { %7592 = vmatprep.subr.mxu0 %v8530_v32 }
 0x26b   :  { %7580 = vmatmul.mubr.msk.f32.vlgmr.msra.gmra.mrb[10].mxu0 %vm195_vm1, %v8832_v24 }
 0x26c   :  { %7594 = vmatprep.mubr.msk.f32.mxu0 %vm8531_vm2, %v8530_v32  ;;  %7593 = vmatpush3.msra.mxu0 %v6956_v56 }
 0x26d   :  { %7602 = vmatprep.subr.mxu0 %v8530_v32 }
 0x32e   :  { %v733_v61 = vpop.f32.mrb[6].mxu0 }
 0x32f   :  { %v572_v62 = vpop.f32.mrb[0].mxu1  ;;  %v7543_v63 = vpop.f32.mrb[7].mxu0  ;;  %v737_v0 = vsel %vm499_vm3, %v733_v61, -inf }
 0x330   :  { %738 = vmax.xlane.f32.xlu1 %v737_v0  ;;  %v7533_v1 = vpop.f32.mrb[1].mxu1  ;;  %v576_v2 = vsel %vm499_vm3, %v572_v62, -inf }
 0x331   :  { %577 = vmax.xlane.f32.xlu0 %v576_v2 }
 0x336   :  { %v7559_v4 = vpop.f32.mrb[8].mxu0 }
 0x337   :  { %v8919_v5 = vadd.f32 %v7559_v4, %v6934_v3  ;;  %v900_v6 = vpop.f32.mrb[9].mxu0 }
 0x338   :  { %v901_v45 = vadd.f32 %v6934_v3, %v900_v6 }
 0x33e   :  { %v7581_v8 = vpop.f32.mrb[10].mxu0 }
 0x33f   :  { %v8924_v9 = vadd.f32 %v7581_v8, %v6950_v7  ;;  %v1076_v10 = vpop.f32.mrb[11].mxu0 }
 0x340   :  { %v1077_v46 = vadd.f32 %v6950_v7, %v1076_v10 }
 0x3bd   :  { %v739_v11 = vpop.xlane.xlu1 %738 }
 0x3be   :  { %v740_v12 = vsub.f32 %v733_v61, %v739_v11  ;;  %v578_v13 = vpop.xlane.xlu0 %577 }
 0x3bf   :  { %v579_v14 = vsub.f32 %v572_v62, %v578_v13  ;;  %v6972_v13 = vld [vmem:[%s9827_s7 + $0x40] sm:$0xff] }
 0x3c0   :  { %v741_v15 = vmul.f32 1.442695, %v740_v12 }
 0x3c1   :  { %v580_v16 = vmul.f32 1.442695, %v579_v14  ;;  %v6973_v14 = vld [vmem:[%s9827_s7 + $0x48] sm:$0xff] }
 0x3c2   :  { %8394 = vpow2.f32 %v741_v15 }
 0x3c3   :  { %8396 = vpow2.f32 %v580_v16 }
 0x3cc   :  { %v8395_v17 = vpop.eup %8394 }
 0x3cd   :  { %v8397_v19 = vpop.eup %8396  ;;  %v743_v20 = vsel %vm499_vm3, %v8395_v17, 0.0 }
 0x3ce   :  { %744 = vadd.xlane.f32.xlu1 %v743_v20  ;;  %v582_v21 = vsel %vm499_vm3, %v8397_v19, 0.0  ;;  %v6975_v20 = vld [vmem:[%s9827_s7 + $0x58] sm:$0xff] }
 0x3cf   :  { %583 = vadd.xlane.f32.xlu0 %v582_v21 }
 0x45b   :  { %v745_v22 = vpop.xlane.xlu1 %744 }
 0x45c   :  { %v584_v23 = vpop.xlane.xlu0 %583 }
 0x45d   :  { %8398 = vrcp.f32 %v584_v23  ;;  %v6965_v23 = vld [vmem:[%s9873_s4 + $0x48] sm:$0xff] }
 0x45e   :  { %8400 = vrcp.f32 %v745_v22  ;;  %v6964_v22 = vld [vmem:[%s9873_s4 + $0x40] sm:$0xff] }
 0x45f   :  { %v8151_v25 = vpack.c.bf16 %v6965_v23, %v6964_v22 }
 0x467   :  { %v8399_v27 = vpop.eup %8398 }
 0x468   :  { %v586_v28 = vmul.f32 %v8399_v27, %v8397_v19  ;;  %v8401_v30 = vpop.eup %8400  ;;  %v6974_v19 = vld [vmem:[%s9827_s7 + $0x50] sm:$0xff]  ;;  %v6967_v27 = vld [vmem:[%s9873_s4 + $0x58] sm:$0xff] }
 0x469   :  { %v747_v34 = vmul.f32 %v8401_v30, %v8395_v17  ;;  %v8159_v17 = vpack.c.bf16 %v6973_v14, %v6972_v13  ;;  %v8163_v21 = vpack.c.bf16 %v6975_v20, %v6974_v19  ;;  %v6980_v30 = vld [vmem:[%s9829_s9 + $0x40] sm:$0xff]  ;;  %v6998_v20 = vld [vmem:[%s9873_s4 + $0x68] sm:$0xff] }
 0x46a   :  { %7537 = vmatmul.mubr.msk.f32.vlgmr.msra.gmra.mrb[2].mxu1 %vm499_vm3, %v586_v28  ;;  %v8155_v28 = vpack.c.bf16 %v6967_v27, %v6966_v26  ;;  %v6997_v19 = vld [vmem:[%s9873_s4 + $0x60] sm:$0xff]  ;;  %v6999_v27 = vld [vmem:[%s9873_s4 + $0x70] sm:$0xff] }
 0x46b   :  { %7545 = vmatpush3.msra.mxu1 %v496_v55  ;;  %7546 = vmatprep.mubr.msk.f32.mxu1 %vm8531_vm2, %v8530_v32 }
 0x46c   :  { %8136 = vmatprep.subr.bf16.mxu1 %v8135_v29 }
 0x46e   :  { %7547 = vmatmul.mubr.msk.f32.vlgmr.msra.gmra.mrb[4].mxu1 %vm499_vm3, %v747_v34  ;;  %v8167_v34 = vpack.c.bf16 %v6981_v31, %v6980_v30 }
 0x46f   :  { %8138 = vmatpush3.bf16.msra.mxu1 %v8135_v29  ;;  %7568 = vmatprep.mubr.msk.f32.mxu1 %vm195_vm1, %v8822_v18 }
 0x470   :  { %8140 = vmatprep.subr.bf16.mxu1 %v8139_v35 }
 0x473   :  { %8142 = vmatpush3.bf16.msra.mxu1 %v8139_v35 }
 0x474   :  { %7582 = vmatprep.subr.mxu1 %v8530_v32 }
 0x476   :  { %7569 = vmatmul.mubr.msk.f32.vlgmr.msra.gmra.mrb[6].mxu1 %vm195_vm1, %v8832_v24 }
 0x477   :  { %7584 = vmatprep.mubr.msk.f32.mxu1 %vm8531_vm2, %v8530_v32 }
 0x53d   :  { %v656_v36 = vpop.f32.mrb[2].mxu1 }
 0x53e   :  { %v7538_v37 = vpop.f32.mrb[3].mxu1 }
 0x53f   :  { %v6983_v37 = vld [vmem:[%s9829_s9 + $0x58] sm:$0xff] }
 0x541   :  { %v8951_v38 = vpop.f32.mrb[4].mxu1 }
 0x542   :  { %v7548_v39 = vpop.f32.mrb[5].mxu1 }
 0x549   :  { %v7570_v41 = vpop.f32.mrb[6].mxu1 }
 0x54a   :  { %v994_v42 = vadd.f32 %v7570_v41, %v6942_v40  ;;  %v988_v43 = vpop.f32.mrb[7].mxu1 }
 0x54b   :  { %v989_v44 = vadd.f32 %v6942_v40, %v988_v43  ;;  %v6977_v40 = vld [vmem:[%s9828_s8 + $0x2] ss:$0 sm:$0xff] }
 0x54d   :  { %7583 = vmatpush3.xpose.msk.msra.mxu1 %vm499_vm3, %v989_v44 }
 0x54e   :  { %7587 = vmatprep.subr.mxu1 %v8530_v32 }
 0x550   :  { %7585 = vmatmul.mubr.msk.f32.vlgmr.msra.gmra.mrb[8].mxu1 %vm499_vm3, %v901_v45 }
 0x551   :  { %7588 = vmatpush3.msra.mxu1 %v1077_v46  ;;  %7589 = vmatprep.mubr.msk.f32.mxu1 %vm8531_vm2, %v8530_v32 }
 0x552   :  { %7597 = vmatprep.subr.mxu1 %v8530_v32 }
 0x623   :  { %v1157_v48 = vpop.f32.mrb[8].mxu1 }
 0x624   :  { %v7586_v49 = vpop.f32.mrb[9].mxu1  ;;  %v1161_v50 = vsel %vm499_vm3, %v1157_v48, -inf }
 0x625   :  { %1162 = vmax.xlane.f32.xlu0 %v1161_v50  ;;  %v6969_v49 = vld [vmem:[%s9876_s24 + $0x2] ss:$0 sm:$0xff] }
 0x6b2   :  { %v1163_v51 = vpop.xlane.xlu0 %1162 }
 0x6b3   :  { %v1164_v52 = vsub.f32 %v1157_v48, %v1163_v51 }
 0x6b5   :  { %v1165_v53 = vmul.f32 1.442695, %v1164_v52 }
 0x6b7   :  { %8402 = vpow2.f32 %v1165_v53 }
 0x6c1   :  { %v8403_v54 = vpop.eup %8402 }
 0x6c2   :  { %v1167_v55 = vsel %vm499_vm3, %v8403_v54, 0.0 }
 0x6c3   :  { %1168 = vadd.xlane.f32.xlu1 %v1167_v55 }
 0x750   :  { %v1169_v57 = vpop.xlane.xlu1 %1168 }
 0x751   :  { %8404 = vrcp.f32 %v1169_v57 }
 0x75b   :  { %v8405_v58 = vpop.eup %8404 }
 0x75c   :  { %v1171_v59 = vmul.f32 %v8405_v58, %v8403_v54  ;;  %v6985_v54 = vld [vmem:[%s9830_s10 + $0x2] ss:$0 sm:$0xff] }
 0x75e   :  { %7590 = vmatmul.mubr.msk.f32.vlgmr.msra.gmra.mrb[10].mxu1 %vm499_vm3, %v1171_v59 }
 0x75f   :  { %7598 = vmatpush3.msra.mxu1 %v660_v60  ;;  %7599 = vmatprep.mubr.msk.f32.mxu1 %vm8531_vm2, %v8530_v32 }
 0x760   :  { %7607 = vmatprep.subr.mxu1 %v8530_v32 }
 0x762   :  { %7600 = vmatmul.mubr.msk.f32.vlgmr.msra.gmra.mrb[12].mxu1 %vm499_vm3, %v656_v36  ;;  %v6982_v36 = vld [vmem:[%s9829_s9 + $0x50] sm:$0xff] }
 0x763   :  { %7608 = vmatpush3.msra.mxu1 %v8924_v9  ;;  %7609 = vmatprep.mubr.msk.f32.mxu1 %vm8531_vm2, %v8530_v32  ;;  %v8171_v39 = vpack.c.bf16 %v6983_v37, %v6982_v36  ;;  %v7016_v36 = vld [vmem:[%s9829_s9 + $0x78] sm:$0xff] }
 0x764   :  { %7617 = vmatprep.subr.mxu1 %v8530_v32 }
 0x831   :  { %v1241_v61 = vpop.f32.mrb[10].mxu1 }
 0x832   :  { %v7591_v62 = vpop.f32.mrb[11].mxu1  ;;  %7595 = vmatmul.mubr.msk.f32.vlgmr.msra.gmra.mrb[12].mxu0 %vm499_vm3, %v1241_v61 }
 0x833   :  { %7603 = vmatpush3.xpose.msk.msra.mxu0 %vm499_vm3, %v994_v42  ;;  %7604 = vmatprep.mubr.msk.f32.mxu0 %vm8531_vm2, %v8530_v32 }
 0x834   :  { %7612 = vmatprep.subr.mxu0 %v8530_v32 }
 0x835   :  { %v1389_v63 = vpop.f32.mrb[12].mxu1 }
 0x836   :  { %v7601_v0 = vpop.f32.mrb[13].mxu1  ;;  %7605 = vmatmul.mubr.msk.f32.vlgmr.msra.gmra.mrb[14].mxu0 %vm499_vm3, %v8919_v5 }
 0x837   :  { %7613 = vmatpush3.msra.mxu0 %v6956_v56  ;;  %7614 = vmatprep.mubr.msk.f32.mxu0 %vm8531_vm2, %v8530_v32 }
 0x838   :  { %8152 = vmatprep.subr.bf16.mxu0 %v8151_v25 }
 0x905   :  { %v1316_v1 = vpop.f32.mrb[12].mxu0 }
 0x906   :  { %v8989_v2 = vadd.f32 %v1389_v63, %v1316_v1  ;;  %v7596_v3 = vpop.f32.mrb[13].mxu0 }
 0x909   :  { %v1465_v4 = vpop.f32.mrb[14].mxu0 }
 0x90a   :  { %v7606_v6 = vpop.f32.mrb[15].mxu0  ;;  %v1469_v7 = vsel %vm499_vm3, %v1465_v4, -inf }
 0x90b   :  { %1470 = vmax.xlane.f32.xlu0 %v1469_v7 }
 0x998   :  { %v1471_v8 = vpop.xlane.xlu0 %1470 }
 0x999   :  { %v1472_v9 = vsub.f32 %v1465_v4, %v1471_v8  ;;  %v6991_v4 = vld [vmem:[%s9831_s11 + $0x10] sm:$0xff] }
 0x99b   :  { %v1473_v10 = vmul.f32 1.442695, %v1472_v9 }
 0x99d   :  { %8406 = vpow2.f32 %v1473_v10 }
 0x9a7   :  { %v8407_v11 = vpop.eup %8406 }
 0x9a8   :  { %v1475_v5 = vsel %vm499_vm3, %v8407_v11, 0.0 }
 0x9a9   :  { %1476 = vadd.xlane.f32.xlu1 %v1475_v5 }
 0xa36   :  { %v1477_v12 = vpop.xlane.xlu1 %1476 }
 0xa37   :  { %8408 = vrcp.f32 %v1477_v12 }
 0xa41   :  { %v8409_v15 = vpop.eup %8408 }
 0xa42   :  { %v1479_v16 = vmul.f32 %v8409_v15, %v8407_v11 }
 0xa44   :  { %7610 = vmatmul.mubr.msk.f32.vlgmr.msra.gmra.mrb[14].mxu1 %vm499_vm3, %v1479_v16 }
 0xa45   :  { %7618 = vmatpush3.msra.mxu1 %v660_v60  ;;  %7619 = vmatprep.mubr.msk.f32.mxu1 %vm8531_vm2, %v8530_v32 }
 0xa46   :  { %8160 = vmatprep.subr.bf16.mxu1 %v8159_v17 }
 0xa48   :  { %7620 = vmatmul.mubr.msk.f32.vlgmr.msra.gmra.mrb[16].mxu1 %vm499_vm3, %v8951_v38 }
 0xa49   :  { %8162 = vmatpush3.bf16.msra.mxu1 %v8159_v17  ;;  %7641 = vmatprep.mubr.msk.f32.mxu1 %vm195_vm1, %v8822_v18 }
 0xa4a   :  { %8164 = vmatprep.subr.bf16.mxu1 %v8163_v21 }
 0xa4d   :  { %8166 = vmatpush3.bf16.msra.mxu1 %v8163_v21  ;;  %v8175_v21 = vpack.c.bf16 %v6998_v20, %v6997_v19 }
 0xa4e   :  { %7655 = vmatprep.subr.mxu1 %v8530_v32 }
 0xa50   :  { %7642 = vmatmul.mubr.msk.f32.vlgmr.msra.gmra.mrb[18].mxu1 %vm195_vm1, %v8832_v24 }
 0xa51   :  { %7657 = vmatprep.mubr.msk.f32.mxu1 %vm8531_vm2, %v8530_v32 }
 0xb17   :  { %v1549_v29 = vpop.f32.mrb[14].mxu1 }
 0xb18   :  { %v7611_v33 = vpop.f32.mrb[15].mxu1  ;;  %7615 = vmatmul.mubr.msk.f32.vlgmr.msra.gmra.mrb[16].mxu0 %vm499_vm3, %v1549_v29 }
 0xb19   :  { %8154 = vmatpush3.bf16.msra.mxu0 %v8151_v25  ;;  %7630 = vmatprep.mubr.msk.f32.mxu0 %vm195_vm1, %v8822_v18  ;;  %v7013_v33 = vld [vmem:[%s9829_s9 + $0x60] sm:$0xff] }
 0xb1a   :  { %8156 = vmatprep.subr.bf16.mxu0 %v8155_v28 }
 0xb1b   :  { %v1695_v35 = vpop.f32.mrb[16].mxu1 }
 0xb1c   :  { %v7621_v38 = vpop.f32.mrb[17].mxu1 }
 0xb1d   :  { %8158 = vmatpush3.bf16.msra.mxu0 %v8155_v28  ;;  %v7000_v28 = vld [vmem:[%s9873_s4 + $0x78] sm:$0xff]  ;;  %v7005_v38 = vld [vmem:[%s9827_s7 + $0x60] sm:$0xff] }
 0xb1e   :  { %8168 = vmatprep.subr.bf16.mxu0 %v8167_v34  ;;  %v8179_v31 = vpack.c.bf16 %v7000_v28, %v6999_v27  ;;  %v7030_v28 = vld [vmem:[%s9832_s12] ss:$0 sm:$0xff] }
 0xb20   :  { %7631 = vmatmul.mubr.msk.f32.vlgmr.msra.gmra.mrb[18].mxu0 %vm195_vm1, %v8832_v24 }
 0xb21   :  { %8170 = vmatpush3.bf16.msra.mxu0 %v8167_v34  ;;  %7652 = vmatprep.mubr.msk.f32.mxu0 %vm195_vm1, %v8822_v18 }
 0xb22   :  { %8172 = vmatprep.subr.bf16.mxu0 %v8171_v39 }
 0xb23   :  { %v7643_v41 = vpop.f32.mrb[18].mxu1 }
 0xb24   :  { %v1872_v42 = vadd.f32 %v7643_v41, %v6977_v40  ;;  %v1866_v43 = vpop.f32.mrb[19].mxu1  ;;  %v7007_v41 = vld [vmem:[%s9827_s7 + $0x70] sm:$0xff] }
 0xb25   :  { %v1867_v44 = vadd.f32 %v6977_v40, %v1866_v43  ;;  %8174 = vmatpush3.bf16.msra.mxu0 %v8171_v39  ;;  %v7006_v39 = vld [vmem:[%s9827_s7 + $0x68] sm:$0xff] }
 0xb26   :  { %7665 = vmatprep.subr.mxu0 %v8530_v32  ;;  %v8183_v40 = vpack.c.bf16 %v7006_v39, %v7005_v38 }
 0xb27   :  { %7656 = vmatpush3.xpose.msk.msra.mxu1 %vm499_vm3, %v1867_v44 }
 0xb28   :  { %7653 = vmatmul.mubr.msk.f32.vlgmr.msra.gmra.mrb[20].mxu0 %vm195_vm1, %v8832_v24  ;;  %7660 = vmatprep.subr.mxu1 %v8530_v32 }
 0xb29   :  { %7667 = vmatprep.mubr.msk.f32.mxu0 %vm8531_vm2, %v8530_v32  ;;  %7666 = vmatpush3.msra.mxu0 %v6991_v4 }
 0xb2a   :  { %7675 = vmatprep.subr.mxu0 %v8530_v32 }
 0xbeb   :  { %v1622_v45 = vpop.f32.mrb[16].mxu0 }
 0xbec   :  { %v9058_v46 = vadd.f32 %v1695_v35, %v1622_v45  ;;  %v7616_v48 = vpop.f32.mrb[17].mxu0  ;;  %v7015_v35 = vld [vmem:[%s9829_s9 + $0x70] sm:$0xff] }
 0xbed   :  { %v8195_v37 = vpack.c.bf16 %v7016_v36, %v7015_v35  ;;  %v7002_v48 = vld [vmem:[%s9876_s24 + $0x3] ss:$0 sm:$0xff] }
 0xbf3   :  { %v7632_v50 = vpop.f32.mrb[18].mxu0 }
 0xbf4   :  { %v1784_v51 = vadd.f32 %v7632_v50, %v6969_v49  ;;  %v1778_v52 = vpop.f32.mrb[19].mxu0 }
 0xbf5   :  { %v1779_v53 = vadd.f32 %v6969_v49, %v1778_v52 }
 0xbf7   :  { %7658 = vmatmul.mubr.msk.f32.vlgmr.msra.gmra.mrb[20].mxu1 %vm499_vm3, %v1779_v53 }
 0xbf8   :  { %7662 = vmatprep.mubr.msk.f32.mxu1 %vm8531_vm2, %v8530_v32 }
 0xbfb   :  { %v7654_v55 = vpop.f32.mrb[20].mxu0 }
 0xbfc   :  { %v1960_v56 = vadd.f32 %v7654_v55, %v6985_v54  ;;  %v1954_v57 = vpop.f32.mrb[21].mxu0 }
 0xbfd   :  { %v1955_v58 = vadd.f32 %v6985_v54, %v1954_v57 }
 0xbff   :  { %7661 = vmatpush3.msra.mxu1 %v1955_v58  ;;  %v7010_v58 = vld [vmem:[%s9828_s8 + $0x3] ss:$0 sm:$0xff] }
 0xc00   :  { %7670 = vmatprep.subr.mxu1 %v8530_v32 }
 0xcca   :  { %v2035_v59 = vpop.f32.mrb[20].mxu1 }
 0xccb   :  { %v7659_v60 = vpop.f32.mrb[21].mxu1  ;;  %v2039_v61 = vsel %vm499_vm3, %v2035_v59, -inf }
 0xccc   :  { %2040 = vmax.xlane.f32.xlu0 %v2039_v61 }
 0xd59   :  { %v2041_v62 = vpop.xlane.xlu0 %2040 }
 0xd5a   :  { %v2042_v63 = vsub.f32 %v2035_v59, %v2041_v62 }
 0xd5c   :  { %v2043_v0 = vmul.f32 1.442695, %v2042_v63 }
 0xd5e   :  { %8410 = vpow2.f32 %v2043_v0 }
 0xd68   :  { %v8411_v1 = vpop.eup %8410 }
 0xd69   :  { %v2045_v3 = vsel %vm499_vm3, %v8411_v1, 0.0 }
 0xd6a   :  { %2046 = vadd.xlane.f32.xlu1 %v2045_v3 }
 0xdf7   :  { %v2047_v6 = vpop.xlane.xlu1 %2046 }
 0xdf8   :  { %8412 = vrcp.f32 %v2047_v6 }
 0xe02   :  { %v8413_v7 = vpop.eup %8412 }
 0xe03   :  { %v2049_v8 = vmul.f32 %v8413_v7, %v8411_v1 }
 0xe05   :  { %7663 = vmatmul.mubr.msk.f32.vlgmr.msra.gmra.mrb[22].mxu1 %vm499_vm3, %v2049_v8 }
 0xe06   :  { %7671 = vmatpush3.xpose.msk.msra.mxu1 %vm499_vm3, %v1872_v42  ;;  %7672 = vmatprep.mubr.msk.f32.mxu1 %vm8531_vm2, %v8530_v32  ;;  %v7008_v42 = vld [vmem:[%s9827_s7 + $0x78] sm:$0xff] }
 0xe07   :  { %7680 = vmatprep.subr.mxu1 %v8530_v32  ;;  %v8187_v43 = vpack.c.bf16 %v7008_v42, %v7007_v41  ;;  %v7031_v42 = vld [vmem:[%s9833_s13] ss:$0 sm:$0xff] }
 0xe09   :  { %7673 = vmatmul.mubr.msk.f32.vlgmr.msra.gmra.mrb[24].mxu1 %vm499_vm3, %v1784_v51 }
 0xe0a   :  { %7681 = vmatpush3.msra.mxu1 %v6991_v4  ;;  %7682 = vmatprep.mubr.msk.f32.mxu1 %vm8531_vm2, %v8530_v32 }
 0xe0b   :  { %8184 = vmatprep.subr.bf16.mxu1 %v8183_v40 }
 0xed8   :  { %v2119_v9 = vpop.f32.mrb[22].mxu1 }
 0xed9   :  { %v7664_v10 = vpop.f32.mrb[23].mxu1  ;;  %7668 = vmatmul.mubr.msk.f32.vlgmr.msra.gmra.mrb[22].mxu0 %vm499_vm3, %v2119_v9  ;;  %v7024_v9 = vld [vmem:[%s9831_s11 + $0x18] sm:$0xff] }
 0xeda   :  { %7676 = vmatpush3.msra.mxu0 %v1960_v56  ;;  %7677 = vmatprep.mubr.msk.f32.mxu0 %vm8531_vm2, %v8530_v32 }
 0xedb   :  { %8176 = vmatprep.subr.bf16.mxu0 %v8175_v21 }
 0xedc   :  { %v2271_v11 = vpop.f32.mrb[24].mxu1 }
 0xedd   :  { %v7674_v5 = vpop.f32.mrb[25].mxu1  ;;  %v2275_v12 = vsel %vm499_vm3, %v2271_v11, -inf }
 0xede   :  { %2276 = vmax.xlane.f32.xlu0 %v2275_v12 }
 0xf6b   :  { %v2277_v13 = vpop.xlane.xlu0 %2276 }
 0xf6c   :  { %v2278_v14 = vsub.f32 %v2271_v11, %v2277_v13 }
 0xf6e   :  { %v2279_v15 = vmul.f32 1.442695, %v2278_v14 }
 0xf70   :  { %8414 = vpow2.f32 %v2279_v15 }
 0xf7a   :  { %v8415_v16 = vpop.eup %8414 }
 0xf7b   :  { %v2281_v17 = vsel %vm499_vm3, %v8415_v16, 0.0 }
 0xf7c   :  { %2282 = vadd.xlane.f32.xlu1 %v2281_v17 }
 0xfac   :  { %v2194_v22 = vpop.f32.mrb[22].mxu0 }
 0xfad   :  { %v9096_v23 = vadd.f32 %v2194_v22, %v8989_v2  ;;  %v7669_v25 = vpop.f32.mrb[23].mxu0  ;;  %v7014_v2 = vld [vmem:[%s9829_s9 + $0x68] sm:$0xff] }
 0xfae   :  { %v8191_v34 = vpack.c.bf16 %v7014_v2, %v7013_v33 }
0x1009   :  { %v2283_v26 = vpop.xlane.xlu1 %2282 }
0x100a   :  { %8416 = vrcp.f32 %v2283_v26 }
0x1014   :  { %v8417_v29 = vpop.eup %8416 }
0x1015   :  { %v2285_v30 = vmul.f32 %v8417_v29, %v8415_v16 }
0x1017   :  { %7678 = vmatmul.mubr.msk.f32.vlgmr.msra.gmra.mrb[24].mxu0 %vm499_vm3, %v2285_v30 }
0x1018   :  { %8178 = vmatpush3.bf16.msra.mxu0 %v8175_v21  ;;  %7693 = vmatprep.mubr.msk.f32.mxu0 %vm195_vm1, %v8822_v18 }
0x1019   :  { %8180 = vmatprep.subr.bf16.mxu0 %v8179_v31 }
0x101c   :  { %8182 = vmatpush3.bf16.msra.mxu0 %v8179_v31 }
0x101d   :  { %8192 = vmatprep.subr.bf16.mxu0 %v8191_v34 }
0x101f   :  { %7694 = vmatmul.mubr.msk.f32.vlgmr.msra.gmra.mrb[26].mxu0 %vm195_vm1, %v8832_v24 }
0x1020   :  { %8194 = vmatpush3.bf16.msra.mxu0 %v8191_v34  ;;  %7715 = vmatprep.mubr.msk.f32.mxu0 %vm195_vm1, %v8822_v18 }
0x1021   :  { %8196 = vmatprep.subr.bf16.mxu0 %v8195_v37 }
0x1024   :  { %8198 = vmatpush3.bf16.msra.mxu0 %v8195_v37 }
0x1025   :  { %7728 = vmatprep.subr.mxu0 %v8530_v32 }
0x1027   :  { %7716 = vmatmul.mubr.msk.f32.vlgmr.msra.gmra.mrb[28].mxu0 %vm195_vm1, %v8832_v24 }
0x1028   :  { %7730 = vmatprep.mubr.msk.f32.mxu0 %vm8531_vm2, %v8530_v32  ;;  %7729 = vmatpush3.msra.mxu0 %v7024_v9 }
0x1029   :  { %7738 = vmatprep.subr.mxu0 %v8530_v32 }
0x10ea   :  { %v2355_v44 = vpop.f32.mrb[24].mxu0 }
0x10eb   :  { %v7679_v45 = vpop.f32.mrb[25].mxu0  ;;  %7683 = vmatmul.mubr.msk.f32.vlgmr.msra.gmra.mrb[26].mxu1 %vm499_vm3, %v2355_v44  ;;  %v7032_v44 = vld [vmem:[%s9834_s14] ss:$0 sm:$0xff] }
0x10ec   :  { %8186 = vmatpush3.bf16.msra.mxu1 %v8183_v40  ;;  %7704 = vmatprep.mubr.msk.f32.mxu1 %vm195_vm1, %v8822_v18  ;;  %v7018_v18 = vld [vmem:[%s9830_s10 + $0x3] ss:$0 sm:$0xff] }
0x10ed   :  { %8188 = vmatprep.subr.bf16.mxu1 %v8187_v43 }
0x10f0   :  { %8190 = vmatpush3.bf16.msra.mxu1 %v8187_v43 }
0x10f1   :  { %7718 = vmatprep.subr.mxu1 %v8530_v32 }
0x10f2   :  { %v7695_v49 = vpop.f32.mrb[26].mxu0 }
0x10f3   :  { %v2518_v50 = vadd.f32 %v7695_v49, %v7002_v48  ;;  %v2512_v51 = vpop.f32.mrb[27].mxu0  ;;  %7705 = vmatmul.mubr.msk.f32.vlgmr.msra.gmra.mrb[28].mxu1 %vm195_vm1, %v8832_v24 }
0x10f4   :  { %7720 = vmatprep.mubr.msk.f32.mxu1 %vm8531_vm2, %v8530_v32  ;;  %v2513_v62 = vadd.f32 %v7002_v48, %v2512_v51 }
0x10fa   :  { %v7717_v52 = vpop.f32.mrb[28].mxu0 }
0x10fb   :  { %v2694_v53 = vadd.f32 %v7717_v52, %v7018_v18  ;;  %v2688_v54 = vpop.f32.mrb[29].mxu0 }
0x10fc   :  { %v2689_v63 = vadd.f32 %v7018_v18, %v2688_v54 }
0x11be   :  { %v2428_v55 = vpop.f32.mrb[26].mxu1 }
0x11bf   :  { %v9155_v56 = vadd.f32 %v2428_v55, %v9058_v46  ;;  %v7684_v57 = vpop.f32.mrb[27].mxu1 }
0x11c6   :  { %v7706_v24 = vpop.f32.mrb[28].mxu1 }
0x11c7   :  { %v2606_v59 = vadd.f32 %v7706_v24, %v7010_v58  ;;  %v2600_v60 = vpop.f32.mrb[29].mxu1 }
0x11c8   :  { %v2601_v61 = vadd.f32 %v7010_v58, %v2600_v60 }
0x11ca   :  { %7719 = vmatpush3.xpose.msk.msra.mxu1 %vm499_vm3, %v2601_v61 }
0x11cb   :  { %7723 = vmatprep.subr.mxu1 %v8530_v32 }
0x11cd   :  { %7721 = vmatmul.mubr.msk.f32.vlgmr.msra.gmra.mrb[30].mxu1 %vm499_vm3, %v2513_v62  ;;  %v3217_v62 = vld [vmem:[%s9877_s0 + $0x8] sm:$0xff] }
0x11ce   :  { %7724 = vmatpush3.msra.mxu1 %v2689_v63  ;;  %7725 = vmatprep.mubr.msk.f32.mxu1 %vm8531_vm2, %v8530_v32 }
0x11cf   :  { %7733 = vmatprep.subr.mxu1 %v8530_v32 }
0x12a0   :  { %v2769_v46 = vpop.f32.mrb[30].mxu1 }
0x12a1   :  { %v7722_v0 = vpop.f32.mrb[31].mxu1  ;;  %v2773_v1 = vsel %vm499_vm3, %v2769_v46, -inf }
0x12a2   :  { %2774 = vmax.xlane.f32.xlu0 %v2773_v1  ;;  %v3219_v0 = vld [vmem:[%s9877_s0 + $0x18] sm:$0xff] }
0x132f   :  { %v2775_v3 = vpop.xlane.xlu0 %2774 }
0x1330   :  { %v2776_v4 = vsub.f32 %v2769_v46, %v2775_v3  ;;  %v3218_v46 = vld [vmem:[%s9877_s0 + $0x10] sm:$0xff] }
0x1331   :  { %v8203_v1 = vpack.c.bf16 %v3219_v0, %v3218_v46 }
0x1332   :  { %v2777_v6 = vmul.f32 1.442695, %v2776_v4 }
0x1334   :  { %8418 = vpow2.f32 %v2777_v6 }
0x133e   :  { %v8419_v7 = vpop.eup %8418 }
0x133f   :  { %v2779_v8 = vsel %vm499_vm3, %v8419_v7, 0.0 }
0x1340   :  { %2780 = vadd.xlane.f32.xlu1 %v2779_v8 }
0x13cd   :  { %v2781_v10 = vpop.xlane.xlu1 %2780 }
0x13ce   :  { %8420 = vrcp.f32 %v2781_v10 }
0x13d8   :  { %v8421_v11 = vpop.eup %8420 }
0x13d9   :  { %v2783_v5 = vmul.f32 %v8421_v11, %v8419_v7  ;;  %v3360_v11 = vld [vmem:[%s9878_s1] sm:$0xff] }
0x13db   :  { %7726 = vmatmul.mubr.msk.f32.vlgmr.msra.gmra.mrb[32].mxu1 %vm499_vm3, %v2783_v5  ;;  %v3361_v5 = vld [vmem:[%s9878_s1 + $0x8] sm:$0xff] }
0x13dc   :  { %7734 = vmatpush3.xpose.msk.msra.mxu1 %vm499_vm3, %v2606_v59  ;;  %7735 = vmatprep.mubr.msk.f32.mxu1 %vm8531_vm2, %v8530_v32 }
0x13dd   :  { %7743 = vmatprep.subr.mxu1 %v8530_v32 }
0x13df   :  { %7736 = vmatmul.mubr.msk.f32.vlgmr.msra.gmra.mrb[34].mxu1 %vm499_vm3, %v2518_v50 }
0x13e0   :  { %7744 = vmatpush3.msra.mxu1 %v7024_v9  ;;  %7745 = vmatprep.mubr.msk.f32.mxu1 %vm8531_vm2, %v8530_v32 }
0x14ae   :  { %v2853_v12 = vpop.f32.mrb[32].mxu1 }
0x14af   :  { %v7727_v13 = vpop.f32.mrb[33].mxu1  ;;  %7731 = vmatmul.mubr.msk.f32.vlgmr.msra.gmra.mrb[30].mxu0 %vm499_vm3, %v2853_v12  ;;  %v8207_v12 = vpack.c.bf16 %v3361_v5, %v3360_v11 }
0x14b0   :  { %7739 = vmatpush3.msra.mxu0 %v2694_v53  ;;  %7740 = vmatprep.mubr.msk.f32.mxu0 %vm8531_vm2, %v8530_v32  ;;  %v8490_v53 = vld [vmem:[#allocation2 + $0x8] sm:$0xff]  ;;  %v3362_v13 = vld [vmem:[%s9878_s1 + $0x10] sm:$0xff] }
0x14b1   :  { %8208 = vmatprep.subr.bf16.mxu1 %v8207_v12 }
0x14b2   :  { %v3005_v14 = vpop.f32.mrb[34].mxu1 }
0x14b3   :  { %v7737_v15 = vpop.f32.mrb[35].mxu1  ;;  %v3009_v16 = vsel %vm499_vm3, %v3005_v14, -inf }
0x14b4   :  { %3010 = vmax.xlane.f32.xlu0 %v3009_v16  ;;  %v3364_v16 = vld [vmem:[%s9878_s1 + $0x20] sm:$0xff] }
0x1541   :  { %v3011_v17 = vpop.xlane.xlu0 %3010 }
0x1542   :  { %v3012_v19 = vsub.f32 %v3005_v14, %v3011_v17  ;;  %v3363_v14 = vld [vmem:[%s9878_s1 + $0x18] sm:$0xff]  ;;  %v3365_v17 = vld [vmem:[%s9878_s1 + $0x28] sm:$0xff] }
0x1543   :  { %v8211_v15 = vpack.c.bf16 %v3363_v14, %v3362_v13 }
0x1544   :  { %v3013_v20 = vmul.f32 1.442695, %v3012_v19  ;;  %v8215_v19 = vpack.c.bf16 %v3365_v17, %v3364_v16  ;;  %v8532_v17 = vmov -1.0  }
0x1546   :  { %8422 = vpow2.f32 %v3013_v20  ;;  %v3366_v20 = vld [vmem:[%s9878_s1 + $0x30] sm:$0xff] }
0x1550   :  { %v8423_v21 = vpop.eup %8422 }
0x1551   :  { %v3015_v22 = vsel %vm499_vm3, %v8423_v21, 0.0 }
0x1552   :  { %3016 = vadd.xlane.f32.xlu1 %v3015_v22 }
0x1582   :  { %v2928_v25 = vpop.f32.mrb[30].mxu0 }
0x1583   :  { %v2932_v26 = vadd.f32 %v2928_v25, %v9096_v23  ;;  %v7732_v27 = vpop.f32.mrb[31].mxu0  ;;  %v3368_v25 = vld [vmem:[%s9878_s1 + $0x40] sm:$0xff] }
0x1585   :  { %v3167_v29 = vadd.f32 %v2932_v26, %v8786_v47  ;;  %v3369_v26 = vld [vmem:[%s9878_s1 + $0x48] sm:$0xff] }
0x1586   :  { %v8223_v27 = vpack.c.bf16 %v3369_v26, %v3368_v25 }
0x1587   :  { %v9190_v30 = vadd.f32 %v7030_v28, %v3167_v29  ;;  %v3371_v29 = vld [vmem:[%s9878_s1 + $0x58] sm:$0xff] }
0x1589   :  { %v3178_v31 = vsel %vm195_vm1, %v9190_v30, 0.0 }
0x158a   :  { %3179 = vadd.xlane.f32.xlu0 %v3178_v31 }
0x15df   :  { %v3017_v33 = vpop.xlane.xlu1 %3016 }
0x15e0   :  { %8424 = vrcp.f32 %v3017_v33  ;;  %v3372_v33 = vld [vmem:[%s9878_s1 + $0x60] sm:$0xff] }
0x15ea   :  { %v8425_v2 = vpop.eup %8424 }
0x15eb   :  { %v3019_v34 = vmul.f32 %v8425_v2, %v8423_v21  ;;  %v3367_v21 = vld [vmem:[%s9878_s1 + $0x38] sm:$0xff]  ;;  %v3373_v2 = vld [vmem:[%s9878_s1 + $0x68] sm:$0xff] }
0x15ec   :  { %v8219_v22 = vpack.c.bf16 %v3367_v21, %v3366_v20 }
0x15ed   :  { %7741 = vmatmul.mubr.msk.f32.vlgmr.msra.gmra.mrb[32].mxu0 %vm499_vm3, %v3019_v34  ;;  %v8231_v34 = vpack.c.bf16 %v3373_v2, %v3372_v33 }
0x1617   :  { %v3180_v23 = vpop.xlane.xlu0 %3179 }
0x1618   :  { %v3184_v35 = vmul.f32 0.03125, %v3180_v23  ;;  %v3374_v23 = vld [vmem:[%s9878_s1 + $0x70] sm:$0xff] }
0x161a   :  { %v3186_v36 = vsub.f32 %v9190_v30, %v3184_v35  ;;  %v3375_v35 = vld [vmem:[%s9878_s1 + $0x78] sm:$0xff] }
0x161c   :  { %v3188_v37 = vmul.f32 %v3186_v36, %v3186_v36 }
0x161e   :  { %v3190_v38 = vsel %vm195_vm1, %v3188_v37, 0.0  ;;  %v7033_v37 = vld [vmem:[%s9879_s2] ss:$0 sm:$0xff] }
0x161f   :  { %3191 = vadd.xlane.f32.xlu0 %v3190_v38 }
0x16ac   :  { %v3192_v47 = vpop.xlane.xlu0 %3191 }
0x16ad   :  { %v3196_v39 = vmul.f32 0.03125, %v3192_v47 }
0x16af   :  { %v3198_v40 = vadd.f32 1e-05, %v3196_v39 }
0x16b1   :  { %8426 = vrsqrt.f32 %v3198_v40 }
0x16bb   :  { %v8427_v41 = vpop.eup %8426 }
0x16bc   :  { %v3202_v43 = vmul.f32 %v8427_v41, %v3186_v36  ;;  %v8235_v36 = vpack.c.bf16 %v3375_v35, %v3374_v23 }
0x16be   :  { %v3208_v45 = vmul.f32 %v7031_v42, %v3202_v43 }
0x16c0   :  { %v3089_v48 = vpop.f32.mrb[32].mxu0  ;;  %v3214_v49 = vadd.f32 %v7032_v44, %v3208_v45 }
0x16c1   :  { %v7742_v50 = vpop.f32.mrb[33].mxu0  ;;  %7746 = vmatmul.mubr.msk.f32.vlgmr.msra.gmra.mrb[36].mxu1 %vm499_vm3, %v3089_v48 }
0x16c2   :  { %7756 = vmatprep.mubr.msk.f32.mxu0 %vm195_vm1, %v3214_v49  ;;  %8210 = vmatpush3.bf16.msra.mxu1 %v8207_v12 }
0x16c3   :  { %8212 = vmatprep.subr.bf16.mxu1 %v8211_v15 }
0x16c6   :  { %8214 = vmatpush3.bf16.msra.mxu1 %v8211_v15 }
0x16c7   :  { %8216 = vmatprep.subr.bf16.mxu1 %v8215_v19 }
0x16ca   :  { %8218 = vmatpush3.bf16.msra.mxu1 %v8215_v19 }
0x16cb   :  { %8220 = vmatprep.subr.bf16.mxu1 %v8219_v22 }
0x16ce   :  { %8222 = vmatpush3.bf16.msra.mxu1 %v8219_v22 }
0x16cf   :  { %8224 = vmatprep.subr.bf16.mxu1 %v8223_v27 }
0x16d2   :  { %8226 = vmatpush3.bf16.msra.mxu1 %v8223_v27 }
0x1794   :  { %v3162_v51 = vpop.f32.mrb[36].mxu1 }
0x1795   :  { %v3166_v18 = vadd.f32 %v3162_v51, %v9155_v56  ;;  %v7747_v52 = vpop.f32.mrb[37].mxu1  ;;  %v3216_v56 = vld [vmem:[%s9877_s0] sm:$0xff] }
0x1796   :  { %v8199_v63 = vpack.c.bf16 %v3217_v62, %v3216_v56 }
0x1797   :  { %v3168_v54 = vadd.f32 %v8490_v53, %v3166_v18 }
0x1798   :  { %8200 = vmatprep.subr.bf16.mxu0 %v8199_v63 }
0x1799   :  { %v9206_v55 = vadd.f32 %v7030_v28, %v3168_v54  ;;  %8202 = vmatpush3.bf16.msra.mxu0 %v8199_v63  ;;  %v3370_v28 = vld [vmem:[%s9878_s1 + $0x50] sm:$0xff] }
0x179a   :  { %8204 = vmatprep.subr.bf16.mxu0 %v8203_v1  ;;  %v8227_v31 = vpack.c.bf16 %v3371_v29, %v3370_v28 }
0x179b   :  { %v3181_v57 = vsel %vm195_vm1, %v9206_v55, 0.0 }
0x179c   :  { %3182 = vadd.xlane.f32.xlu1 %v3181_v57  ;;  %8228 = vmatprep.subr.bf16.mxu1 %v8227_v31 }
0x179d   :  { %8206 = vmatpush3.bf16.msra.mxu0 %v8203_v1  ;;  %8230 = vmatpush3.bf16.msra.mxu1 %v8227_v31 }
0x179e   :  { %8232 = vmatprep.subr.bf16.mxu1 %v8231_v34 }
0x17a1   :  { %8234 = vmatpush3.bf16.msra.mxu1 %v8231_v34  ;;  %v7036_v34 = vld [vmem:[%s9880_s23] ss:$0 sm:$0xff] }
0x17a2   :  { %8236 = vmatprep.subr.bf16.mxu1 %v8235_v36 }
0x17a5   :  { %8238 = vmatpush3.bf16.msra.mxu1 %v8235_v36 }
0x17a6   :  { %7832 = vmatprep.subr.mxu1 %v8530_v32 }
0x1829   :  { %v3183_v58 = vpop.xlane.xlu1 %3182 }
0x182a   :  { %v3185_v24 = vmul.f32 0.03125, %v3183_v58 }
0x182c   :  { %v3187_v59 = vsub.f32 %v9206_v55, %v3185_v24 }
0x182e   :  { %v3189_v60 = vmul.f32 %v3187_v59, %v3187_v59 }
0x1830   :  { %v3193_v61 = vsel %vm195_vm1, %v3189_v60, 0.0 }
0x1831   :  { %3194 = vadd.xlane.f32.xlu1 %v3193_v61 }
0x18be   :  { %v3195_v3 = vpop.xlane.xlu1 %3194 }
0x18bf   :  { %v3197_v4 = vmul.f32 0.03125, %v3195_v3 }
0x18c1   :  { %v3199_v6 = vadd.f32 1e-05, %v3197_v4 }
0x18c3   :  { %8428 = vrsqrt.f32 %v3199_v6 }
0x18cd   :  { %v8429_v7 = vpop.eup %8428 }
0x18ce   :  { %v3203_v8 = vmul.f32 %v8429_v7, %v3187_v59 }
0x18d0   :  { %v3209_v9 = vmul.f32 %v7031_v42, %v3203_v8 }
0x18d2   :  { %v3215_v10 = vadd.f32 %v7032_v44, %v3209_v9 }
0x18d4   :  { %7757 = vmatmul.mubr.msk.f32.vlgmr.msra.gmra.mrb[34].mxu0 %vm195_vm1, %v3215_v10 }
0x19a7   :  { %v7758_v38 = vpop.f32.mrb[34].mxu0 }
0x19a8   :  { %v3303_v47 = vadd.f32 %v7758_v38, %v7033_v37  ;;  %v3297_v39 = vpop.f32.mrb[35].mxu0 }
0x19a9   :  { %v3298_v40 = vadd.f32 %v7033_v37, %v3297_v39 }
0x19aa   :  { %v3309_v41 = vmul.f32 0.70710677, %v3303_v47  ;;  %v3307_v29 = vmul.f32 0.5, %v3303_v47 }
0x19ab   :  { %v3308_v42 = vmul.f32 0.70710677, %v3298_v40  ;;  %v3306_v27 = vmul.f32 0.5, %v3298_v40 }
0x19ac   :  { %v3315_v43 = vand.u32 2147483647, %v3309_v41  ;;  %vm3311_vm4 = vcmp.ge.f32.partialorder %v3309_v41, 0.0 }
0x19ad   :  { %v3314_v44 = vand.u32 2147483647, %v3308_v42  ;;  %vm3310_vm5 = vcmp.ge.f32.partialorder %v3308_v42, 0.0  ;;  %v3313_v19 = vsel %vm3311_vm4, 1.0, %v8532_v17 }
0x19ae   :  { %v3317_v45 = vmul.f32 0.3275911, %v3315_v43  ;;  %v3343_v51 = vsub.f32 0.0, %v3315_v43  ;;  %v3312_v22 = vsel %vm3310_vm5, 1.0, %v8532_v17 }
0x19af   :  { %v3316_v48 = vmul.f32 0.3275911, %v3314_v44  ;;  %v3342_v18 = vsub.f32 0.0, %v3314_v44 }
0x19b0   :  { %v3319_v49 = vadd.f32 1.0, %v3317_v45  ;;  %v3345_v53 = vmul.f32 %v3343_v51, %v3315_v43  ;;  %v7040_v51 = vld [vmem:[%s9873_s4 + $0x88] sm:$0xff] }
0x19b1   :  { %v3318_v50 = vadd.f32 1.0, %v3316_v48  ;;  %v3344_v58 = vmul.f32 %v3342_v18, %v3314_v44 }
0x19b2   :  { %8430 = vrcp.f32 %v3319_v49  ;;  %v3348_v60 = vmul.f32 1.442695, %v3345_v53  ;;  %v7042_v53 = vld [vmem:[%s9873_s4 + $0x98] sm:$0xff] }
0x19b3   :  { %8432 = vrcp.f32 %v3318_v50  ;;  %v3346_v62 = vmul.f32 1.442695, %v3344_v58  ;;  %v7039_v50 = vld [vmem:[%s9873_s4 + $0x80] sm:$0xff]  ;;  %v7048_v58 = vld [vmem:[%s9827_s7 + $0x88] sm:$0xff] }
0x19b4   :  { %8434 = vpow2.f32 %v3348_v60  ;;  %v8239_v18 = vpack.c.bf16 %v7040_v51, %v7039_v50 }
0x19b5   :  { %8436 = vpow2.f32 %v3346_v62 }
0x19b6   :  { %8240 = vmatprep.subr.bf16.mxu0 %v8239_v18 }
0x19b7   :  { %8242 = vmatpush3.bf16.msra.mxu0 %v8239_v18 }
0x19bc   :  { %v8431_v52 = vpop.eup %8430 }
0x19bd   :  { %v8433_v54 = vpop.eup %8432  ;;  %v3325_v57 = vmul.f32 1.0614054, %v8431_v52 }
0x19be   :  { %v3324_v24 = vmul.f32 1.0614054, %v8433_v54  ;;  %v8435_v5 = vpop.eup %8434 }
0x19bf   :  { %v3327_v59 = vadd.f32 -1.4531521, %v3325_v57  ;;  %v8437_v13 = vpop.eup %8436  ;;  %v7047_v57 = vld [vmem:[%s9827_s7 + $0x80] sm:$0xff] }
0x19c0   :  { %v3326_v61 = vadd.f32 -1.4531521, %v3324_v24  ;;  %v8247_v24 = vpack.c.bf16 %v7048_v58, %v7047_v57  ;;  %v7075_v58 = vld [vmem:[%s9876_s24 + $0x5] ss:$0 sm:$0xff] }
0x19c1   :  { %v3329_v56 = vmul.f32 %v8431_v52, %v3327_v59 }
0x19c2   :  { %v3328_v63 = vmul.f32 %v8433_v54, %v3326_v61 }
0x19c3   :  { %v3331_v46 = vadd.f32 1.4214138, %v3329_v56 }
0x19c4   :  { %v3330_v0 = vadd.f32 1.4214138, %v3328_v63 }
0x19c5   :  { %v3333_v1 = vmul.f32 %v8431_v52, %v3331_v46 }
0x19c6   :  { %v3332_v3 = vmul.f32 %v8433_v54, %v3330_v0  ;;  %v7037_v0 = vld [vmem:[%s9874_s28 + $0x1] ss:$0 sm:$0xff] }
0x19c7   :  { %v3335_v4 = vadd.f32 -0.28449672, %v3333_v1 }
0x19c8   :  { %v3334_v6 = vadd.f32 -0.28449672, %v3332_v3 }
0x19c9   :  { %v3337_v7 = vmul.f32 %v8431_v52, %v3335_v4 }
0x19ca   :  { %v3336_v8 = vmul.f32 %v8433_v54, %v3334_v6  ;;  %v7038_v6 = vld [vmem:[%s9875_s29 + $0x1] ss:$0 sm:$0xff]  ;;  %s9881_s29 = sld [smem:[#allocation22_spill]] }
0x19cb   :  { %v3339_v9 = vadd.f32 0.2548296, %v3337_v7 }
0x19cc   :  { %v3338_v10 = vadd.f32 0.2548296, %v3336_v8 }
0x19cd   :  { %v3341_v11 = vmul.f32 %v8431_v52, %v3339_v9  ;;  %v7041_v52 = vld [vmem:[%s9873_s4 + $0x90] sm:$0xff] }
0x19ce   :  { %v3340_v12 = vmul.f32 %v8433_v54, %v3338_v10  ;;  %v8243_v54 = vpack.c.bf16 %v7042_v53, %v7041_v52  ;;  %v7049_v9 = vld [vmem:[%s9827_s7 + $0x90] sm:$0xff]  ;;  %v7050_v10 = vld [vmem:[%s9827_s7 + $0x98] sm:$0xff] }
0x19cf   :  { %v3351_v14 = vmul.f32 %v8435_v5, %v3341_v11 }
0x19d0   :  { %v3350_v15 = vmul.f32 %v8437_v13, %v3340_v12  ;;  %8244 = vmatprep.subr.bf16.mxu0 %v8243_v54  ;;  %v8251_v12 = vpack.c.bf16 %v7050_v10, %v7049_v9  ;;  %v7055_v13 = vld [vmem:[%s9829_s9 + $0x80] sm:$0xff] }
0x19d1   :  { %v3353_v16 = vsub.f32 1.0, %v3351_v14  ;;  %8246 = vmatpush3.bf16.msra.mxu0 %v8243_v54  ;;  %v7056_v14 = vld [vmem:[%s9829_s9 + $0x88] sm:$0xff] }
0x19d2   :  { %v3352_v20 = vsub.f32 1.0, %v3350_v15  ;;  %8248 = vmatprep.subr.bf16.mxu0 %v8247_v24  ;;  %v8255_v15 = vpack.c.bf16 %v7056_v14, %v7055_v13  ;;  %v7078_v14 = vld [vmem:[%s9827_s7 + $0xa0] sm:$0xff] }
0x19d3   :  { %v3355_v21 = vmul.f32 %v3353_v16, %v3313_v19  ;;  %v7057_v16 = vld [vmem:[%s9829_s9 + $0x90] sm:$0xff]  ;;  %v7058_v19 = vld [vmem:[%s9829_s9 + $0x98] sm:$0xff] }
0x19d4   :  { %v3354_v25 = vmul.f32 %v3352_v20, %v3312_v22  ;;  %v8259_v20 = vpack.c.bf16 %v7058_v19, %v7057_v16 }
0x19d5   :  { %v3357_v26 = vadd.f32 1.0, %v3355_v21 }
0x19d6   :  { %v3356_v28 = vadd.f32 1.0, %v3354_v25  ;;  %v7052_v25 = vld [vmem:[%s9828_s8 + $0x4] ss:$0 sm:$0xff] }
0x19d7   :  { %v3359_v33 = vmul.f32 %v3357_v26, %v3307_v29 }
0x19d8   :  { %v3358_v31 = vmul.f32 %v3356_v28, %v3306_v27  ;;  %v7044_v28 = vld [vmem:[%s9876_s24 + $0x4] ss:$0 sm:$0xff] }
0x19da   :  { %7791 = vmatprep.mubr.f32.mxu1 %v3358_v31  ;;  %v7070_v31 = vld [vmem:[%s9873_s4 + $0xa0] sm:$0xff] }
0x19db   :  { %7792 = vmatmul.mubr.f32.vlgmr.msra.gmra.mrb[38].mxu1 %v3359_v33  ;;  %v7071_v33 = vld [vmem:[%s9873_s4 + $0xa8] sm:$0xff] }
0x19dc   :  { %7834 = vmatprep.mubr.msk.f32.mxu1 %vm8531_vm2, %v8530_v32 }
0x1aae   :  { %v7793_v2 = vpop.f32.mrb[38].mxu1 }
0x1aaf   :  { %v3452_v23 = vadd.f32 %v7793_v2, %v9206_v55  ;;  %v3442_v35 = vpop.f32.mrb[39].mxu1 }
0x1ab0   :  { %v3451_v36 = vadd.f32 %v3442_v35, %v9190_v30  ;;  %v7060_v35 = vld [vmem:[%s9830_s10 + $0x4] ss:$0 sm:$0xff] }
0x1ab1   :  { %v9286_v37 = vadd.f32 %v7036_v34, %v3452_v23 }
0x1ab2   :  { %v9288_v38 = vadd.f32 %v7036_v34, %v3451_v36  ;;  %v8263_v34 = vpack.c.bf16 %v7071_v33, %v7070_v31  ;;  %v7072_v36 = vld [vmem:[%s9873_s4 + $0xb0] sm:$0xff] }
0x1ab3   :  { %v3465_v47 = vsel %vm195_vm1, %v9286_v37, 0.0 }
0x1ab4   :  { %3466 = vadd.xlane.f32.xlu1 %v3465_v47  ;;  %v3462_v39 = vsel %vm195_vm1, %v9288_v38, 0.0  ;;  %v7073_v47 = vld [vmem:[%s9873_s4 + $0xb8] sm:$0xff] }
0x1ab5   :  { %3463 = vadd.xlane.f32.xlu0 %v3462_v39 }
0x1b41   :  { %v3467_v40 = vpop.xlane.xlu1 %3466 }
0x1b42   :  { %v3469_v41 = vmul.f32 0.03125, %v3467_v40  ;;  %v3464_v42 = vpop.xlane.xlu0 %3463 }
0x1b43   :  { %v3468_v43 = vmul.f32 0.03125, %v3464_v42 }
0x1b44   :  { %v3471_v55 = vsub.f32 %v9286_v37, %v3469_v41 }
0x1b45   :  { %v3470_v30 = vsub.f32 %v9288_v38, %v3468_v43  ;;  %v8267_v43 = vpack.c.bf16 %v7073_v47, %v7072_v36 }
0x1b46   :  { %v3473_v44 = vmul.f32 %v3471_v55, %v3471_v55 }
0x1b47   :  { %v3472_v45 = vmul.f32 %v3470_v30, %v3470_v30 }
0x1b48   :  { %v3477_v48 = vsel %vm195_vm1, %v3473_v44, 0.0  ;;  %v7087_v44 = vld [vmem:[%s9829_s9 + $0xa8] sm:$0xff] }
0x1b49   :  { %3478 = vadd.xlane.f32.xlu1 %v3477_v48  ;;  %v3474_v49 = vsel %vm195_vm1, %v3472_v45, 0.0  ;;  %v7088_v48 = vld [vmem:[%s9829_s9 + $0xb0] sm:$0xff] }
0x1b4a   :  { %3475 = vadd.xlane.f32.xlu0 %v3474_v49  ;;  %v7089_v49 = vld [vmem:[%s9829_s9 + $0xb8] sm:$0xff] }
0x1b4b   :  { %v8283_v50 = vpack.c.bf16 %v7089_v49, %v7088_v48  ;;  %v7097_v48 = vld [vmem:[%s9831_s11 + $0x28] sm:$0xff] }
0x1bd6   :  { %v3479_v59 = vpop.xlane.xlu1 %3478 }
0x1bd7   :  { %v3481_v60 = vmul.f32 0.03125, %v3479_v59  ;;  %v3476_v61 = vpop.xlane.xlu0 %3475 }
0x1bd8   :  { %v3480_v56 = vmul.f32 0.03125, %v3476_v61  ;;  %v7091_v61 = vld [vmem:[%s9830_s10 + $0x5] ss:$0 sm:$0xff] }
0x1bd9   :  { %v3483_v62 = vadd.f32 1e-05, %v3481_v60 }
0x1bda   :  { %v3482_v63 = vadd.f32 1e-05, %v3480_v56 }
0x1bdb   :  { %8438 = vrsqrt.f32 %v3483_v62 }
0x1bdc   :  { %8440 = vrsqrt.f32 %v3482_v63 }
0x1be5   :  { %v8439_v46 = vpop.eup %8438 }
0x1be6   :  { %v8441_v1 = vpop.eup %8440  ;;  %v3487_v3 = vmul.f32 %v8439_v46, %v3471_v55 }
0x1be7   :  { %v3486_v4 = vmul.f32 %v8441_v1, %v3470_v30  ;;  %v7086_v30 = vld [vmem:[%s9829_s9 + $0xa0] sm:$0xff] }
0x1be8   :  { %v3493_v7 = vmul.f32 %v7037_v0, %v3487_v3  ;;  %v8279_v45 = vpack.c.bf16 %v7087_v44, %v7086_v30 }
0x1be9   :  { %v3492_v8 = vmul.f32 %v7037_v0, %v3486_v4 }
0x1bea   :  { %v9330_v5 = vadd.f32 %v7038_v6, %v3493_v7 }
0x1beb   :  { %v9328_v11 = vadd.f32 %v7038_v6, %v3492_v8 }
0x1bed   :  { %7802 = vmatprep.mubr.msk.f32.mxu0 %vm195_vm1, %v9328_v11 }
0x1bee   :  { %7803 = vmatmul.mubr.msk.f32.vlgmr.msra.gmra.mrb[36].mxu0 %vm195_vm1, %v9330_v5 }
0x1bef   :  { %8250 = vmatpush3.bf16.msra.mxu0 %v8247_v24  ;;  %7813 = vmatprep.mubr.msk.f32.mxu0 %vm195_vm1, %v9328_v11 }
0x1bf0   :  { %8252 = vmatprep.subr.bf16.mxu0 %v8251_v12 }
0x1bf3   :  { %8254 = vmatpush3.bf16.msra.mxu0 %v8251_v12 }
0x1bf4   :  { %8256 = vmatprep.subr.bf16.mxu0 %v8255_v15 }
0x1bf6   :  { %7814 = vmatmul.mubr.msk.f32.vlgmr.msra.gmra.mrb[38].mxu0 %vm195_vm1, %v9330_v5 }
0x1bf7   :  { %8258 = vmatpush3.bf16.msra.mxu0 %v8255_v15  ;;  %7824 = vmatprep.mubr.msk.f32.mxu0 %vm195_vm1, %v9328_v11  ;;  %v7079_v15 = vld [vmem:[%s9827_s7 + $0xa8] sm:$0xff] }
0x1bf8   :  { %8260 = vmatprep.subr.bf16.mxu0 %v8259_v20 }
0x1bfb   :  { %8262 = vmatpush3.bf16.msra.mxu0 %v8259_v20  ;;  %v8271_v20 = vpack.c.bf16 %v7079_v15, %v7078_v14  ;;  %v7105_v14 = vld [vmem:[%s9873_s4 + $0xc0] sm:$0xff]  ;;  %v7106_v15 = vld [vmem:[%s9873_s4 + $0xc8] sm:$0xff] }
0x1bfc   :  { %7827 = vmatprep.subr.mxu0 %v8530_v32 }
0x1bfe   :  { %7825 = vmatmul.mubr.msk.f32.vlgmr.msra.gmra.mrb[40].mxu0 %vm195_vm1, %v9330_v5 }
0x1bff   :  { %7829 = vmatprep.mubr.msk.f32.mxu0 %vm8531_vm2, %v8530_v32 }
0x1cc1   :  { %v7804_v21 = vpop.f32.mrb[36].mxu0 }
0x1cc2   :  { %v3585_v22 = vpop.f32.mrb[37].mxu0  ;;  %v3591_v40 = vadd.f32 %v7804_v21, %v7044_v28  ;;  %v7080_v21 = vld [vmem:[%s9827_s7 + $0xb0] sm:$0xff] }
0x1cc3   :  { %v3586_v2 = vadd.f32 %v7044_v28, %v3585_v22  ;;  %v7081_v22 = vld [vmem:[%s9827_s7 + $0xb8] sm:$0xff] }
0x1cc9   :  { %v7815_v26 = vpop.f32.mrb[38].mxu0 }
0x1cca   :  { %v3673_v27 = vpop.f32.mrb[39].mxu0  ;;  %v3679_v23 = vadd.f32 %v7815_v26, %v7052_v25 }
0x1ccb   :  { %v3674_v29 = vadd.f32 %v7052_v25, %v3673_v27  ;;  %v8275_v27 = vpack.c.bf16 %v7081_v22, %v7080_v21 }
0x1ccd   :  { %7828 = vmatpush3.xpose.msk.msra.mxu0 %vm499_vm3, %v3674_v29 }
0x1cce   :  { %7837 = vmatprep.subr.mxu0 %v8530_v32 }
0x1cd0   :  { %7830 = vmatmul.mubr.msk.f32.vlgmr.msra.gmra.mrb[42].mxu0 %vm499_vm3, %v3586_v2  ;;  %v7083_v2 = vld [vmem:[%s9828_s8 + $0x5] ss:$0 sm:$0xff] }
0x1cd1   :  { %v7826_v39 = vpop.f32.mrb[40].mxu0  ;;  %7838 = vmatpush3.xpose.msk.msra.mxu0 %vm499_vm3, %v3679_v23  ;;  %7839 = vmatprep.mubr.msk.f32.mxu0 %vm8531_vm2, %v8530_v32 }
0x1cd2   :  { %v9386_v41 = vadd.f32 %v7826_v39, %v7060_v35  ;;  %v3761_v42 = vpop.f32.mrb[41].mxu0  ;;  %8264 = vmatprep.subr.bf16.mxu0 %v8263_v34 }
0x1cd3   :  { %v3762_v55 = vadd.f32 %v7060_v35, %v3761_v42 }
0x1cd4   :  { %7840 = vmatmul.mubr.msk.f32.vlgmr.msra.gmra.mrb[44].mxu0 %vm499_vm3, %v3591_v40 }
0x1cd5   :  { %7833 = vmatpush3.msra.mxu1 %v3762_v55  ;;  %8266 = vmatpush3.bf16.msra.mxu0 %v8263_v34 }
0x1cd6   :  { %7855 = vmatprep.mubr.msk.f32.mxu0 %vm195_vm1, %v9328_v11  ;;  %8268 = vmatprep.subr.bf16.mxu0 %v8267_v43 }
0x1cd7   :  { %7842 = vmatprep.subr.mxu1 %v8530_v32 }
0x1cd9   :  { %8270 = vmatpush3.bf16.msra.mxu0 %v8267_v43 }
0x1cda   :  { %8280 = vmatprep.subr.bf16.mxu0 %v8279_v45 }
0x1cdc   :  { %7856 = vmatmul.mubr.msk.f32.vlgmr.msra.gmra.mrb[46].mxu0 %vm195_vm1, %v9330_v5 }
0x1cdd   :  { %8282 = vmatpush3.bf16.msra.mxu0 %v8279_v45  ;;  %7877 = vmatprep.mubr.msk.f32.mxu0 %vm195_vm1, %v9328_v11 }
0x1cde   :  { %8284 = vmatprep.subr.bf16.mxu0 %v8283_v50 }
0x1ce1   :  { %8286 = vmatpush3.bf16.msra.mxu0 %v8283_v50 }
0x1ce2   :  { %7890 = vmatprep.subr.mxu0 %v8530_v32 }
0x1ce4   :  { %7878 = vmatmul.mubr.msk.f32.vlgmr.msra.gmra.mrb[48].mxu0 %vm195_vm1, %v9330_v5 }
0x1ce5   :  { %7892 = vmatprep.mubr.msk.f32.mxu0 %vm8531_vm2, %v8530_v32  ;;  %7891 = vmatpush3.msra.mxu0 %v7097_v48 }
0x1ce6   :  { %7900 = vmatprep.subr.mxu0 %v8530_v32 }
0x1da3   :  { %v3842_v51 = vpop.f32.mrb[42].mxu0 }
0x1da4   :  { %v7831_v18 = vpop.f32.mrb[43].mxu0  ;;  %v3846_v52 = vsel %vm499_vm3, %v3842_v51, -inf }
0x1da5   :  { %3847 = vmax.xlane.f32.xlu0 %v3846_v52  ;;  %v7066_v18 = vld [vmem:[%s9831_s11 + $0x20] sm:$0xff] }
0x1da7   :  { %v4004_v53 = vpop.f32.mrb[44].mxu0 }
0x1da8   :  { %v7841_v54 = vpop.f32.mrb[45].mxu0  ;;  %v4008_v57 = vsel %vm499_vm3, %v4004_v53, -inf }
0x1da9   :  { %4009 = vmax.xlane.f32.xlu1 %v4008_v57 }
0x1daf   :  { %v7857_v24 = vpop.f32.mrb[46].mxu0 }
0x1db0   :  { %v9418_v59 = vadd.f32 %v7857_v24, %v7075_v58  ;;  %v4171_v60 = vpop.f32.mrb[47].mxu0 }
0x1db1   :  { %v4172_v47 = vadd.f32 %v7075_v58, %v4171_v60 }
0x1db7   :  { %v7879_v56 = vpop.f32.mrb[48].mxu0 }
0x1db8   :  { %v9423_v62 = vadd.f32 %v7879_v56, %v7091_v61  ;;  %v4347_v63 = vpop.f32.mrb[49].mxu0 }
0x1db9   :  { %v4348_v39 = vadd.f32 %v7091_v61, %v4347_v63 }
0x1e32   :  { %v3848_v46 = vpop.xlane.xlu0 %3847 }
0x1e33   :  { %v3849_v0 = vsub.f32 %v3842_v51, %v3848_v46 }
0x1e35   :  { %v3850_v1 = vmul.f32 1.442695, %v3849_v0 }
0x1e36   :  { %v4010_v3 = vpop.xlane.xlu1 %4009 }
0x1e37   :  { %8442 = vpow2.f32 %v3850_v1  ;;  %v4011_v4 = vsub.f32 %v4004_v53, %v4010_v3 }
0x1e39   :  { %v4012_v6 = vmul.f32 1.442695, %v4011_v4  ;;  %v7113_v4 = vld [vmem:[%s9827_s7 + $0xc0] sm:$0xff] }
0x1e3b   :  { %8444 = vpow2.f32 %v4012_v6  ;;  %v7114_v6 = vld [vmem:[%s9827_s7 + $0xc8] sm:$0xff] }
0x1e41   :  { %v8443_v7 = vpop.eup %8442 }
0x1e42   :  { %v3852_v8 = vsel %vm499_vm3, %v8443_v7, 0.0 }
0x1e43   :  { %3853 = vadd.xlane.f32.xlu0 %v3852_v8 }
0x1e45   :  { %v8445_v9 = vpop.eup %8444 }
0x1e46   :  { %v4014_v10 = vsel %vm499_vm3, %v8445_v9, 0.0 }
0x1e47   :  { %4015 = vadd.xlane.f32.xlu1 %v4014_v10  ;;  %v7115_v10 = vld [vmem:[%s9827_s7 + $0xd0] sm:$0xff] }
0x1ed0   :  { %v3854_v12 = vpop.xlane.xlu0 %3853 }
0x1ed1   :  { %8446 = vrcp.f32 %v3854_v12  ;;  %v7116_v12 = vld [vmem:[%s9827_s7 + $0xd8] sm:$0xff] }
0x1ed4   :  { %v4016_v13 = vpop.xlane.xlu1 %4015 }
0x1ed5   :  { %8448 = vrcp.f32 %v4016_v13  ;;  %v8299_v13 = vpack.c.bf16 %v7116_v12, %v7115_v10 }
0x1edb   :  { %v8447_v16 = vpop.eup %8446 }
0x1edc   :  { %v3856_v19 = vmul.f32 %v8447_v16, %v8443_v7  ;;  %v8287_v16 = vpack.c.bf16 %v7106_v15, %v7105_v14  ;;  %v7139_v14 = vld [vmem:[%s9873_s4 + $0xe8] sm:$0xff] }
0x1ede   :  { %7835 = vmatmul.mubr.msk.f32.vlgmr.msra.gmra.mrb[40].mxu1 %vm499_vm3, %v3856_v19  ;;  %v7107_v19 = vld [vmem:[%s9873_s4 + $0xd0] sm:$0xff] }
0x1edf   :  { %v8449_v25 = vpop.eup %8448  ;;  %7843 = vmatpush3.msra.mxu1 %v9386_v41  ;;  %7844 = vmatprep.mubr.msk.f32.mxu1 %vm8531_vm2, %v8530_v32 }
0x1ee0   :  { %v4018_v26 = vmul.f32 %v8449_v25, %v8445_v9  ;;  %8272 = vmatprep.subr.bf16.mxu1 %v8271_v20  ;;  %v8295_v9 = vpack.c.bf16 %v7114_v6, %v7113_v4  ;;  %v7121_v25 = vld [vmem:[%s9829_s9 + $0xc0] sm:$0xff] }
0x1ee2   :  { %7845 = vmatmul.mubr.msk.f32.vlgmr.msra.gmra.mrb[42].mxu1 %vm499_vm3, %v4018_v26  ;;  %v7122_v26 = vld [vmem:[%s9829_s9 + $0xc8] sm:$0xff] }
0x1ee3   :  { %8274 = vmatpush3.bf16.msra.mxu1 %v8271_v20  ;;  %7866 = vmatprep.mubr.msk.f32.mxu1 %vm195_vm1, %v9328_v11  ;;  %v7108_v20 = vld [vmem:[%s9873_s4 + $0xd8] sm:$0xff] }
0x1ee4   :  { %8276 = vmatprep.subr.bf16.mxu1 %v8275_v27  ;;  %v8291_v21 = vpack.c.bf16 %v7108_v20, %v7107_v19 }
0x1ee7   :  { %8278 = vmatpush3.bf16.msra.mxu1 %v8275_v27 }
0x1ee8   :  { %7880 = vmatprep.subr.mxu1 %v8530_v32 }
0x1eea   :  { %7867 = vmatmul.mubr.msk.f32.vlgmr.msra.gmra.mrb[44].mxu1 %vm195_vm1, %v9330_v5 }
0x1eeb   :  { %7882 = vmatprep.mubr.msk.f32.mxu1 %vm8531_vm2, %v8530_v32 }
0x1fb1   :  { %v3926_v28 = vpop.f32.mrb[40].mxu1 }
0x1fb2   :  { %v7836_v29 = vpop.f32.mrb[41].mxu1 }
0x1fb5   :  { %v9451_v31 = vpop.f32.mrb[42].mxu1 }
0x1fb6   :  { %v7846_v33 = vpop.f32.mrb[43].mxu1 }
0x1fb7   :  { %v7124_v33 = vld [vmem:[%s9829_s9 + $0xd8] sm:$0xff] }
0x1fbd   :  { %v7868_v34 = vpop.f32.mrb[44].mxu1 }
0x1fbe   :  { %v4265_v23 = vadd.f32 %v7868_v34, %v7083_v2  ;;  %v4259_v35 = vpop.f32.mrb[45].mxu1 }
0x1fbf   :  { %v4260_v36 = vadd.f32 %v7083_v2, %v4259_v35 }
0x1fc1   :  { %7881 = vmatpush3.xpose.msk.msra.mxu1 %vm499_vm3, %v4260_v36 }
0x1fc2   :  { %7885 = vmatprep.subr.mxu1 %v8530_v32 }
0x1fc4   :  { %7883 = vmatmul.mubr.msk.f32.vlgmr.msra.gmra.mrb[46].mxu1 %vm499_vm3, %v4172_v47 }
0x1fc5   :  { %7886 = vmatpush3.msra.mxu1 %v4348_v39  ;;  %7887 = vmatprep.mubr.msk.f32.mxu1 %vm8531_vm2, %v8530_v32 }
0x1fc6   :  { %7895 = vmatprep.subr.mxu1 %v8530_v32 }
0x2097   :  { %v4428_v40 = vpop.f32.mrb[46].mxu1 }
0x2098   :  { %v7884_v41 = vpop.f32.mrb[47].mxu1  ;;  %v4432_v42 = vsel %vm499_vm3, %v4428_v40, -inf }
0x2099   :  { %4433 = vmax.xlane.f32.xlu0 %v4432_v42 }
0x2126   :  { %v4434_v43 = vpop.xlane.xlu0 %4433 }
0x2127   :  { %v4435_v55 = vsub.f32 %v4428_v40, %v4434_v43  ;;  %v7110_v43 = vld [vmem:[%s9876_s24 + $0x6] ss:$0 sm:$0xff] }
0x2129   :  { %v4436_v30 = vmul.f32 1.442695, %v4435_v55 }
0x212b   :  { %8450 = vpow2.f32 %v4436_v30 }
0x2135   :  { %v8451_v44 = vpop.eup %8450 }
0x2136   :  { %v4438_v45 = vsel %vm499_vm3, %v8451_v44, 0.0 }
0x2137   :  { %4439 = vadd.xlane.f32.xlu1 %v4438_v45 }
0x21c4   :  { %v4440_v49 = vpop.xlane.xlu1 %4439 }
0x21c5   :  { %8452 = vrcp.f32 %v4440_v49 }
0x21cf   :  { %v8453_v50 = vpop.eup %8452 }
0x21d0   :  { %v4442_v51 = vmul.f32 %v8453_v50, %v8451_v44 }
0x21d2   :  { %7888 = vmatmul.mubr.msk.f32.vlgmr.msra.gmra.mrb[48].mxu1 %vm499_vm3, %v4442_v51 }
0x21d3   :  { %7896 = vmatpush3.msra.mxu1 %v7066_v18  ;;  %7897 = vmatprep.mubr.msk.f32.mxu1 %vm8531_vm2, %v8530_v32 }
0x21d4   :  { %7905 = vmatprep.subr.mxu1 %v8530_v32 }
0x21d6   :  { %7898 = vmatmul.mubr.msk.f32.vlgmr.msra.gmra.mrb[50].mxu1 %vm499_vm3, %v3926_v28  ;;  %v8303_v28 = vpack.c.bf16 %v7122_v26, %v7121_v25  ;;  %v7141_v25 = vld [vmem:[%s9873_s4 + $0xf8] sm:$0xff] }
0x21d7   :  { %7906 = vmatpush3.msra.mxu1 %v9423_v62  ;;  %7907 = vmatprep.mubr.msk.f32.mxu1 %vm8531_vm2, %v8530_v32 }
0x21d8   :  { %7915 = vmatprep.subr.mxu1 %v8530_v32 }
0x22a5   :  { %v4512_v52 = vpop.f32.mrb[48].mxu1 }
0x22a6   :  { %v7889_v53 = vpop.f32.mrb[49].mxu1  ;;  %7893 = vmatmul.mubr.msk.f32.vlgmr.msra.gmra.mrb[50].mxu0 %vm499_vm3, %v4512_v52 }
0x22a7   :  { %7901 = vmatpush3.xpose.msk.msra.mxu0 %vm499_vm3, %v4265_v23  ;;  %7902 = vmatprep.mubr.msk.f32.mxu0 %vm8531_vm2, %v8530_v32  ;;  %v7118_v23 = vld [vmem:[%s9828_s8 + $0x6] ss:$0 sm:$0xff] }
0x22a8   :  { %7910 = vmatprep.subr.mxu0 %v8530_v32 }
0x22a9   :  { %v4660_v54 = vpop.f32.mrb[50].mxu1 }
0x22aa   :  { %v7899_v57 = vpop.f32.mrb[51].mxu1  ;;  %7903 = vmatmul.mubr.msk.f32.vlgmr.msra.gmra.mrb[52].mxu0 %vm499_vm3, %v9418_v59 }
0x22ab   :  { %7911 = vmatpush3.msra.mxu0 %v7097_v48  ;;  %7912 = vmatprep.mubr.msk.f32.mxu0 %vm8531_vm2, %v8530_v32  ;;  %v7126_v48 = vld [vmem:[%s9830_s10 + $0x6] ss:$0 sm:$0xff] }
0x22ac   :  { %8288 = vmatprep.subr.bf16.mxu0 %v8287_v16 }
0x2379   :  { %v4587_v58 = vpop.f32.mrb[50].mxu0 }
0x237a   :  { %v9489_v24 = vadd.f32 %v4660_v54, %v4587_v58  ;;  %v7894_v60 = vpop.f32.mrb[51].mxu0 }
0x237d   :  { %v4736_v61 = vpop.f32.mrb[52].mxu0 }
0x237e   :  { %v7904_v56 = vpop.f32.mrb[53].mxu0  ;;  %v4740_v62 = vsel %vm499_vm3, %v4736_v61, -inf }
0x237f   :  { %4741 = vmax.xlane.f32.xlu0 %v4740_v62  ;;  %v7132_v62 = vld [vmem:[%s9831_s11 + $0x30] sm:$0xff] }
0x240c   :  { %v4742_v63 = vpop.xlane.xlu0 %4741 }
0x240d   :  { %v4743_v46 = vsub.f32 %v4736_v61, %v4742_v63 }
0x240f   :  { %v4744_v0 = vmul.f32 1.442695, %v4743_v46 }
0x2411   :  { %8454 = vpow2.f32 %v4744_v0 }
0x241b   :  { %v8455_v1 = vpop.eup %8454 }
0x241c   :  { %v4746_v59 = vsel %vm499_vm3, %v8455_v1, 0.0 }
0x241d   :  { %4747 = vadd.xlane.f32.xlu1 %v4746_v59 }
0x24aa   :  { %v4748_v3 = vpop.xlane.xlu1 %4747 }
0x24ab   :  { %8456 = vrcp.f32 %v4748_v3 }
0x24b5   :  { %v8457_v7 = vpop.eup %8456 }
0x24b6   :  { %v4750_v8 = vmul.f32 %v8457_v7, %v8455_v1 }
0x24b8   :  { %7908 = vmatmul.mubr.msk.f32.vlgmr.msra.gmra.mrb[52].mxu1 %vm499_vm3, %v4750_v8 }
0x24b9   :  { %7916 = vmatpush3.msra.mxu1 %v7066_v18  ;;  %7917 = vmatprep.mubr.msk.f32.mxu1 %vm8531_vm2, %v8530_v32 }
0x24ba   :  { %8296 = vmatprep.subr.bf16.mxu1 %v8295_v9 }
0x24bc   :  { %7918 = vmatmul.mubr.msk.f32.vlgmr.msra.gmra.mrb[54].mxu1 %vm499_vm3, %v9451_v31  ;;  %v7123_v31 = vld [vmem:[%s9829_s9 + $0xd0] sm:$0xff] }
0x24bd   :  { %8298 = vmatpush3.bf16.msra.mxu1 %v8295_v9  ;;  %7939 = vmatprep.mubr.msk.f32.mxu1 %vm195_vm1, %v9328_v11  ;;  %v8307_v34 = vpack.c.bf16 %v7124_v33, %v7123_v31  ;;  %v7156_v33 = vld [vmem:[%s9829_s9 + $0xf0] sm:$0xff] }
0x24be   :  { %8300 = vmatprep.subr.bf16.mxu1 %v8299_v13 }
0x24c1   :  { %8302 = vmatpush3.bf16.msra.mxu1 %v8299_v13  ;;  %v7138_v13 = vld [vmem:[%s9873_s4 + $0xe0] sm:$0xff] }
0x24c2   :  { %7953 = vmatprep.subr.mxu1 %v8530_v32  ;;  %v8311_v15 = vpack.c.bf16 %v7139_v14, %v7138_v13 }
0x24c4   :  { %7940 = vmatmul.mubr.msk.f32.vlgmr.msra.gmra.mrb[56].mxu1 %vm195_vm1, %v9330_v5 }
0x24c5   :  { %7955 = vmatprep.mubr.msk.f32.mxu1 %vm8531_vm2, %v8530_v32 }
0x258b   :  { %v4820_v22 = vpop.f32.mrb[52].mxu1 }
0x258c   :  { %v7909_v27 = vpop.f32.mrb[53].mxu1  ;;  %7913 = vmatmul.mubr.msk.f32.vlgmr.msra.gmra.mrb[54].mxu0 %vm499_vm3, %v4820_v22  ;;  %v7140_v22 = vld [vmem:[%s9873_s4 + $0xf0] sm:$0xff]  ;;  %s9883_s4 = sld [smem:[#allocation21_spill]] }
0x258d   :  { %8290 = vmatpush3.bf16.msra.mxu0 %v8287_v16  ;;  %7928 = vmatprep.mubr.msk.f32.mxu0 %vm195_vm1, %v9328_v11 }
0x258e   :  { %8292 = vmatprep.subr.bf16.mxu0 %v8291_v21 }
0x258f   :  { %v4966_v29 = vpop.f32.mrb[54].mxu1 }
0x2590   :  { %v7919_v2 = vpop.f32.mrb[55].mxu1 }
0x2591   :  { %8294 = vmatpush3.bf16.msra.mxu0 %v8291_v21  ;;  %v7157_v2 = vld [vmem:[%s9829_s9 + $0xf8] sm:$0xff] }
0x2592   :  { %8304 = vmatprep.subr.bf16.mxu0 %v8303_v28 }
0x2594   :  { %7929 = vmatmul.mubr.msk.f32.vlgmr.msra.gmra.mrb[56].mxu0 %vm195_vm1, %v9330_v5 }
0x2595   :  { %8306 = vmatpush3.bf16.msra.mxu0 %v8303_v28  ;;  %7950 = vmatprep.mubr.msk.f32.mxu0 %vm195_vm1, %v9328_v11  ;;  %v8315_v28 = vpack.c.bf16 %v7141_v25, %v7140_v22 }
0x2596   :  { %8308 = vmatprep.subr.bf16.mxu0 %v8307_v34 }
0x2597   :  { %v7941_v35 = vpop.f32.mrb[56].mxu1 }
0x2598   :  { %v5143_v36 = vadd.f32 %v7941_v35, %v7118_v23  ;;  %v5137_v47 = vpop.f32.mrb[57].mxu1  ;;  %v7147_v35 = vld [vmem:[%s9827_s7 + $0xe8] sm:$0xff] }
0x2599   :  { %v5138_v39 = vadd.f32 %v7118_v23, %v5137_v47  ;;  %8310 = vmatpush3.bf16.msra.mxu0 %v8307_v34  ;;  %v8331_v34 = vpack.c.bf16 %v7157_v2, %v7156_v33  ;;  %v7146_v23 = vld [vmem:[%s9827_s7 + $0xe0] sm:$0xff]  ;;  %v7148_v47 = vld [vmem:[%s9827_s7 + $0xf0] sm:$0xff] }
0x259a   :  { %7963 = vmatprep.subr.mxu0 %v8530_v32 }
0x259b   :  { %7954 = vmatpush3.xpose.msk.msra.mxu1 %vm499_vm3, %v5138_v39  ;;  %v7149_v39 = vld [vmem:[%s9827_s7 + $0xf8] sm:$0xff] }
0x259c   :  { %7951 = vmatmul.mubr.msk.f32.vlgmr.msra.gmra.mrb[58].mxu0 %vm195_vm1, %v9330_v5  ;;  %7958 = vmatprep.subr.mxu1 %v8530_v32 }
0x259d   :  { %7965 = vmatprep.mubr.msk.f32.mxu0 %vm8531_vm2, %v8530_v32  ;;  %7964 = vmatpush3.msra.mxu0 %v7132_v62 }
0x259e   :  { %7973 = vmatprep.subr.mxu0 %v8530_v32 }
0x265f   :  { %v4893_v40 = vpop.f32.mrb[54].mxu0 }
0x2660   :  { %v9558_v41 = vadd.f32 %v4966_v29, %v4893_v40  ;;  %v7914_v42 = vpop.f32.mrb[55].mxu0  ;;  %v7154_v29 = vld [vmem:[%s9829_s9 + $0xe0] sm:$0xff]  ;;  %v8323_v40 = vpack.c.bf16 %v7149_v39, %v7148_v47 }
0x2667   :  { %v7930_v55 = vpop.f32.mrb[56].mxu0 }
0x2668   :  { %v5055_v30 = vadd.f32 %v7930_v55, %v7110_v43  ;;  %v5049_v44 = vpop.f32.mrb[57].mxu0  ;;  %v7143_v55 = vld [vmem:[%s9876_s24 + $0x7] ss:$0 sm:$0xff] }
0x2669   :  { %v5050_v45 = vadd.f32 %v7110_v43, %v5049_v44 }
0x266b   :  { %7956 = vmatmul.mubr.msk.f32.vlgmr.msra.gmra.mrb[58].mxu1 %vm499_vm3, %v5050_v45 }
0x266c   :  { %7960 = vmatprep.mubr.msk.f32.mxu1 %vm8531_vm2, %v8530_v32 }
0x266f   :  { %v7952_v49 = vpop.f32.mrb[58].mxu0 }
0x2670   :  { %v5231_v50 = vadd.f32 %v7952_v49, %v7126_v48  ;;  %v5225_v51 = vpop.f32.mrb[59].mxu0 }
0x2671   :  { %v5226_v18 = vadd.f32 %v7126_v48, %v5225_v51 }
0x2673   :  { %7959 = vmatpush3.msra.mxu1 %v5226_v18 }
0x2674   :  { %7968 = vmatprep.subr.mxu1 %v8530_v32 }
0x273e   :  { %v5306_v52 = vpop.f32.mrb[58].mxu1 }
0x273f   :  { %v7957_v53 = vpop.f32.mrb[59].mxu1  ;;  %v5310_v54 = vsel %vm499_vm3, %v5306_v52, -inf }
0x2740   :  { %5311 = vmax.xlane.f32.xlu0 %v5310_v54  ;;  %v7151_v53 = vld [vmem:[%s9828_s8 + $0x7] ss:$0 sm:$0xff] }
0x27cd   :  { %v5312_v57 = vpop.xlane.xlu0 %5311 }
0x27ce   :  { %v5313_v58 = vsub.f32 %v5306_v52, %v5312_v57 }
0x27d0   :  { %v5314_v60 = vmul.f32 1.442695, %v5313_v58 }
0x27d2   :  { %8458 = vpow2.f32 %v5314_v60 }
0x27dc   :  { %v8459_v61 = vpop.eup %8458 }
0x27dd   :  { %v5316_v56 = vsel %vm499_vm3, %v8459_v61, 0.0 }
0x27de   :  { %5317 = vadd.xlane.f32.xlu1 %v5316_v56 }
0x286b   :  { %v5318_v63 = vpop.xlane.xlu1 %5317 }
0x286c   :  { %8460 = vrcp.f32 %v5318_v63 }
0x2876   :  { %v8461_v46 = vpop.eup %8460 }
0x2877   :  { %v5320_v0 = vmul.f32 %v8461_v46, %v8459_v61 }
0x2879   :  { %7961 = vmatmul.mubr.msk.f32.vlgmr.msra.gmra.mrb[60].mxu1 %vm499_vm3, %v5320_v0 }
0x287a   :  { %7969 = vmatpush3.xpose.msk.msra.mxu1 %vm499_vm3, %v5143_v36  ;;  %7970 = vmatprep.mubr.msk.f32.mxu1 %vm8531_vm2, %v8530_v32  ;;  %v8319_v36 = vpack.c.bf16 %v7147_v35, %v7146_v23 }
0x287b   :  { %7978 = vmatprep.subr.mxu1 %v8530_v32 }
0x287d   :  { %7971 = vmatmul.mubr.msk.f32.vlgmr.msra.gmra.mrb[62].mxu1 %vm499_vm3, %v5055_v30 }
0x287e   :  { %7979 = vmatpush3.msra.mxu1 %v7132_v62  ;;  %7980 = vmatprep.mubr.msk.f32.mxu1 %vm8531_vm2, %v8530_v32 }
0x287f   :  { %8320 = vmatprep.subr.bf16.mxu1 %v8319_v36 }
0x294c   :  { %v5390_v1 = vpop.f32.mrb[60].mxu1 }
0x294d   :  { %v7962_v59 = vpop.f32.mrb[61].mxu1  ;;  %7966 = vmatmul.mubr.msk.f32.vlgmr.msra.gmra.mrb[60].mxu0 %vm499_vm3, %v5390_v1 }
0x294e   :  { %7974 = vmatpush3.msra.mxu0 %v5231_v50  ;;  %7975 = vmatprep.mubr.msk.f32.mxu0 %vm8531_vm2, %v8530_v32 }
0x294f   :  { %8312 = vmatprep.subr.bf16.mxu0 %v8311_v15 }
0x2950   :  { %v5542_v3 = vpop.f32.mrb[62].mxu1 }
0x2951   :  { %v7972_v4 = vpop.f32.mrb[63].mxu1  ;;  %v5546_v6 = vsel %vm499_vm3, %v5542_v3, -inf }
0x2952   :  { %5547 = vmax.xlane.f32.xlu0 %v5546_v6 }
0x29df   :  { %v5548_v7 = vpop.xlane.xlu0 %5547 }
0x29e0   :  { %v5549_v8 = vsub.f32 %v5542_v3, %v5548_v7  ;;  %v7165_v3 = vld [vmem:[%s9831_s11 + $0x38] sm:$0xff] }
0x29e2   :  { %v5550_v9 = vmul.f32 1.442695, %v5549_v8 }
0x29e4   :  { %8462 = vpow2.f32 %v5550_v9 }
0x29ee   :  { %v8463_v10 = vpop.eup %8462 }
0x29ef   :  { %v5552_v12 = vsel %vm499_vm3, %v8463_v10, 0.0 }
0x29f0   :  { %5553 = vadd.xlane.f32.xlu1 %v5552_v12 }
0x2a20   :  { %v5465_v16 = vpop.f32.mrb[60].mxu0 }
0x2a21   :  { %v9596_v19 = vadd.f32 %v5465_v16, %v9489_v24  ;;  %v7967_v20 = vpop.f32.mrb[61].mxu0  ;;  %v7155_v24 = vld [vmem:[%s9829_s9 + $0xe8] sm:$0xff] }
0x2a22   :  { %v8327_v31 = vpack.c.bf16 %v7155_v24, %v7154_v29 }
0x2a7d   :  { %v5554_v21 = vpop.xlane.xlu1 %5553 }
0x2a7e   :  { %8464 = vrcp.f32 %v5554_v21 }
0x2a88   :  { %v8465_v26 = vpop.eup %8464 }
0x2a89   :  { %v5556_v27 = vmul.f32 %v8465_v26, %v8463_v10 }
0x2a8b   :  { %7976 = vmatmul.mubr.msk.f32.vlgmr.msra.gmra.mrb[62].mxu0 %vm499_vm3, %v5556_v27 }
0x2a8c   :  { %8314 = vmatpush3.bf16.msra.mxu0 %v8311_v15  ;;  %7991 = vmatprep.mubr.msk.f32.mxu0 %vm195_vm1, %v9328_v11 }
0x2a8d   :  { %8316 = vmatprep.subr.bf16.mxu0 %v8315_v28 }
0x2a90   :  { %8318 = vmatpush3.bf16.msra.mxu0 %v8315_v28 }
0x2a91   :  { %8328 = vmatprep.subr.bf16.mxu0 %v8327_v31 }
0x2a93   :  { %7992 = vmatmul.mubr.msk.f32.vlgmr.msra.gmra.mrb[64].mxu0 %vm195_vm1, %v9330_v5 }
0x2a94   :  { %8330 = vmatpush3.bf16.msra.mxu0 %v8327_v31  ;;  %8013 = vmatprep.mubr.msk.f32.mxu0 %vm195_vm1, %v9328_v11 }
0x2a95   :  { %8332 = vmatprep.subr.bf16.mxu0 %v8331_v34 }
0x2a98   :  { %8334 = vmatpush3.bf16.msra.mxu0 %v8331_v34 }
0x2a99   :  { %8026 = vmatprep.subr.mxu0 %v8530_v32 }
0x2a9b   :  { %8014 = vmatmul.mubr.msk.f32.vlgmr.msra.gmra.mrb[66].mxu0 %vm195_vm1, %v9330_v5 }
0x2a9c   :  { %8028 = vmatprep.mubr.msk.f32.mxu0 %vm8531_vm2, %v8530_v32  ;;  %8027 = vmatpush3.msra.mxu0 %v7165_v3 }
0x2a9d   :  { %8036 = vmatprep.subr.mxu0 %v8530_v32 }
0x2b5e   :  { %v5626_v42 = vpop.f32.mrb[62].mxu0 }
0x2b5f   :  { %v7977_v43 = vpop.f32.mrb[63].mxu0  ;;  %7981 = vmatmul.mubr.msk.f32.vlgmr.msra.gmra.mrb[64].mxu1 %vm499_vm3, %v5626_v42 }
0x2b60   :  { %8322 = vmatpush3.bf16.msra.mxu1 %v8319_v36  ;;  %8002 = vmatprep.mubr.msk.f32.mxu1 %vm195_vm1, %v9328_v11  ;;  %v7159_v11 = vld [vmem:[%s9830_s10 + $0x7] ss:$0 sm:$0xff]  ;;  %v7173_v43 = vld [vmem:[%s9834_s14 + $0x1] ss:$0 sm:$0xff] }
0x2b61   :  { %8324 = vmatprep.subr.bf16.mxu1 %v8323_v40 }
0x2b64   :  { %8326 = vmatpush3.bf16.msra.mxu1 %v8323_v40  ;;  %v7172_v40 = vld [vmem:[%s9833_s13 + $0x1] ss:$0 sm:$0xff]  ;;  %s8533_s13 = smov [#allocation5]  }
0x2b65   :  { %8016 = vmatprep.subr.mxu1 %v8530_v32  ;;  %s6870_s14 = sshll.u32 %s8533_s13, 4  ;;  %s6871_s14 = int_to_ptr.vmem [resolvable:$true] %s6870_s14 }
0x2b66   :  { %v7993_v30 = vpop.f32.mrb[64].mxu0  ;;  %s8503_s26 = scalar_lea.vmem %s6871_s14, 256  ;;  %p8508_p6 = scmp.lt.s32.totalorder %s6871_s14, %s6871_s14 }
0x2b67   :  { %v5789_v44 = vadd.f32 %v7993_v30, %v7143_v55  ;;  %v5783_v45 = vpop.f32.mrb[65].mxu0  ;;  %8003 = vmatmul.mubr.msk.f32.vlgmr.msra.gmra.mrb[66].mxu1 %vm195_vm1, %v9330_v5  ;;  %p8504_p5 = scmp.ne.s32.totalorder %s6871_s14, %s8503_s26  ;;  %p8509_p7 = scmp.lt.s32.totalorder %s8503_s26, %s8503_s26 }
0x2b68   :  { %8018 = vmatprep.mubr.msk.f32.mxu1 %vm8531_vm2, %v8530_v32  ;;  %v5784_v60 = vadd.f32 %v7143_v55, %v5783_v45 }
0x2b69   :  { %p8510_p8 = por %p8509_p7, %p8508_p6 }
0x2b6b   :  { %p8511_p9 = pnand %p8510_p8, %p8504_p5 }
0x2b6e   :  { %v8015_v48 = vpop.f32.mrb[66].mxu0 }
0x2b6f   :  { %v5965_v49 = vadd.f32 %v8015_v48, %v7159_v11  ;;  %v5959_v50 = vpop.f32.mrb[67].mxu0 }
0x2b70   :  { %v5960_v61 = vadd.f32 %v7159_v11, %v5959_v50 }
0x2c32   :  { %v5699_v51 = vpop.f32.mrb[64].mxu1 }
0x2c33   :  { %v9655_v18 = vadd.f32 %v5699_v51, %v9558_v41  ;;  %v7982_v52 = vpop.f32.mrb[65].mxu1 }
0x2c3a   :  { %v8004_v5 = vpop.f32.mrb[66].mxu1 }
0x2c3b   :  { %v5877_v54 = vadd.f32 %v8004_v5, %v7151_v53  ;;  %v5871_v57 = vpop.f32.mrb[67].mxu1 }
0x2c3c   :  { %v5872_v58 = vadd.f32 %v7151_v53, %v5871_v57 }
0x2c3e   :  { %8017 = vmatpush3.xpose.msk.msra.mxu1 %vm499_vm3, %v5872_v58 }
0x2c3f   :  { %8021 = vmatprep.subr.mxu1 %v8530_v32 }
0x2c41   :  { %8019 = vmatmul.mubr.msk.f32.vlgmr.msra.gmra.mrb[68].mxu1 %vm499_vm3, %v5784_v60 }
0x2c42   :  { %8022 = vmatpush3.msra.mxu1 %v5960_v61  ;;  %8023 = vmatprep.mubr.msk.f32.mxu1 %vm8531_vm2, %v8530_v32  ;;  %v7176_v61 = vld [vmem:[%s9877_s0 + $0x30] sm:$0xff] }
0x2c43   :  { %8031 = vmatprep.subr.mxu1 %v8530_v32 }
0x2d14   :  { %v6040_v41 = vpop.f32.mrb[68].mxu1 }
0x2d15   :  { %v8020_v56 = vpop.f32.mrb[69].mxu1  ;;  %v6044_v62 = vsel %vm499_vm3, %v6040_v41, -inf }
0x2d16   :  { %6045 = vmax.xlane.f32.xlu0 %v6044_v62 }
0x2da3   :  { %v6046_v63 = vpop.xlane.xlu0 %6045 }
0x2da4   :  { %v6047_v46 = vsub.f32 %v6040_v41, %v6046_v63  ;;  %v7177_v41 = vld [vmem:[%s9877_s0 + $0x38] sm:$0xff] }
0x2da5   :  { %v8339_v56 = vpack.c.bf16 %v7177_v41, %v7176_v61 }
0x2da6   :  { %v6048_v0 = vmul.f32 1.442695, %v6047_v46 }
0x2da8   :  { %8466 = vpow2.f32 %v6048_v0 }
0x2db2   :  { %v8467_v1 = vpop.eup %8466 }
0x2db3   :  { %v6050_v59 = vsel %vm499_vm3, %v8467_v1, 0.0 }
0x2db4   :  { %6051 = vadd.xlane.f32.xlu1 %v6050_v59 }
0x2e41   :  { %v6052_v4 = vpop.xlane.xlu1 %6051 }
0x2e42   :  { %8468 = vrcp.f32 %v6052_v4  ;;  %v7181_v4 = vld [vmem:[%s9878_s1 + $0x80] sm:$0xff] }
0x2e4c   :  { %v8469_v6 = vpop.eup %8468 }
0x2e4d   :  { %v6054_v7 = vmul.f32 %v8469_v6, %v8467_v1  ;;  %v7182_v6 = vld [vmem:[%s9878_s1 + $0x88] sm:$0xff] }
0x2e4f   :  { %8024 = vmatmul.mubr.msk.f32.vlgmr.msra.gmra.mrb[70].mxu1 %vm499_vm3, %v6054_v7  ;;  %v8343_v7 = vpack.c.bf16 %v7182_v6, %v7181_v4 }
0x2e50   :  { %8032 = vmatpush3.xpose.msk.msra.mxu1 %vm499_vm3, %v5877_v54  ;;  %8033 = vmatprep.mubr.msk.f32.mxu1 %vm8531_vm2, %v8530_v32 }
0x2e51   :  { %8041 = vmatprep.subr.mxu1 %v8530_v32 }
0x2e53   :  { %8034 = vmatmul.mubr.msk.f32.vlgmr.msra.gmra.mrb[72].mxu1 %vm499_vm3, %v5789_v44 }
0x2e54   :  { %8042 = vmatpush3.msra.mxu1 %v7165_v3  ;;  %8043 = vmatprep.mubr.msk.f32.mxu1 %vm8531_vm2, %v8530_v32 }
0x2e55   :  { %8344 = vmatprep.subr.bf16.mxu1 %v8343_v7 }
0x2f22   :  { %v6124_v8 = vpop.f32.mrb[70].mxu1 }
0x2f23   :  { %v8025_v9 = vpop.f32.mrb[71].mxu1  ;;  %8029 = vmatmul.mubr.msk.f32.vlgmr.msra.gmra.mrb[68].mxu0 %vm499_vm3, %v6124_v8  ;;  %v7183_v8 = vld [vmem:[%s9878_s1 + $0x90] sm:$0xff] }
0x2f24   :  { %8037 = vmatpush3.msra.mxu0 %v5965_v49  ;;  %8038 = vmatprep.mubr.msk.f32.mxu0 %vm8531_vm2, %v8530_v32  ;;  %v7171_v32 = vld [vmem:[%s9832_s12 + $0x1] ss:$0 sm:$0xff]  ;;  %v7184_v9 = vld [vmem:[%s9878_s1 + $0x98] sm:$0xff]  ;;  %s9882_s12 = sld [smem:[#allocation20_spill]] }
0x2f26   :  { %v6276_v10 = vpop.f32.mrb[72].mxu1 }
0x2f27   :  { %v8035_v12 = vpop.f32.mrb[73].mxu1  ;;  %v6280_v13 = vsel %vm499_vm3, %v6276_v10, -inf }
0x2f28   :  { %6281 = vmax.xlane.f32.xlu0 %v6280_v13  ;;  %v7185_v12 = vld [vmem:[%s9878_s1 + $0xa0] sm:$0xff]  ;;  %v7186_v13 = vld [vmem:[%s9878_s1 + $0xa8] sm:$0xff] }
0x2fb5   :  { %v6282_v14 = vpop.xlane.xlu0 %6281 }
0x2fb6   :  { %v6283_v15 = vsub.f32 %v6276_v10, %v6282_v14  ;;  %v8347_v10 = vpack.c.bf16 %v7184_v9, %v7183_v8  ;;  %v8351_v14 = vpack.c.bf16 %v7186_v13, %v7185_v12 }
0x2fb8   :  { %v6284_v16 = vmul.f32 1.442695, %v6283_v15  ;;  %v7187_v15 = vld [vmem:[%s9878_s1 + $0xb0] sm:$0xff] }
0x2fba   :  { %8470 = vpow2.f32 %v6284_v16  ;;  %v7188_v16 = vld [vmem:[%s9878_s1 + $0xb8] sm:$0xff] }
0x2fc4   :  { %v8471_v20 = vpop.eup %8470 }
0x2fc5   :  { %v6286_v21 = vsel %vm499_vm3, %v8471_v20, 0.0 }
0x2fc6   :  { %6287 = vadd.xlane.f32.xlu1 %v6286_v21  ;;  %v7189_v21 = vld [vmem:[%s9878_s1 + $0xc0] sm:$0xff] }
0x2ff6   :  { %v6199_v22 = vpop.f32.mrb[68].mxu0 }
0x2ff7   :  { %v6203_v25 = vadd.f32 %v6199_v22, %v9596_v19  ;;  %v8030_v26 = vpop.f32.mrb[69].mxu0  ;;  %v7190_v22 = vld [vmem:[%s9878_s1 + $0xc8] sm:$0xff] }
0x2ff8   :  { %v7191_v26 = vld [vmem:[%s9878_s1 + $0xd0] sm:$0xff] }
0x2ff9   :  { %v6438_v27 = vadd.f32 %v6203_v25, %v9288_v38  ;;  %v8359_v25 = vpack.c.bf16 %v7190_v22, %v7189_v21 }
0x2ffb   :  { %v9690_v28 = vadd.f32 %v7171_v32, %v6438_v27 }
0x2ffd   :  { %v6449_v29 = vsel %vm195_vm1, %v9690_v28, 0.0 }
0x2ffe   :  { %6450 = vadd.xlane.f32.xlu0 %v6449_v29  ;;  %v7193_v29 = vld [vmem:[%s9878_s1 + $0xe0] sm:$0xff] }
0x3053   :  { %v6288_v24 = vpop.xlane.xlu1 %6287 }
0x3054   :  { %8472 = vrcp.f32 %v6288_v24  ;;  %v7194_v24 = vld [vmem:[%s9878_s1 + $0xe8] sm:$0xff] }
0x305e   :  { %v8473_v31 = vpop.eup %8472 }
0x305f   :  { %v6290_v33 = vmul.f32 %v8473_v31, %v8471_v20  ;;  %v8355_v20 = vpack.c.bf16 %v7188_v16, %v7187_v15  ;;  %v8367_v31 = vpack.c.bf16 %v7194_v24, %v7193_v29  ;;  %v7197_v24 = vld [vmem:[%s9880_s23 + $0x1] ss:$0 sm:$0xff] }
0x3061   :  { %8039 = vmatmul.mubr.msk.f32.vlgmr.msra.gmra.mrb[70].mxu0 %vm499_vm3, %v6290_v33  ;;  %v7195_v33 = vld [vmem:[%s9878_s1 + $0xf0] sm:$0xff] }
0x308b   :  { %v6451_v19 = vpop.xlane.xlu0 %6450 }
0x308c   :  { %v6455_v2 = vmul.f32 0.03125, %v6451_v19  ;;  %v7196_v19 = vld [vmem:[%s9878_s1 + $0xf8] sm:$0xff] }
0x308e   :  { %v6457_v34 = vsub.f32 %v9690_v28, %v6455_v2  ;;  %v8371_v2 = vpack.c.bf16 %v7196_v19, %v7195_v33 }
0x3090   :  { %v6459_v23 = vmul.f32 %v6457_v34, %v6457_v34 }
0x3092   :  { %v6461_v35 = vsel %vm195_vm1, %v6459_v23, 0.0 }
0x3093   :  { %6462 = vadd.xlane.f32.xlu0 %v6461_v35 }
0x3120   :  { %v6463_v38 = vpop.xlane.xlu0 %6462 }
0x3121   :  { %v6467_v36 = vmul.f32 0.03125, %v6463_v38 }
0x3123   :  { %v6469_v47 = vadd.f32 1e-05, %v6467_v36 }
0x3125   :  { %8474 = vrsqrt.f32 %v6469_v47 }
0x312f   :  { %v8475_v39 = vpop.eup %8474 }
0x3130   :  { %v6473_v42 = vmul.f32 %v8475_v39, %v6457_v34  ;;  %v7178_v34 = vld [vmem:[%s9879_s2 + $0x1] ss:$0 sm:$0xff] }
0x3132   :  { %v6479_v55 = vmul.f32 %v7172_v40, %v6473_v42 }
0x3134   :  { %v6360_v30 = vpop.f32.mrb[70].mxu0  ;;  %v6485_v44 = vadd.f32 %v7173_v43, %v6479_v55 }
0x3135   :  { %v8040_v45 = vpop.f32.mrb[71].mxu0  ;;  %8044 = vmatmul.mubr.msk.f32.vlgmr.msra.gmra.mrb[74].mxu1 %vm499_vm3, %v6360_v30 }
0x3136   :  { %8054 = vmatprep.mubr.msk.f32.mxu0 %vm195_vm1, %v6485_v44  ;;  %8346 = vmatpush3.bf16.msra.mxu1 %v8343_v7 }
0x3137   :  { %8348 = vmatprep.subr.bf16.mxu1 %v8347_v10 }
0x313a   :  { %8350 = vmatpush3.bf16.msra.mxu1 %v8347_v10 }
0x313b   :  { %8352 = vmatprep.subr.bf16.mxu1 %v8351_v14 }
0x313e   :  { %8354 = vmatpush3.bf16.msra.mxu1 %v8351_v14 }
0x313f   :  { %8356 = vmatprep.subr.bf16.mxu1 %v8355_v20 }
0x3142   :  { %8358 = vmatpush3.bf16.msra.mxu1 %v8355_v20 }
0x3143   :  { %8360 = vmatprep.subr.bf16.mxu1 %v8359_v25 }
0x3146   :  { %8362 = vmatpush3.bf16.msra.mxu1 %v8359_v25 }
0x3208   :  { %v6433_v11 = vpop.f32.mrb[74].mxu1 }
0x3209   :  { %v6437_v48 = vadd.f32 %v6433_v11, %v9655_v18  ;;  %v8045_v49 = vpop.f32.mrb[75].mxu1  ;;  %v7174_v18 = vld [vmem:[%s9877_s0 + $0x20] sm:$0xff] }
0x320b   :  { %v6439_v50 = vadd.f32 %v6437_v48, %v9286_v37  ;;  %v7175_v37 = vld [vmem:[%s9877_s0 + $0x28] sm:$0xff] }
0x320c   :  { %v8335_v60 = vpack.c.bf16 %v7175_v37, %v7174_v18 }
0x320d   :  { %v9707_v51 = vadd.f32 %v7171_v32, %v6439_v50  ;;  %v7192_v32 = vld [vmem:[%s9878_s1 + $0xd8] sm:$0xff] }
0x320e   :  { %8336 = vmatprep.subr.bf16.mxu0 %v8335_v60  ;;  %v8363_v27 = vpack.c.bf16 %v7192_v32, %v7191_v26 }
0x320f   :  { %v6452_v52 = vsel %vm195_vm1, %v9707_v51, 0.0  ;;  %8338 = vmatpush3.bf16.msra.mxu0 %v8335_v60 }
0x3210   :  { %6453 = vadd.xlane.f32.xlu1 %v6452_v52  ;;  %8340 = vmatprep.subr.bf16.mxu0 %v8339_v56 }
0x3211   :  { %8364 = vmatprep.subr.bf16.mxu1 %v8363_v27 }
0x3212   :  { %8366 = vmatpush3.bf16.msra.mxu1 %v8363_v27 }
0x3213   :  { %8342 = vmatpush3.bf16.msra.mxu0 %v8339_v56  ;;  %8368 = vmatprep.subr.bf16.mxu1 %v8367_v31 }
0x3216   :  { %8370 = vmatpush3.bf16.msra.mxu1 %v8367_v31 }
0x3217   :  { %8372 = vmatprep.subr.bf16.mxu1 %v8371_v2 }
0x321a   :  { %8374 = vmatpush3.bf16.msra.mxu1 %v8371_v2 }
0x329d   :  { %v6454_v53 = vpop.xlane.xlu1 %6453 }
0x329e   :  { %v6456_v5 = vmul.f32 0.03125, %v6454_v53 }
0x32a0   :  { %v6458_v54 = vsub.f32 %v9707_v51, %v6456_v5 }
0x32a2   :  { %v6460_v57 = vmul.f32 %v6458_v54, %v6458_v54 }
0x32a4   :  { %v6464_v58 = vsel %vm195_vm1, %v6460_v57, 0.0 }
0x32a5   :  { %6465 = vadd.xlane.f32.xlu1 %v6464_v58 }
0x3332   :  { %v6466_v62 = vpop.xlane.xlu1 %6465 }
0x3333   :  { %v6468_v63 = vmul.f32 0.03125, %v6466_v62 }
0x3335   :  { %v6470_v46 = vadd.f32 1e-05, %v6468_v63 }
0x3337   :  { %8476 = vrsqrt.f32 %v6470_v46 }
0x3341   :  { %v8477_v0 = vpop.eup %8476 }
0x3342   :  { %v6474_v1 = vmul.f32 %v8477_v0, %v6458_v54 }
0x3344   :  { %v6480_v59 = vmul.f32 %v7172_v40, %v6474_v1 }
0x3346   :  { %v6486_v3 = vadd.f32 %v7173_v43, %v6480_v59 }
0x3348   :  { %8055 = vmatmul.mubr.msk.f32.vlgmr.msra.gmra.mrb[72].mxu0 %vm195_vm1, %v6486_v3 }
0x341b   :  { %v8056_v23 = vpop.f32.mrb[72].mxu0 }
0x341c   :  { %v6575_v35 = vadd.f32 %v8056_v23, %v7178_v34  ;;  %v6569_v38 = vpop.f32.mrb[73].mxu0 }
0x341d   :  { %v6570_v36 = vadd.f32 %v7178_v34, %v6569_v38 }
0x341e   :  { %v6581_v47 = vmul.f32 0.70710677, %v6575_v35  ;;  %v6579_v26 = vmul.f32 0.5, %v6575_v35 }
0x341f   :  { %v6580_v39 = vmul.f32 0.70710677, %v6570_v36  ;;  %v6578_v22 = vmul.f32 0.5, %v6570_v36 }
0x3420   :  { %v6587_v40 = vand.u32 2147483647, %v6581_v47  ;;  %vm6583_vm6 = vcmp.ge.f32.partialorder %v6581_v47, 0.0 }
0x3421   :  { %v6586_v42 = vand.u32 2147483647, %v6580_v39  ;;  %vm6582_vm7 = vcmp.ge.f32.partialorder %v6580_v39, 0.0  ;;  %v6585_v13 = vsel %vm6583_vm6, 1.0, %v8532_v17 }
0x3422   :  { %v6589_v43 = vmul.f32 0.3275911, %v6587_v40  ;;  %v6615_v45 = vsub.f32 0.0, %v6587_v40  ;;  %v6584_v16 = vsel %vm6582_vm7, 1.0, %v8532_v17 }
0x3423   :  { %v6588_v55 = vmul.f32 0.3275911, %v6586_v42  ;;  %v6614_v11 = vsub.f32 0.0, %v6586_v42 }
0x3424   :  { %v6591_v30 = vadd.f32 1.0, %v6589_v43  ;;  %v6617_v49 = vmul.f32 %v6615_v45, %v6587_v40  ;;  %v6779_v45 = vld [vmem:[%s9881_s29 + $0x10] sm:$0xff] }
0x3425   :  { %v6590_v44 = vadd.f32 1.0, %v6588_v55  ;;  %v6616_v53 = vmul.f32 %v6614_v11, %v6586_v42  ;;  %v6777_v55 = vld [vmem:[%s9881_s29] sm:$0xff]  ;;  %v6780_v11 = vld [vmem:[%s9881_s29 + $0x18] sm:$0xff] }
0x3426   :  { %8478 = vrcp.f32 %v6591_v30  ;;  %v6620_v57 = vmul.f32 1.442695, %v6617_v49  ;;  %v6778_v30 = vld [vmem:[%s9881_s29 + $0x8] sm:$0xff] }
0x3427   :  { %8480 = vrcp.f32 %v6590_v44  ;;  %v6618_v37 = vmul.f32 1.442695, %v6616_v53  ;;  %v8375_v44 = vpack.c.bf16 %v6778_v30, %v6777_v55 }
0x3428   :  { %8482 = vpow2.f32 %v6620_v57 }
0x3429   :  { %8484 = vpow2.f32 %v6618_v37  ;;  %8376 = vmatprep.subr.bf16.mxu0 %v8375_v44 }
0x342a   :  { %8378 = vmatpush3.bf16.msra.mxu0 %v8375_v44 }
0x3430   :  { %v8479_v48 = vpop.eup %8478 }
0x3431   :  { %v8481_v50 = vpop.eup %8480  ;;  %v6597_v52 = vmul.f32 1.0614054, %v8479_v48 }
0x3432   :  { %v6596_v5 = vmul.f32 1.0614054, %v8481_v50  ;;  %v8483_v6 = vpop.eup %8482 }
0x3433   :  { %v6599_v54 = vadd.f32 -1.4531521, %v6597_v52  ;;  %v8485_v8 = vpop.eup %8484 }
0x3434   :  { %v6598_v58 = vadd.f32 -1.4531521, %v6596_v5 }
0x3435   :  { %v6601_v18 = vmul.f32 %v8479_v48, %v6599_v54 }
0x3436   :  { %v6600_v60 = vmul.f32 %v8481_v50, %v6598_v58  ;;  %v7198_v58 = vld [vmem:[%s9882_s12] ss:$0 sm:$0xff] }
0x3437   :  { %v6603_v61 = vadd.f32 1.4214138, %v6601_v18 }
0x3438   :  { %v6602_v41 = vadd.f32 1.4214138, %v6600_v60 }
0x3439   :  { %v6605_v56 = vmul.f32 %v8479_v48, %v6603_v61  ;;  %v7199_v61 = vld [vmem:[%s9883_s4] ss:$0 sm:$0xff] }
0x343a   :  { %v6604_v62 = vmul.f32 %v8481_v50, %v6602_v41 }
0x343b   :  { %v6607_v63 = vadd.f32 -0.28449672, %v6605_v56 }
0x343c   :  { %v6606_v46 = vadd.f32 -0.28449672, %v6604_v62 }
0x343d   :  { %v6609_v0 = vmul.f32 %v8479_v48, %v6607_v63 }
0x343e   :  { %v6608_v1 = vmul.f32 %v8481_v50, %v6606_v46 }
0x343f   :  { %v6611_v59 = vadd.f32 0.2548296, %v6609_v0 }
0x3440   :  { %v6610_v3 = vadd.f32 0.2548296, %v6608_v1 }
0x3441   :  { %v6613_v4 = vmul.f32 %v8479_v48, %v6611_v59  ;;  %v8379_v48 = vpack.c.bf16 %v6780_v11, %v6779_v45 }
0x3442   :  { %v6612_v7 = vmul.f32 %v8481_v50, %v6610_v3 }
0x3443   :  { %v6623_v9 = vmul.f32 %v8483_v6, %v6613_v4  ;;  %8380 = vmatprep.subr.bf16.mxu0 %v8379_v48 }
0x3444   :  { %v6622_v10 = vmul.f32 %v8485_v8, %v6612_v7  ;;  %8382 = vmatpush3.bf16.msra.mxu0 %v8379_v48 }
0x3445   :  { %v6625_v12 = vsub.f32 1.0, %v6623_v9 }
0x3446   :  { %v6624_v14 = vsub.f32 1.0, %v6622_v10 }
0x3447   :  { %v6627_v15 = vmul.f32 %v6625_v12, %v6585_v13 }
0x3448   :  { %v6626_v20 = vmul.f32 %v6624_v14, %v6584_v16 }
0x3449   :  { %v6629_v21 = vadd.f32 1.0, %v6627_v15 }
0x344a   :  { %v6628_v25 = vadd.f32 1.0, %v6626_v20 }
0x344b   :  { %v6631_v27 = vmul.f32 %v6629_v21, %v6579_v26 }
0x344c   :  { %v6630_v32 = vmul.f32 %v6628_v25, %v6578_v22 }
0x344e   :  { %8089 = vmatprep.mubr.f32.mxu1 %v6630_v32 }
0x344f   :  { %8090 = vmatmul.mubr.f32.vlgmr.msra.gmra.mrb[76].mxu1 %v6631_v27 }
0x3522   :  { %v8091_v29 = vpop.f32.mrb[76].mxu1 }
0x3523   :  { %v6725_v31 = vadd.f32 %v8091_v29, %v9707_v51  ;;  %v6715_v33 = vpop.f32.mrb[77].mxu1 }
0x3524   :  { %v6724_v19 = vadd.f32 %v6715_v33, %v9690_v28 }
0x3525   :  { %v6732_v17 = vadd.f32 %v7197_v24, %v6725_v31 }
0x3526   :  { %v6731_v2 = vadd.f32 %v7197_v24, %v6724_v19 }
0x3527   :  { %v6738_v34 = vsel %vm195_vm1, %v6732_v17, 0.0 }
0x3528   :  { %6739 = vadd.xlane.f32.xlu1 %v6738_v34  ;;  %v6735_v23 = vsel %vm195_vm1, %v6731_v2, 0.0 }
0x3529   :  { %6736 = vadd.xlane.f32.xlu0 %v6735_v23 }
0x35b5   :  { %v6740_v35 = vpop.xlane.xlu1 %6739 }
0x35b6   :  { %v6742_v38 = vmul.f32 0.03125, %v6740_v35  ;;  %v6737_v36 = vpop.xlane.xlu0 %6736 }
0x35b7   :  { %v6741_v47 = vmul.f32 0.03125, %v6737_v36 }
0x35b8   :  { %v6744_v39 = vsub.f32 %v6732_v17, %v6742_v38 }
0x35b9   :  { %v6743_v40 = vsub.f32 %v6731_v2, %v6741_v47 }
0x35ba   :  { %v6746_v42 = vmul.f32 %v6744_v39, %v6744_v39 }
0x35bb   :  { %v6745_v43 = vmul.f32 %v6743_v40, %v6743_v40 }
0x35bc   :  { %v6750_v51 = vsel %vm195_vm1, %v6746_v42, 0.0 }
0x35bd   :  { %6751 = vadd.xlane.f32.xlu1 %v6750_v51  ;;  %v6747_v28 = vsel %vm195_vm1, %v6745_v43, 0.0 }
0x35be   :  { %6748 = vadd.xlane.f32.xlu0 %v6747_v28 }
0x364a   :  { %v6752_v49 = vpop.xlane.xlu1 %6751 }
0x364b   :  { %v6754_v50 = vmul.f32 0.03125, %v6752_v49  ;;  %v6749_v52 = vpop.xlane.xlu0 %6748 }
0x364c   :  { %v6753_v53 = vmul.f32 0.03125, %v6749_v52 }
0x364d   :  { %v6756_v5 = vadd.f32 1e-05, %v6754_v50 }
0x364e   :  { %v6755_v54 = vadd.f32 1e-05, %v6753_v53 }
0x364f   :  { %8486 = vrsqrt.f32 %v6756_v5 }
0x3650   :  { %8488 = vrsqrt.f32 %v6755_v54 }
0x3659   :  { %v8487_v57 = vpop.eup %8486 }
0x365a   :  { %v8489_v18 = vpop.eup %8488  ;;  %v6760_v37 = vmul.f32 %v8487_v57, %v6744_v39 }
0x365b   :  { %v6759_v60 = vmul.f32 %v8489_v18, %v6743_v40 }
0x365c   :  { %v6768_v41 = vmul.f32 %v7198_v58, %v6760_v37 }
0x365d   :  { %v6767_v56 = vmul.f32 %v7198_v58, %v6759_v60 }
0x365e   :  { %v6776_v63 = vadd.f32 %v7199_v61, %v6768_v41 }
0x365f   :  { %v6775_v62 = vadd.f32 %v7199_v61, %v6767_v56 }
0x3661   :  { %8100 = vmatprep.mubr.msk.f32.mxu0 %vm195_vm1, %v6775_v62 }
0x3662   :  { %8101 = vmatmul.mubr.msk.f32.vlgmr.msra.gmra.mrb[74].mxu0 %vm195_vm1, %v6776_v63 }
0x3735   :  { %v8102_v46 = vpop.f32.mrb[74].mxu0 }
0x3736   :  { %6864 = vst [vmem:[#allocation5 + $0x8] sm:$0xff] %v8102_v46  ;;  %v6853_v0 = vpop.f32.mrb[75].mxu0 }
0x3737   :  { %6862 = vst [vmem:[#allocation5] sm:$0xff] %v6853_v0 }
0x3738   :  { %8514 = shalt.err (!%p8511_p9)
}
0x3739   :  { %s9884_s9 = sld [smem:[#allocation23_spill]] }
0x373f   :  { %s8515_s15 = scalar_lea.hbm %s9884_s9, 256 }
0x3740   :  { %p8516_p10 = scmp.ne.s32.totalorder %s9884_s9, %s8515_s15  ;;  %p8519_p11 = scmp.lt.u32.totalorder %s8515_s15, %s9884_s9 }
0x3742   :  { %p8521_p12 = pnand %p8519_p11, %p8516_p10 }
0x3744   :  { %8524 = shalt.err (!%p8521_p12)
}
0x3745   :  { %s8534_s27 = smov 128   ;;  %s8535_s0 = smov 8  }
0x3746   :  { %6876 = dma.vmem_to_hbm [thread:$0]  %s6871_s14, 256, %s9884_s9, [#allocation6], %s8534_s27, %s8534_s27, %s8535_s0  }
0x3747   :  { %8527 = dma.done.wait [#allocation6], 256  }
0x3748   :  { %8528 = vsyncadd [#allocation6], 4294967040 }
0x3749   :  { %6880 = vsyncpa [#allocation6], 1 }

</bundles_post_ra>
